<compile_context>
chip_gen: v6e
topology: v6e:2x2x1
jax: 0.10.0
libtpu: 0.0.40
codegen_flags: <defaults>
</compile_context>

<pallas_src>
import math

import jax
import jax.numpy as jnp
from jax.experimental import pallas as pl
from jax.experimental.pallas import tpu as pltpu

EMB_DIM = 256            # timestep embedding dim
HALF = EMB_DIM // 2      # 128 -> one full lane vreg
HIDDEN = 1152            # 9 * 128
TM_MAX = 256             # M tile used only when the unique-row count is large


def _fps_embedder_kernel(t_ref, freqs_ref, w1c_ref, w1s_ref, b1_ref,
                         w2_ref, b2_ref, o_ref):
    # --- sinusoidal embedding: phase = t * freqs; emb = [cos(phase), sin(phase)] ---
    t = t_ref[...]                                   # (TM, 1) f32
    phase = t * freqs_ref[...]                       # (TM, 128) f32
    cos_e = jnp.cos(phase).astype(jnp.bfloat16)      # (TM, 128) bf16
    sin_e = jnp.sin(phase).astype(jnp.bfloat16)      # (TM, 128) bf16

    # --- Linear(256 -> 1152): emb @ W1 == cos @ W1[:128] + sin @ W1[128:]  (no concat) ---
    h = (jnp.dot(cos_e, w1c_ref[...], preferred_element_type=jnp.float32)
         + jnp.dot(sin_e, w1s_ref[...], preferred_element_type=jnp.float32)
         + b1_ref[...])                              # (TM, 1152) f32

    # --- SiLU ---
    h = h * jax.nn.sigmoid(h)

    # --- Linear(1152 -> 1152), W2 fully resident (no N split) ---
    y = jnp.dot(h.astype(jnp.bfloat16), w2_ref[...],
                preferred_element_type=jnp.float32) + b2_ref[...]   # (TM, 1152) f32
    o_ref[...] = y.astype(o_ref.dtype)


def fps_embedder_forward(fps, b, params):
    """Replicates FpsEmbedder.forward(fps, b).

    fps: (n,) float32; b: python int.
    Returns (b * n, 1152) float32.
    """
    w1, b1, w2, b2 = params   # w1: (256,1152), w2: (1152,1152), stored as (in, out)

    fps = fps.astype(jnp.float32)
    n = fps.shape[0]

    # Deduplicated: compute only the n unique rows; broadcast to b*n afterwards.
    if n > 512:
        TM = TM_MAX
        n_pad = ((n + TM - 1) // TM) * TM
    else:
        TM = n
        n_pad = n
    t = fps if n_pad == n else jnp.pad(fps, (0, n_pad - n))
    t2d = t[:, None]                                                 # (n_pad, 1)

    # Precomputed frequency table (hoisted out of the kernel).
    freqs = jnp.exp((-math.log(10000.0) / HALF)
                    * jnp.arange(HALF, dtype=jnp.float32))[None, :]  # (1, 128)

    # Stream weights as bf16 (halves HBM bytes; MXU-native input type). Biases stay f32.
    w1c = w1[:HALF, :].astype(jnp.bfloat16)                          # (128, 1152)
    w1s = w1[HALF:, :].astype(jnp.bfloat16)                          # (128, 1152)
    w2b = w2.astype(jnp.bfloat16)                                    # (1152, 1152)
    b1r = b1[None, :]                                                # (1, 1152)
    b2r = b2[None, :]                                                # (1, 1152)

    m_blocks = n_pad // TM
    grid = (m_blocks,)                                               # usually (1,)

    flops = 2 * n_pad * (EMB_DIM * HIDDEN + HIDDEN * HIDDEN)
    transcendentals = n_pad * (EMB_DIM + HIDDEN)          # cos+sin + sigmoid
    bytes_accessed = (2 * (EMB_DIM * HIDDEN + HIDDEN * HIDDEN)       # bf16 weights (once)
                      + 4 * 2 * HIDDEN                               # f32 biases
                      + 4 * (n_pad + HALF)                           # t + freqs
                      + 4 * n_pad * HIDDEN)                          # output

    out_n = pl.pallas_call(
        _fps_embedder_kernel,
        out_shape=jax.ShapeDtypeStruct((n_pad, HIDDEN), jnp.float32),
        grid=grid,
        in_specs=[
            pl.BlockSpec((TM, 1), lambda i: (i, 0)),                 # t
            pl.BlockSpec((1, HALF), lambda i: (0, 0)),               # freqs (resident)
            pl.BlockSpec((HALF, HIDDEN), lambda i: (0, 0)),          # W1 cos half (resident)
            pl.BlockSpec((HALF, HIDDEN), lambda i: (0, 0)),          # W1 sin half (resident)
            pl.BlockSpec((1, HIDDEN), lambda i: (0, 0)),             # b1 (resident)
            pl.BlockSpec((HIDDEN, HIDDEN), lambda i: (0, 0)),        # W2 (fully resident)
            pl.BlockSpec((1, HIDDEN), lambda i: (0, 0)),             # b2 (resident)
        ],
        out_specs=pl.BlockSpec((TM, HIDDEN), lambda i: (i, 0)),
        compiler_params=pltpu.CompilerParams(
            dimension_semantics=("parallel",),
            vmem_limit_bytes=32 << 20,
        ),
        cost_estimate=pl.CostEstimate(
            flops=int(flops),
            transcendentals=int(transcendentals),
            bytes_accessed=int(bytes_accessed),
        ),
    )(t2d, freqs, w1c, w1s, b1r, w2b, b2r)

    if n_pad != n:
        out_n = out_n[:n]

    # Batch repeat (fps.unsqueeze(0).repeat(b, 1).reshape(-1)) -> block-repeat rows.
    # Plain XLA broadcast/copy; no redundant compute.
    return jnp.tile(out_n, (b, 1))                                   # (b*n, 1152)


def init_params(key):
    """Deterministic init matching nn.Linear shapes (weights stored as (in, out))."""
    k1, k2, k3, k4 = jax.random.split(key, 4)
    lim1 = 1.0 / math.sqrt(EMB_DIM)
    lim2 = 1.0 / math.sqrt(HIDDEN)
    w1 = jax.random.uniform(k1, (EMB_DIM, HIDDEN), jnp.float32, -lim1, lim1)
    b1 = jax.random.uniform(k2, (HIDDEN,), jnp.float32, -lim1, lim1)
    w2 = jax.random.uniform(k3, (HIDDEN, HIDDEN), jnp.float32, -lim2, lim2)
    b2 = jax.random.uniform(k4, (HIDDEN,), jnp.float32, -lim2, lim2)
    return w1, b1, w2, b2


def _reference_bf16(fps, b, params):
    """Pure-JAX reference emulating the kernel's bf16 weight/activation streaming."""
    w1, b1, w2, b2 = params
    t = jnp.tile(fps[None, :], (b, 1)).reshape(-1).astype(jnp.float32)
    k = jnp.arange(HALF, dtype=jnp.float32)
    freqs = jnp.exp(-math.log(10000.0) * k / HALF)
    phase = t[:, None] * freqs[None, :]
    emb = jnp.concatenate([jnp.cos(phase), jnp.sin(phase)], axis=-1)
    h = jnp.dot(emb.astype(jnp.bfloat16), w1.astype(jnp.bfloat16),
                preferred_element_type=jnp.float32) + b1
    h = h * jax.nn.sigmoid(h)
    return jnp.dot(h.astype(jnp.bfloat16), w2.astype(jnp.bfloat16),
                   preferred_element_type=jnp.float32) + b2


def _reference_f32(fps, b, params):
    """Full-precision reference (matches the PyTorch module in f32)."""
    w1, b1, w2, b2 = params
    t = jnp.tile(fps[None, :], (b, 1)).reshape(-1).astype(jnp.float32)
    k = jnp.arange(HALF, dtype=jnp.float32)
    freqs = jnp.exp(-math.log(10000.0) * k / HALF)
    phase = t[:, None] * freqs[None, :]
    emb = jnp.concatenate([jnp.cos(phase), jnp.sin(phase)], axis=-1)
    h = emb @ w1 + b1
    h = h * jax.nn.sigmoid(h)
    return h @ w2 + b2


if __name__ == "__main__":
    key = jax.random.PRNGKey(0)
    pkey, fkey = jax.random.split(key)
    params = init_params(pkey)

    # Small example: fps vector of length 4, batch b=2 -> output has 8 rows.
    fps = jax.random.uniform(fkey, (4,), jnp.float32, 8.0, 30.0)
    b = 2

    out = fps_embedder_forward(fps, b, params)
    out = jax.block_until_ready(out)

    assert out.shape == (b * fps.shape[0], HIDDEN)

    ref_bf16 = _reference_bf16(fps, b, params)
    assert jnp.allclose(out, ref_bf16, atol=1e-2, rtol=1e-2), (
        float(jnp.max(jnp.abs(out - ref_bf16))))

    ref_f32 = _reference_f32(fps, b, params)
    assert jnp.allclose(out, ref_f32, atol=5e-2, rtol=5e-2), (
        float(jnp.max(jnp.abs(out - ref_f32))))

    print("KERNEL_OK")
</pallas_src>

<mosaic_0001>
module attributes {stable_mosaic.version = 11 : i64} {
  func.func @_fps_embedder_kernel(%arg0: i32, %arg1: memref<4x1xf32, #tpu.memory_space<vmem>>, %arg2: memref<1x128xf32, #tpu.memory_space<vmem>>, %arg3: memref<128x1152xbf16, #tpu.memory_space<vmem>>, %arg4: memref<128x1152xbf16, #tpu.memory_space<vmem>>, %arg5: memref<1x1152xf32, #tpu.memory_space<vmem>>, %arg6: memref<1152x1152xbf16, #tpu.memory_space<vmem>>, %arg7: memref<1x1152xf32, #tpu.memory_space<vmem>>, %arg8: memref<4x1152xf32, #tpu.memory_space<vmem>>) attributes {dimension_semantics = [#tpu.dimension_semantics<parallel>], iteration_bounds = array<i64: 1>, scalar_prefetch = 0 : i64, scratch_operands = 0 : i64, tpu.core_type = #tpu.core_type<tc>, window_params = [{transform_indices = @transform_0, window_bounds = array<i64: 4, 1>}, {pipeline_mode = #tpu.pipeline_mode<synchronous>, transform_indices = @transform_1, window_bounds = array<i64: 1, 128>}, {pipeline_mode = #tpu.pipeline_mode<synchronous>, transform_indices = @transform_2, window_bounds = array<i64: 128, 1152>}, {pipeline_mode = #tpu.pipeline_mode<synchronous>, transform_indices = @transform_3, window_bounds = array<i64: 128, 1152>}, {pipeline_mode = #tpu.pipeline_mode<synchronous>, transform_indices = @transform_4, window_bounds = array<i64: 1, 1152>}, {pipeline_mode = #tpu.pipeline_mode<synchronous>, transform_indices = @transform_5, window_bounds = array<i64: 1152, 1152>}, {pipeline_mode = #tpu.pipeline_mode<synchronous>, transform_indices = @transform_6, window_bounds = array<i64: 1, 1152>}, {transform_indices = @transform_7, window_bounds = array<i64: 4, 1152>}]} {
    %c0 = arith.constant 0 : index
    %c0_0 = arith.constant 0 : index
    %0 = vector.load %arg1[%c0, %c0_0] : memref<4x1xf32, #tpu.memory_space<vmem>>, vector<4x1xf32>
    %c0_1 = arith.constant 0 : index
    %c0_2 = arith.constant 0 : index
    %1 = vector.load %arg2[%c0_1, %c0_2] : memref<1x128xf32, #tpu.memory_space<vmem>>, vector<1x128xf32>
    %2 = vector.broadcast %0 : vector<4x1xf32> to vector<4x128xf32>
    %3 = vector.broadcast %1 : vector<1x128xf32> to vector<4x128xf32>
    %4 = arith.mulf %2, %3 : vector<4x128xf32>
    %5 = math.cos %4 : vector<4x128xf32>
    %6 = arith.truncf %5 : vector<4x128xf32> to vector<4x128xbf16>
    %7 = math.sin %4 : vector<4x128xf32>
    %8 = arith.truncf %7 : vector<4x128xf32> to vector<4x128xbf16>
    %c0_3 = arith.constant 0 : index
    %c0_4 = arith.constant 0 : index
    %9 = vector.load %arg3[%c0_3, %c0_4] : memref<128x1152xbf16, #tpu.memory_space<vmem>>, vector<128x1152xbf16>
    %cst = arith.constant dense<0.000000e+00> : vector<4x1152xf32>
    %10 = tpu.matmul %6, %9, %cst {dimension_numbers = #tpu.dot_dimension_numbers<[1], [0], [0], [1], [0, 0, 1, 1], [], []>} : vector<4x128xbf16>, vector<128x1152xbf16>, vector<4x1152xf32> -> vector<4x1152xf32>
    %c0_5 = arith.constant 0 : index
    %c0_6 = arith.constant 0 : index
    %11 = vector.load %arg4[%c0_5, %c0_6] : memref<128x1152xbf16, #tpu.memory_space<vmem>>, vector<128x1152xbf16>
    %cst_7 = arith.constant dense<0.000000e+00> : vector<4x1152xf32>
    %12 = tpu.matmul %8, %11, %cst_7 {dimension_numbers = #tpu.dot_dimension_numbers<[1], [0], [0], [1], [0, 0, 1, 1], [], []>} : vector<4x128xbf16>, vector<128x1152xbf16>, vector<4x1152xf32> -> vector<4x1152xf32>
    %13 = arith.addf %10, %12 : vector<4x1152xf32>
    %c0_8 = arith.constant 0 : index
    %c0_9 = arith.constant 0 : index
    %14 = vector.load %arg5[%c0_8, %c0_9] : memref<1x1152xf32, #tpu.memory_space<vmem>>, vector<1x1152xf32>
    %15 = vector.broadcast %14 : vector<1x1152xf32> to vector<4x1152xf32>
    %16 = arith.addf %13, %15 : vector<4x1152xf32>
    %17 = arith.negf %16 : vector<4x1152xf32>
    %18 = math.exp %17 : vector<4x1152xf32>
    %cst_10 = arith.constant 1.000000e+00 : f32
    %19 = vector.broadcast %cst_10 : f32 to vector<4x1152xf32>
    %20 = arith.addf %19, %18 : vector<4x1152xf32>
    %21 = arith.divf %19, %20 : vector<4x1152xf32>
    %22 = arith.mulf %16, %21 : vector<4x1152xf32>
    %23 = arith.truncf %22 : vector<4x1152xf32> to vector<4x1152xbf16>
    %c0_11 = arith.constant 0 : index
    %c0_12 = arith.constant 0 : index
    %24 = vector.load %arg6[%c0_11, %c0_12] : memref<1152x1152xbf16, #tpu.memory_space<vmem>>, vector<1152x1152xbf16>
    %cst_13 = arith.constant dense<0.000000e+00> : vector<4x1152xf32>
    %25 = tpu.matmul %23, %24, %cst_13 {dimension_numbers = #tpu.dot_dimension_numbers<[1], [0], [0], [1], [0, 0, 1, 1], [], []>} : vector<4x1152xbf16>, vector<1152x1152xbf16>, vector<4x1152xf32> -> vector<4x1152xf32>
    %c0_14 = arith.constant 0 : index
    %c0_15 = arith.constant 0 : index
    %26 = vector.load %arg7[%c0_14, %c0_15] : memref<1x1152xf32, #tpu.memory_space<vmem>>, vector<1x1152xf32>
    %27 = vector.broadcast %26 : vector<1x1152xf32> to vector<4x1152xf32>
    %28 = arith.addf %25, %27 : vector<4x1152xf32>
    %c0_16 = arith.constant 0 : index
    %c0_17 = arith.constant 0 : index
    %29 = vector.load %arg8[%c0_16, %c0_17] : memref<4x1152xf32, #tpu.memory_space<vmem>>, vector<4x1152xf32>
    tpu.vector_store %arg8[%c0_16, %c0_17], %28 {strides = array<i32>} : memref<4x1152xf32, #tpu.memory_space<vmem>>, vector<4x1152xf32>,
    return
  }
  func.func @transform_0(%arg0: i32) -> (i32, i32) {
    %c0_i32 = arith.constant 0 : i32
    %c0_i32_0 = arith.constant 0 : i32
    return %arg0, %c0_i32 : i32, i32
  }
  func.func @transform_1(%arg0: i32) -> (i32, i32) {
    %c0_i32 = arith.constant 0 : i32
    %c0_i32_0 = arith.constant 0 : i32
    %c0_i32_1 = arith.constant 0 : i32
    return %c0_i32, %c0_i32_0 : i32, i32
  }
  func.func @transform_2(%arg0: i32) -> (i32, i32) {
    %c0_i32 = arith.constant 0 : i32
    %c0_i32_0 = arith.constant 0 : i32
    %c0_i32_1 = arith.constant 0 : i32
    return %c0_i32, %c0_i32_0 : i32, i32
  }
  func.func @transform_3(%arg0: i32) -> (i32, i32) {
    %c0_i32 = arith.constant 0 : i32
    %c0_i32_0 = arith.constant 0 : i32
    %c0_i32_1 = arith.constant 0 : i32
    return %c0_i32, %c0_i32_0 : i32, i32
  }
  func.func @transform_4(%arg0: i32) -> (i32, i32) {
    %c0_i32 = arith.constant 0 : i32
    %c0_i32_0 = arith.constant 0 : i32
    %c0_i32_1 = arith.constant 0 : i32
    return %c0_i32, %c0_i32_0 : i32, i32
  }
  func.func @transform_5(%arg0: i32) -> (i32, i32) {
    %c0_i32 = arith.constant 0 : i32
    %c0_i32_0 = arith.constant 0 : i32
    %c0_i32_1 = arith.constant 0 : i32
    return %c0_i32, %c0_i32_0 : i32, i32
  }
  func.func @transform_6(%arg0: i32) -> (i32, i32) {
    %c0_i32 = arith.constant 0 : i32
    %c0_i32_0 = arith.constant 0 : i32
    %c0_i32_1 = arith.constant 0 : i32
    return %c0_i32, %c0_i32_0 : i32, i32
  }
  func.func @transform_7(%arg0: i32) -> (i32, i32) {
    %c0_i32 = arith.constant 0 : i32
    %c0_i32_0 = arith.constant 0 : i32
    return %arg0, %c0_i32 : i32, i32
  }
}

</mosaic_0001>

<bundles_post_ra>
// kernel: tpu_custom_call.1
= control target key start
LH: loop header
LB: loop body
LE: loop exit
PB: predicated region body
PF: predicated region fallthrough
CT: control target
= control target key end

     0   :  { %12 = vsyncpa [#allocation3], 0  ;;  %s9643_s0 = inlined_call_operand.vmem [shape: f32[4,1], index: 0, kind: input, shape index: {}]   ;;  %s9644_s1 = inlined_call_operand.hbm [shape: f32[1,128], index: 1, kind: input, shape index: {}]   ;;  %s9645_s2 = inlined_call_operand.hbm [shape: bf16[128,1152], index: 2, kind: input, shape index: {}]   ;;  %s9646_s3 = inlined_call_operand.hbm [shape: bf16[128,1152], index: 3, kind: input, shape index: {}]   ;;  %s9647_s4 = inlined_call_operand.hbm [shape: f32[1,1152], index: 4, kind: input, shape index: {}]   ;;  %s9648_s5 = inlined_call_operand.hbm [shape: bf16[1152,1152], index: 5, kind: input, shape index: {}]   ;;  %s9649_s6 = inlined_call_operand.hbm [shape: f32[1,1152], index: 6, kind: input, shape index: {}]   ;;  %s9650_s7 = inlined_call_operand.hbm [shape: f32[4,1152], index: 7, kind: output, shape index: {}]  }
   0x1   :  { %13 = vsyncpa [#allocation6], 0 }
   0x2   :  { %14 = vsyncpa [#allocation9], 0 }
   0x3   :  { %15 = vsyncpa [#allocation12], 0 }
   0x4   :  { %16 = vsyncpa [#allocation4], 0  ;;  %s9246_s24 = smov [#allocation5]  }
   0x5   :  { %s34_s25 = sshll.u32 %s9246_s24, 4  ;;  %s35_s25 = int_to_ptr.vmem [resolvable:$true] %s34_s25 }
   0x6   :  { %s9104_s26 = scalar_lea.vmem %s35_s25, 9216  ;;  %p9109_p1 = scmp.lt.s32.totalorder %s35_s25, %s35_s25 }
   0x7   :  { %p9105_p0 = scmp.ne.s32.totalorder %s35_s25, %s9104_s26  ;;  %p9110_p2 = scmp.lt.s32.totalorder %s9104_s26, %s9104_s26 }
   0x9   :  { %p9111_p3 = por %p9110_p2, %p9109_p1 }
   0xb   :  { %p9112_p4 = pnand %p9111_p3, %p9105_p0 }
   0xd   :  { %9115 = shalt.err (!%p9112_p4)
}
   0xe   :  { %s9247_s27 = smov 576   ;;  %s9248_s28 = smov 36  }
   0xf   :  { %40 = dma.hbm_to_vmem [thread:$0]  %s9645_s2, 9216, %s35_s25, [#allocation6], %s9247_s27, %s9247_s27, %s9248_s28  }
  0x10   :  { %s9249_s8 = smov [#allocation8]   ;;  %s9250_s10 = smov [#allocation2]  }
  0x11   :  { %s59_s9 = sshll.u32 %s9249_s8, 4  ;;  %s25_s11 = sshll.u32 %s9250_s10, 4  ;;  %s60_s9 = int_to_ptr.vmem [resolvable:$true] %s59_s9  ;;  %s26_s11 = int_to_ptr.vmem [resolvable:$true] %s25_s11 }
  0x12   :  { %s9124_s12 = scalar_lea.vmem %s60_s9, 144  ;;  %s9128_s13 = scalar_lea.vmem %s60_s9, 160 }
  0x13   :  { %p9125_p5 = scmp.ne.s32.totalorder %s60_s9, %s9124_s12  ;;  %p9129_p6 = scmp.lt.s32.totalorder %s60_s9, %s60_s9 }
  0x14   :  { %p9130_p7 = scmp.lt.s32.totalorder %s9128_s13, %s9124_s12 }
  0x16   :  { %p9131_p8 = por %p9130_p7, %p9129_p6 }
  0x18   :  { %p9132_p9 = pnand %p9131_p8, %p9125_p5 }
  0x1a   :  { %9135 = shalt.err (!%p9132_p9)
}
  0x1b   :  { %62 = dma.hbm_to_vmem [thread:$0]  %s9647_s4, 144, %s60_s9, [#allocation9]  }
  0x1c   :  { %s9144_s16 = scalar_lea.vmem %s26_s11, 16  ;;  %s9148_s2 = scalar_lea.vmem %s26_s11, 32 }
  0x1d   :  { %p9145_p10 = scmp.ne.s32.totalorder %s26_s11, %s9144_s16  ;;  %p9149_p11 = scmp.lt.s32.totalorder %s26_s11, %s26_s11 }
  0x1e   :  { %p9150_p12 = scmp.lt.s32.totalorder %s9148_s2, %s9144_s16 }
  0x20   :  { %p9151_p13 = por %p9150_p12, %p9149_p11 }
  0x22   :  { %p9152_p0 = pnand %p9151_p13, %p9145_p10 }
  0x24   :  { %9155 = shalt.err (!%p9152_p0)
}
  0x25   :  { %28 = dma.hbm_to_vmem [thread:$0]  %s9644_s1, 16, %s26_s11, [#allocation3]  }
  0x26   :  { %s9251_s19 = smov [#allocation7]   ;;  %s9252_s21 = smov [#allocation10]  }
  0x27   :  { %s46_s20 = sshll.u32 %s9251_s19, 4  ;;  %s68_s22 = sshll.u32 %s9252_s21, 4  ;;  %s47_s20 = int_to_ptr.vmem [resolvable:$true] %s46_s20  ;;  %s69_s22 = int_to_ptr.vmem [resolvable:$true] %s68_s22 }
  0x28   :  { %s9164_s23 = scalar_lea.vmem %s47_s20, 9216  ;;  %p9169_p2 = scmp.lt.s32.totalorder %s47_s20, %s47_s20 }
  0x29   :  { %p9165_p1 = scmp.ne.s32.totalorder %s47_s20, %s9164_s23  ;;  %p9170_p3 = scmp.lt.s32.totalorder %s9164_s23, %s9164_s23 }
  0x2b   :  { %p9171_p4 = por %p9170_p3, %p9169_p2 }
  0x2d   :  { %p9172_p5 = pnand %p9171_p4, %p9165_p1 }
  0x2f   :  { %9175 = shalt.err (!%p9172_p5)
}
  0x30   :  { %52 = dma.hbm_to_vmem [thread:$0]  %s9646_s3, 9216, %s47_s20, [#allocation6], %s9247_s27, %s9247_s27, %s9248_s28  }
  0x31   :  { %s9184_s1 = scalar_lea.vmem %s69_s22, 82944  ;;  %p9189_p7 = scmp.lt.s32.totalorder %s69_s22, %s69_s22 }
  0x32   :  { %p9185_p6 = scmp.ne.s32.totalorder %s69_s22, %s9184_s1  ;;  %p9190_p8 = scmp.lt.s32.totalorder %s9184_s1, %s9184_s1 }
  0x34   :  { %p9191_p9 = por %p9190_p8, %p9189_p7 }
  0x36   :  { %p9192_p10 = pnand %p9191_p9, %p9185_p6 }
  0x38   :  { %9195 = shalt.err (!%p9192_p10)
}
  0x39   :  { %74 = dma.hbm_to_vmem [thread:$0]  %s9648_s5, 82944, %s69_s22, [#allocation9], %s9247_s27, %s9247_s27, %s9248_s28  }
  0x3a   :  { %s9253_s29 = smov [#allocation11]  }
  0x3b   :  { %s81_s30 = sshll.u32 %s9253_s29, 4  ;;  %s82_s30 = int_to_ptr.vmem [resolvable:$true] %s81_s30 }
  0x3c   :  { %s9204_s8 = scalar_lea.vmem %s82_s30, 144  ;;  %s9208_s3 = scalar_lea.vmem %s82_s30, 160 }
  0x3d   :  { %p9205_p11 = scmp.ne.s32.totalorder %s82_s30, %s9204_s8  ;;  %p9209_p12 = scmp.lt.s32.totalorder %s82_s30, %s82_s30 }
  0x3e   :  { %p9210_p13 = scmp.lt.s32.totalorder %s9208_s3, %s9204_s8 }
  0x40   :  { %p9211_p0 = por %p9210_p13, %p9209_p12 }
  0x42   :  { %p9212_p1 = pnand %p9211_p0, %p9205_p11 }
  0x44   :  { %9215 = shalt.err (!%p9212_p1)
}
  0x45   :  { %84 = dma.hbm_to_vmem [thread:$0]  %s9649_s6, 144, %s82_s30, [#allocation12]  }
  0x46   :  { %9236 = dma.done.wait [#allocation3], 16  }
  0x47   :  { %9237 = vsyncadd [#allocation3], 4294967280 }
  0x48   :  { %9238 = dma.done.wait [#allocation6], 18432  }
  0x49   :  { %9239 = vsyncadd [#allocation6], 4294948864 }
  0x4a   :  { %9240 = dma.done.wait [#allocation9], 83088  }
  0x4b   :  { %9241 = vsyncadd [#allocation9], 4294884208 }
  0x4c   :  { %9242 = dma.done.wait [#allocation12], 144  }
  0x4d   :  { %9243 = vsyncadd [#allocation12], 4294967152  ;;  %v9254_v0 = vmov 0   ;;  %v104_v1 = vld [vmem:[%s9643_s0] sm:$0xf]  ;;  %s9263_s0 = smov [#allocation13]  }
  0x4e   :  { %7910 = vset.pattern.permute.xlu0 %v9254_v0  ;;  %887 = vmatprep.mubr.bf16.mxu0 %v9254_v0  ;;  %v7911_v2 = vld [vmem:[#allocation7 + $0x1fc] ss:$36 sps:$4 sm:$0xff]   ;;  %v7913_v3 = vld [vmem:[#allocation7 + $0x204] ss:$36 sps:$4 sm:$0xff]   ;;  %v7917_v6 = vld [vmem:[#allocation7 + $0x1b4] ss:$36 sps:$4 sm:$0xff]  }
  0x4f   :  { %928 = vmatprep.mubr.bf16.mxu1 %v9254_v0  ;;  %108 = vperm.xlu0 %7910, %v104_v1   ;;  %v7915_v4 = vld [vmem:[#allocation7 + $0x1f8] ss:$36 sps:$4 sm:$0xff]   ;;  %v7916_v5 = vld [vmem:[#allocation7 + $0x200] ss:$36 sps:$4 sm:$0xff]   ;;  %v7921_v8 = vld [vmem:[#allocation7 + $0x1b0] ss:$36 sps:$4 sm:$0xff]  }
  0x50   :  { %855 = vmatprep.subr.bf16.mxu0 %v7911_v2  ;;  %896 = vmatprep.subr.bf16.mxu1 %v7913_v3  ;;  %v7919_v7 = vld [vmem:[#allocation7 + $0x1bc] ss:$36 sps:$4 sm:$0xff]   ;;  %v7923_v10 = vld [vmem:[#allocation7 + $0x16c] ss:$36 sps:$4 sm:$0xff]   ;;  %v7925_v11 = vld [vmem:[#allocation7 + $0x174] ss:$36 sps:$4 sm:$0xff]  }
  0x51   :  { %856 = vmatpush1.bf16.msra.mxu0 %v7915_v4  ;;  %897 = vmatpush1.bf16.msra.mxu1 %v7916_v5  ;;  %v7922_v9 = vld [vmem:[#allocation7 + $0x1b8] ss:$36 sps:$4 sm:$0xff]   ;;  %v7927_v12 = vld [vmem:[#allocation7 + $0x168] ss:$36 sps:$4 sm:$0xff]   ;;  %v7928_v13 = vld [vmem:[#allocation7 + $0x170] ss:$36 sps:$4 sm:$0xff]  }
  0x52   :  { %857 = vmatprep.subr.bf16.mxu0 %v7917_v6  ;;  %898 = vmatprep.subr.bf16.mxu1 %v7919_v7  ;;  %v7929_v14 = vld [vmem:[#allocation7 + $0x124] ss:$36 sps:$4 sm:$0xff]   ;;  %v7931_v15 = vld [vmem:[#allocation7 + $0x12c] ss:$36 sps:$4 sm:$0xff]   ;;  %v7935_v18 = vld [vmem:[#allocation7 + $0xdc] ss:$36 sps:$4 sm:$0xff]  }
  0x53   :  { %v7933_v16 = vld [vmem:[#allocation7 + $0x120] ss:$36 sps:$4 sm:$0xff]   ;;  %v7934_v17 = vld [vmem:[#allocation7 + $0x128] ss:$36 sps:$4 sm:$0xff]   ;;  %v7939_v20 = vld [vmem:[#allocation7 + $0xd8] ss:$36 sps:$4 sm:$0xff]  }
  0x54   :  { %v7937_v19 = vld [vmem:[#allocation7 + $0xe4] ss:$36 sps:$4 sm:$0xff]   ;;  %v7941_v22 = vld [vmem:[#allocation7 + $0x94] ss:$36 sps:$4 sm:$0xff]   ;;  %v7943_v23 = vld [vmem:[#allocation7 + $0x9c] ss:$36 sps:$4 sm:$0xff]  }
  0x55   :  { %858 = vmatpush1.bf16.msra.mxu0 %v7921_v8  ;;  %899 = vmatpush1.bf16.msra.mxu1 %v7922_v9  ;;  %v7940_v21 = vld [vmem:[#allocation7 + $0xe0] ss:$36 sps:$4 sm:$0xff]   ;;  %v7945_v24 = vld [vmem:[#allocation7 + $0x90] ss:$36 sps:$4 sm:$0xff]   ;;  %v7946_v25 = vld [vmem:[#allocation7 + $0x98] ss:$36 sps:$4 sm:$0xff]  }
  0x56   :  { %859 = vmatprep.subr.bf16.mxu0 %v7923_v10  ;;  %900 = vmatprep.subr.bf16.mxu1 %v7925_v11  ;;  %v7947_v26 = vld [vmem:[#allocation7 + $0x4c] ss:$36 sps:$4 sm:$0xff]   ;;  %v7949_v27 = vld [vmem:[#allocation7 + $0x54] ss:$36 sps:$4 sm:$0xff]   ;;  %v7953_v30 = vld [vmem:[#allocation7 + $0x4] ss:$36 sps:$4 sm:$0xff]  }
  0x57   :  { %v7951_v28 = vld [vmem:[#allocation7 + $0x48] ss:$36 sps:$4 sm:$0xff]   ;;  %v7952_v29 = vld [vmem:[#allocation7 + $0x50] ss:$36 sps:$4 sm:$0xff]   ;;  %v7957_v32 = vld [vmem:[#allocation7] ss:$36 sps:$4 sm:$0xff]  }
  0x58   :  { %v7955_v31 = vld [vmem:[#allocation7 + $0xc] ss:$36 sps:$4 sm:$0xff]   ;;  %v7964_v35 = vld [vmem:[#allocation7 + $0x214] ss:$36 sps:$4 sm:$0xff]   ;;  %v6901_v36 = vld [vmem:[#allocation2] ss:$0 sm:$0xff] }
  0x59   :  { %860 = vmatpush1.bf16.msra.mxu0 %v7927_v12  ;;  %901 = vmatpush1.bf16.msra.mxu1 %v7928_v13  ;;  %v7958_v33 = vld [vmem:[#allocation7 + $0x8] ss:$36 sps:$4 sm:$0xff]   ;;  %v9255_v49 = vmov 683565275   ;;  %v9256_v51 = vmov 2475754826  }
  0x5a   :  { %861 = vmatprep.subr.bf16.mxu0 %v7929_v14  ;;  %902 = vmatprep.subr.bf16.mxu1 %v7931_v15  ;;  %v7961_v34 = vld [vmem:[#allocation7 + $0x20c] ss:$36 sps:$4 sm:$0xff]   ;;  %v9257_v54 = vmov 2131351028   ;;  %v9258_v57 = vmov 2102212464  }
  0x5b   :  { %v9259_v60 = vmov 920167782   ;;  %v9260_v63 = vmov 1326507024   ;;  %s6889_s6 = sshll.u32 %s9263_s0, 4  ;;  %s6890_s6 = int_to_ptr.vmem [resolvable:$true] %s6889_s6 }
  0x5c   :  { %s9216_s28 = scalar_lea.vmem %s6890_s6, 576  ;;  %p9221_p3 = scmp.lt.s32.totalorder %s6890_s6, %s6890_s6 }
  0x5d   :  { %862 = vmatpush1.bf16.msra.mxu0 %v7933_v16  ;;  %903 = vmatpush1.bf16.msra.mxu1 %v7934_v17  ;;  %p9217_p2 = scmp.ne.s32.totalorder %s6890_s6, %s9216_s28  ;;  %p9222_p4 = scmp.lt.s32.totalorder %s9216_s28, %s9216_s28 }
  0x5e   :  { %863 = vmatprep.subr.bf16.mxu0 %v7935_v18  ;;  %904 = vmatprep.subr.bf16.mxu1 %v7937_v19 }
  0x5f   :  { %p9223_p5 = por %p9222_p4, %p9221_p3 }
  0x61   :  { %864 = vmatpush1.bf16.msra.mxu0 %v7939_v20  ;;  %905 = vmatpush1.bf16.msra.mxu1 %v7940_v21  ;;  %p9224_p6 = pnand %p9223_p5, %p9217_p2 }
  0x62   :  { %865 = vmatprep.subr.bf16.mxu0 %v7941_v22  ;;  %906 = vmatprep.subr.bf16.mxu1 %v7943_v23 }
  0x65   :  { %866 = vmatpush1.bf16.msra.mxu0 %v7945_v24  ;;  %907 = vmatpush1.bf16.msra.mxu1 %v7946_v25 }
  0x66   :  { %867 = vmatprep.subr.bf16.mxu0 %v7947_v26  ;;  %908 = vmatprep.subr.bf16.mxu1 %v7949_v27 }
  0x69   :  { %868 = vmatpush1.bf16.msra.mxu0 %v7951_v28  ;;  %909 = vmatpush1.bf16.msra.mxu1 %v7952_v29 }
  0x6a   :  { %869 = vmatprep.subr.bf16.mxu0 %v7953_v30  ;;  %910 = vmatprep.subr.bf16.mxu1 %v7955_v31 }
  0x6d   :  { %870 = vmatpush1.bf16.msra.mxu0 %v7957_v32  ;;  %911 = vmatpush1.bf16.msra.mxu1 %v7958_v33 }
  0x6e   :  { %937 = vmatprep.subr.bf16.mxu0 %v7961_v34  ;;  %978 = vmatprep.subr.bf16.mxu1 %v7964_v35 }
  0xca   :  { %v109_v37 = vpop.permute.xlu0 %108 }
  0xcb   :  { %v9337_v38 = vmul.f32 %v6901_v36, %v109_v37 }
  0xcd   :  { %v121_v39 = vand.u32 2139095040, %v9337_v38  ;;  %v118_v43 = vand.u32 2147483647, %v9337_v38  ;;  %vm120_vm7 = vcmp.lt.s32.totalorder %v9337_v38, 0  ;;  %vm210_vm15 = vweird.f32 %v9337_v38 }
  0xcf   :  { %v122_v40 = vshrl.u32 %v121_v39, 23  ;;  %v125_v46 = vand.u32 8388607, %v118_v43  ;;  %vm119_vm8 = vcmp.le.f32.partialorder %v118_v43, 0.7853982 }
  0xd1   :  { %v6902_v41 = vadd.s32 4294967169, %v122_v40  ;;  %v126_v2 = vor.u32 8388608, %v125_v46 }
  0xd3   :  { %v128_v42 = vadd.s32 1, %v6902_v41  ;;  %v166_v16 = vshll.u32 %v126_v2, 8 }
  0xd5   :  { %vm129_vm0 = vcmp.gt.s32.totalorder %v128_v42, 0 }
  0xd6   :  { %v130_v44 = vsel %vm129_vm0, %v128_v42, 0  ;;  %vm9262_vm0 = vmmov 0  }
  0xd7   :  { %v132_v45 = vand.u32 31, %v130_v44  ;;  %v131_v48 = vshrl.u32 %v130_v44, 5 }
  0xd9   :  { %v133_v47 = vsub.s32 32, %v132_v45  ;;  %v135_v50 = vshll.u32 %v9255_v49, %v132_v45  ;;  %v138_v52 = vshll.u32 %v9256_v51, %v132_v45  ;;  %v141_v56 = vshll.u32 %v9257_v54, %v132_v45 }
  0xda   :  { %v144_v59 = vshll.u32 %v9258_v57, %v132_v45  ;;  %v147_v62 = vshll.u32 %v9259_v60, %v132_v45  ;;  %vm150_vm1 = vcmp.lt.s32.totalorder %v131_v48, 1  ;;  %vm153_vm2 = vcmp.lt.s32.totalorder %v131_v48, 4 }
  0xdb   :  { %v136_v53 = vshrl.u32 %v9256_v51, %v133_v47  ;;  %v139_v55 = vshrl.u32 %v9257_v54, %v133_v47  ;;  %v142_v58 = vshrl.u32 %v9258_v57, %v133_v47  ;;  %v145_v61 = vshrl.u32 %v9259_v60, %v133_v47 }
  0xdc   :  { %v148_v1 = vshrl.u32 %v9260_v63, %v133_v47  ;;  %vm152_vm3 = vcmp.lt.s32.totalorder %v131_v48, 3  ;;  %v134_v11 = vshrl.u32 %v9255_v49, %v133_v47  ;;  %vm151_vm4 = vcmp.lt.s32.totalorder %v131_v48, 2 }
  0xdd   :  { %v137_v3 = vor.u32 %v136_v53, %v135_v50  ;;  %v140_v4 = vor.u32 %v139_v55, %v138_v52  ;;  %v143_v5 = vor.u32 %v142_v58, %v141_v56  ;;  %v146_v6 = vor.u32 %v145_v61, %v144_v59 }
  0xde   :  { %v149_v7 = vor.u32 %v148_v1, %v147_v62 }
  0xdf   :  { %v155_v8 = vsel %vm153_vm2, %v143_v5, 2102212464  ;;  %v158_v9 = vsel %vm150_vm1, %v137_v3, %v140_v4  ;;  %v162_v10 = vsel %vm150_vm1, %v140_v4, %v143_v5  ;;  %v159_v12 = vsel %vm153_vm2, %v146_v6, 920167782 }
  0xe0   :  { %v163_v13 = vsel %vm153_vm2, %v149_v7, 1326507024  ;;  %v160_v14 = vsel %vm152_vm3, %v143_v5, %v159_v12  ;;  %v154_v17 = vsel %vm150_vm1, %v134_v11, %v137_v3  ;;  %v156_v18 = vsel %vm152_vm3, %v140_v4, %v155_v8  ;;  %v7959_v4 = vld [vmem:[#allocation7 + $0x208] ss:$36 sps:$4 sm:$0xff]   ;;  %v7962_v5 = vld [vmem:[#allocation7 + $0x210] ss:$36 sps:$4 sm:$0xff]  }
  0xe1   :  { %v164_v15 = vsel %vm152_vm3, %v146_v6, %v163_v13  ;;  %v161_v19 = vsel %vm151_vm4, %v158_v9, %v160_v14  ;;  %v157_v25 = vsel %vm151_vm4, %v154_v17, %v156_v18  ;;  %v7967_v9 = vld [vmem:[#allocation7 + $0x1c4] ss:$36 sps:$4 sm:$0xff]   ;;  %v7973_v17 = vld [vmem:[#allocation7 + $0x17c] ss:$36 sps:$4 sm:$0xff]  }
  0xe2   :  { %v165_v20 = vsel %vm151_vm4, %v162_v10, %v164_v15  ;;  %v9346_v23 = vmul.u32.u64.low %v166_v16, %v161_v19  ;;  %v9347_v24 = vmul.u32.u64.high %v166_v16, %v161_v19, %v9346_v23  ;;  %v173_v27 = vmul.u32 %v166_v16, %v157_v25  ;;  %v7970_v10 = vld [vmem:[#allocation7 + $0x1cc] ss:$36 sps:$4 sm:$0xff]   ;;  %v7965_v15 = vld [vmem:[#allocation7 + $0x1c0] ss:$36 sps:$4 sm:$0xff]   ;;  %v7988_v25 = vld [vmem:[#allocation7 + $0xf4] ss:$36 sps:$4 sm:$0xff]  }
  0xe3   :  { %v9343_v21 = vmul.u32.u64.low %v166_v16, %v165_v20  ;;  %v9344_v22 = vmul.u32.u64.high %v166_v16, %v165_v20, %v9343_v21  ;;  %v7968_v16 = vld [vmem:[#allocation7 + $0x1c8] ss:$36 sps:$4 sm:$0xff]   ;;  %v7974_v19 = vld [vmem:[#allocation7 + $0x180] ss:$36 sps:$4 sm:$0xff]   ;;  %v7979_v20 = vld [vmem:[#allocation7 + $0x134] ss:$36 sps:$4 sm:$0xff]  }
  0xe4   :  { %v176_v26 = vadd.s32 1, %v9347_v24  ;;  %v7976_v18 = vld [vmem:[#allocation7 + $0x184] ss:$36 sps:$4 sm:$0xff]   ;;  %v7982_v21 = vld [vmem:[#allocation7 + $0x13c] ss:$36 sps:$4 sm:$0xff]  }
  0xe5   :  { %vm175_vm5 = vc.u32 %v9344_v22, %v9346_v23  ;;  %v174_v40 = vadd.s32 %v9346_v23, %v9344_v22  ;;  %v7977_v22 = vld [vmem:[#allocation7 + $0x130] ss:$36 sps:$4 sm:$0xff]   ;;  %v7980_v23 = vld [vmem:[#allocation7 + $0x138] ss:$36 sps:$4 sm:$0xff]  }
  0xe6   :  { %v177_v28 = vsel %vm175_vm5, %v176_v26, %v9347_v24  ;;  %v7985_v24 = vld [vmem:[#allocation7 + $0xec] ss:$36 sps:$4 sm:$0xff]  }
  0xe7   :  { %v178_v29 = vadd.s32 %v177_v28, %v173_v27  ;;  %v7983_v26 = vld [vmem:[#allocation7 + $0xe8] ss:$36 sps:$4 sm:$0xff]   ;;  %v7986_v27 = vld [vmem:[#allocation7 + $0xf0] ss:$36 sps:$4 sm:$0xff]  }
  0xe8   :  { %v7991_v28 = vld [vmem:[#allocation7 + $0xa4] ss:$36 sps:$4 sm:$0xff]  }
  0xe9   :  { %v179_v30 = vadd.s32 536870912, %v178_v29 }
  0xeb   :  { %v180_v31 = vshrl.u32 %v179_v30, 30  ;;  %v7989_v30 = vld [vmem:[#allocation7 + $0xa0] ss:$36 sps:$4 sm:$0xff]  }
  0xed   :  { %v181_v32 = vshll.u32 %v180_v31, 30  ;;  %v204_v54 = vsub.s32 4, %v180_v31 }
  0xef   :  { %v182_v33 = vsub.s32 %v178_v29, %v181_v32  ;;  %v205_v57 = vsel %vm120_vm7, %v204_v54, %v180_v31  ;;  %v7994_v29 = vld [vmem:[#allocation7 + $0xac] ss:$36 sps:$4 sm:$0xff]   ;;  %v7997_v32 = vld [vmem:[#allocation7 + $0x5c] ss:$36 sps:$4 sm:$0xff]  }
  0xf0   :  { %v207_v58 = vsel %vm119_vm8, 0, %v205_v57  ;;  %v7992_v31 = vld [vmem:[#allocation7 + $0xa8] ss:$36 sps:$4 sm:$0xff]   ;;  %v8022_v54 = vld [vmem:[#allocation7 + $0x140] ss:$36 sps:$4 sm:$0xff]  }
  0xf1   :  { %v184_v34 = vsub.s32 0, %v182_v33  ;;  %v315_v59 = vadd.s32 3, %v207_v58  ;;  %v211_v60 = vand.u32 3, %v207_v58  ;;  %v8026_v57 = vld [vmem:[#allocation7 + $0xf8] ss:$36 sps:$4 sm:$0xff]  }
  0xf2   :  { %v8029_v58 = vld [vmem:[#allocation5 + $0x94] ss:$36 sps:$4 sm:$0xff]  }
  0xf3   :  { %v6903_v35 = vmin.u32 %v184_v34, %v182_v33  ;;  %v316_v61 = vand.u32 3, %v315_v59  ;;  %vm216_vm10 = vcmp.eq.s32.totalorder %v211_v60, 2  ;;  %vm213_vm12 = vcmp.eq.s32.totalorder %v211_v60, 0  ;;  %v7995_v34 = vld [vmem:[#allocation7 + $0x58] ss:$36 sps:$4 sm:$0xff]  }
  0xf4   :  { %vm212_vm14 = vcmp.lt.s32.totalorder %v211_v60, 2  ;;  %v8027_v59 = vld [vmem:[#allocation5 + $0x90] ss:$36 sps:$4 sm:$0xff]  }
  0xf5   :  { %v186_v36 = vclz %v6903_v35  ;;  %vm321_vm9 = vcmp.eq.s32.totalorder %v316_v61, 2  ;;  %vm318_vm11 = vcmp.eq.s32.totalorder %v316_v61, 0  ;;  %vm317_vm13 = vcmp.lt.s32.totalorder %v316_v61, 2  ;;  %v7998_v35 = vld [vmem:[#allocation7 + $0x60] ss:$36 sps:$4 sm:$0xff]  }
  0xf6   :  { %v8030_v60 = vld [vmem:[#allocation7 + $0xb0] ss:$36 sps:$4 sm:$0xff]  }
  0xf7   :  { %v6904_v37 = vadd.s32 4294967294, %v186_v36  ;;  %v8003_v36 = vld [vmem:[#allocation7 + $0x14] ss:$36 sps:$4 sm:$0xff]   ;;  %v8033_v61 = vld [vmem:[#allocation5 + $0x4c] ss:$36 sps:$4 sm:$0xff]  }
  0xf9   :  { %vm6905_vm6 = vcmp.lt.s32.totalorder %v6904_v37, 0 }
  0xfa   :  { %v189_v39 = vsel %vm6905_vm6, 0, %v6904_v37  ;;  %v8006_v37 = vld [vmem:[#allocation7 + $0x1c] ss:$36 sps:$4 sm:$0xff]  }
  0xfb   :  { %v190_v41 = vsub.s32 32, %v189_v39  ;;  %v194_v42 = vsub.s32 4294967266, %v189_v39  ;;  %v191_v44 = vshll.u32 %v182_v33, %v189_v39  ;;  %v8000_v33 = vld [vmem:[#allocation7 + $0x64] ss:$36 sps:$4 sm:$0xff]   ;;  %v8001_v39 = vld [vmem:[#allocation7 + $0x10] ss:$36 sps:$4 sm:$0xff]  }
  0xfd   :  { %v192_v45 = vshrl.u32 %v174_v40, %v190_v41  ;;  %v195_v46 = vadd.s32 127, %v194_v42  ;;  %v8004_v40 = vld [vmem:[#allocation7 + $0x18] ss:$36 sps:$4 sm:$0xff]  }
  0xfe   :  { %v8009_v41 = vld [vmem:[#allocation5 + $0x1fc] ss:$36 sps:$4 sm:$0xff]  }
  0xff   :  { %v193_v47 = vor.u32 %v192_v45, %v191_v44  ;;  %v196_v48 = vshll.u32 %v195_v46, 23  ;;  %v8007_v42 = vld [vmem:[#allocation5 + $0x1f8] ss:$36 sps:$4 sm:$0xff]   ;;  %v9261_v46 = vmov 0.0  }
 0x100   :  { %v8010_v44 = vld [vmem:[#allocation7 + $0x218] ss:$36 sps:$4 sm:$0xff]  }
 0x101   :  { %v197_v49 = vor.u32 4788187, %v196_v48  ;;  %v200_v51 = vcvt.s32.f32 %v193_v47  ;;  %v8013_v45 = vld [vmem:[#allocation5 + $0x1b4] ss:$36 sps:$4 sm:$0xff]  }
 0x102   :  { %v8011_v47 = vld [vmem:[#allocation5 + $0x1b0] ss:$36 sps:$4 sm:$0xff]  }
 0x103   :  { %v198_v50 = vand.u32 2147483647, %v197_v49  ;;  %v8014_v48 = vld [vmem:[#allocation7 + $0x1d0] ss:$36 sps:$4 sm:$0xff]  }
 0x104   :  { %v8017_v49 = vld [vmem:[#allocation5 + $0x16c] ss:$36 sps:$4 sm:$0xff]  }
 0x105   :  { %v201_v52 = vmul.f32 %v200_v51, %v198_v50  ;;  %v8015_v50 = vld [vmem:[#allocation5 + $0x168] ss:$36 sps:$4 sm:$0xff]  }
 0x106   :  { %v8018_v51 = vld [vmem:[#allocation7 + $0x188] ss:$36 sps:$4 sm:$0xff]  }
 0x107   :  { %v202_v53 = vxor.u32 2147483648, %v201_v52 }
 0x109   :  { %v203_v55 = vsel %vm120_vm7, %v202_v53, %v201_v52  ;;  %v8021_v52 = vld [vmem:[#allocation5 + $0x124] ss:$36 sps:$4 sm:$0xff]  }
 0x10a   :  { %v206_v56 = vsel %vm119_vm8, %v9337_v38, %v203_v55  ;;  %v7971_v38 = vld [vmem:[#allocation7 + $0x178] ss:$36 sps:$4 sm:$0xff]   ;;  %v8019_v53 = vld [vmem:[#allocation5 + $0x120] ss:$36 sps:$4 sm:$0xff]  }
 0x10b   :  { %9055 = vcosq.f32 %v206_v56  ;;  %v8025_v55 = vld [vmem:[#allocation5 + $0xdc] ss:$36 sps:$4 sm:$0xff]  }
 0x10c   :  { %9057 = vsinq.f32 %v206_v56  ;;  %v8023_v56 = vld [vmem:[#allocation5 + $0xd8] ss:$36 sps:$4 sm:$0xff]  }
 0x118   :  { %v9056_v62 = vpop.eup %9055 }
 0x119   :  { %v9058_v63 = vpop.eup %9057  ;;  %v217_v1 = vxor.u32 2147483648, %v9056_v62 }
 0x11a   :  { %v214_v2 = vxor.u32 2147483648, %v9058_v63 }
 0x11b   :  { %v323_v3 = vsel %vm321_vm9, %v217_v1, %v9058_v63  ;;  %v218_v43 = vsel %vm216_vm10, %v217_v1, %v9058_v63  ;;  %v8034_v63 = vld [vmem:[#allocation7 + $0x68] ss:$36 sps:$4 sm:$0xff]  }
 0x11c   :  { %v320_v6 = vsel %vm318_vm11, %v9056_v62, %v214_v2  ;;  %v215_v7 = vsel %vm213_vm12, %v9056_v62, %v214_v2  ;;  %v8031_v62 = vld [vmem:[#allocation5 + $0x48] ss:$36 sps:$4 sm:$0xff]   ;;  %v8035_v2 = vld [vmem:[#allocation5] ss:$36 sps:$4 sm:$0xff]  }
 0x11d   :  { %v324_v8 = vsel %vm317_vm13, %v320_v6, %v323_v3  ;;  %v219_v11 = vsel %vm212_vm14, %v215_v7, %v218_v43  ;;  %v8037_v1 = vld [vmem:[#allocation5 + $0x4] ss:$36 sps:$4 sm:$0xff]   ;;  %v8047_v7 = vld [vmem:[#allocation5 + $0x1bc] ss:$36 sps:$4 sm:$0xff]  }
 0x11e   :  { %v325_v12 = vsel %vm210_vm15, nan, %v324_v8  ;;  %v9358_v13 = vsel %vm210_vm15, nan, %v219_v11  ;;  %v8038_v3 = vld [vmem:[#allocation7 + $0x20] ss:$36 sps:$4 sm:$0xff]   ;;  %v8042_v6 = vld [vmem:[#allocation5 + $0x208] ss:$36 sps:$4 sm:$0xff]  }
 0x11f   :  { %v9360_v14 = vpack.c.bf16 %v325_v12, %v325_v12  ;;  %v8041_v43 = vld [vmem:[#allocation5 + $0x204] ss:$36 sps:$4 sm:$0xff]   ;;  %v8053_v12 = vld [vmem:[#allocation5 + $0x174] ss:$36 sps:$4 sm:$0xff]  }
 0x120   :  { %v8050_v8 = vld [vmem:[#allocation5 + $0x1c4] ss:$36 sps:$4 sm:$0xff]  }
 0x121   :  { %888 = vmatmul.mubr.bf16.vlgmr.msra.gmra.mxu0 %v9360_v14  ;;  %929 = vmatmul.mubr.bf16.vlgmr.msra.gmra.mxu1 %v9360_v14  ;;  %v8048_v11 = vld [vmem:[#allocation5 + $0x1c0] ss:$36 sps:$4 sm:$0xff]  }
 0x122   :  { %938 = vmatpush1.bf16.msra.mxu0 %v7959_v4  ;;  %979 = vmatpush1.bf16.msra.mxu1 %v7962_v5  ;;  %v8044_v4 = vld [vmem:[#allocation5 + $0x20c] ss:$36 sps:$4 sm:$0xff]   ;;  %v8039_v5 = vld [vmem:[#allocation5 + $0x200] ss:$36 sps:$4 sm:$0xff]  }
 0x123   :  { %939 = vmatprep.subr.bf16.mxu0 %v7967_v9  ;;  %980 = vmatprep.subr.bf16.mxu1 %v7970_v10  ;;  %v9381_v9 = vpack.c.bf16 %v9358_v13, %v9358_v13  ;;  %v8045_v10 = vld [vmem:[#allocation5 + $0x1b8] ss:$36 sps:$4 sm:$0xff]   ;;  %v8059_v13 = vld [vmem:[#allocation5 + $0x12c] ss:$36 sps:$4 sm:$0xff]  }
 0x124   :  { %969 = vmatprep.mubr.bf16.mxu0 %v9254_v0  ;;  %1010 = vmatprep.mubr.bf16.mxu1 %v9254_v0 }
 0x126   :  { %940 = vmatpush1.bf16.msra.mxu0 %v7965_v15  ;;  %981 = vmatpush1.bf16.msra.mxu1 %v7968_v16  ;;  %v8056_v15 = vld [vmem:[#allocation5 + $0x17c] ss:$36 sps:$4 sm:$0xff]   ;;  %v8051_v16 = vld [vmem:[#allocation5 + $0x170] ss:$36 sps:$4 sm:$0xff]  }
 0x127   :  { %941 = vmatprep.subr.bf16.mxu0 %v7973_v17  ;;  %982 = vmatprep.subr.bf16.mxu1 %v7976_v18  ;;  %v8054_v17 = vld [vmem:[#allocation5 + $0x178] ss:$36 sps:$4 sm:$0xff]  }
 0x128   :  { %v8062_v18 = vld [vmem:[#allocation5 + $0x134] ss:$36 sps:$4 sm:$0xff]  }
 0x12a   :  { %942 = vmatpush1.bf16.msra.mxu0 %v7971_v38  ;;  %983 = vmatpush1.bf16.msra.mxu1 %v7974_v19  ;;  %v8060_v38 = vld [vmem:[#allocation5 + $0x130] ss:$36 sps:$4 sm:$0xff]   ;;  %v8065_v19 = vld [vmem:[#allocation5 + $0xe4] ss:$36 sps:$4 sm:$0xff]  }
 0x12b   :  { %943 = vmatprep.subr.bf16.mxu0 %v7979_v20  ;;  %984 = vmatprep.subr.bf16.mxu1 %v7982_v21  ;;  %v8068_v20 = vld [vmem:[#allocation5 + $0xec] ss:$36 sps:$4 sm:$0xff]   ;;  %v8063_v21 = vld [vmem:[#allocation5 + $0xe0] ss:$36 sps:$4 sm:$0xff]  }
 0x12e   :  { %944 = vmatpush1.bf16.msra.mxu0 %v7977_v22  ;;  %985 = vmatpush1.bf16.msra.mxu1 %v7980_v23  ;;  %v8066_v22 = vld [vmem:[#allocation5 + $0xe8] ss:$36 sps:$4 sm:$0xff]   ;;  %v8071_v23 = vld [vmem:[#allocation5 + $0x9c] ss:$36 sps:$4 sm:$0xff]  }
 0x12f   :  { %945 = vmatprep.subr.bf16.mxu0 %v7985_v24  ;;  %986 = vmatprep.subr.bf16.mxu1 %v7988_v25  ;;  %v8074_v24 = vld [vmem:[#allocation5 + $0xa4] ss:$36 sps:$4 sm:$0xff]   ;;  %v8069_v25 = vld [vmem:[#allocation5 + $0x98] ss:$36 sps:$4 sm:$0xff]  }
 0x132   :  { %946 = vmatpush1.bf16.msra.mxu0 %v7983_v26  ;;  %987 = vmatpush1.bf16.msra.mxu1 %v7986_v27  ;;  %v8072_v26 = vld [vmem:[#allocation5 + $0xa0] ss:$36 sps:$4 sm:$0xff]   ;;  %v8077_v27 = vld [vmem:[#allocation5 + $0x54] ss:$36 sps:$4 sm:$0xff]  }
 0x133   :  { %947 = vmatprep.subr.bf16.mxu0 %v7991_v28  ;;  %988 = vmatprep.subr.bf16.mxu1 %v7994_v29  ;;  %v8080_v28 = vld [vmem:[#allocation5 + $0x5c] ss:$36 sps:$4 sm:$0xff]   ;;  %v8075_v29 = vld [vmem:[#allocation5 + $0x50] ss:$36 sps:$4 sm:$0xff]  }
 0x136   :  { %948 = vmatpush1.bf16.msra.mxu0 %v7989_v30  ;;  %989 = vmatpush1.bf16.msra.mxu1 %v7992_v31  ;;  %v8078_v30 = vld [vmem:[#allocation5 + $0x58] ss:$36 sps:$4 sm:$0xff]   ;;  %v8083_v31 = vld [vmem:[#allocation5 + $0xc] ss:$36 sps:$4 sm:$0xff]  }
 0x137   :  { %949 = vmatprep.subr.bf16.mxu0 %v7997_v32  ;;  %990 = vmatprep.subr.bf16.mxu1 %v8000_v33  ;;  %v8086_v32 = vld [vmem:[#allocation5 + $0x14] ss:$36 sps:$4 sm:$0xff]   ;;  %v8081_v33 = vld [vmem:[#allocation5 + $0x8] ss:$36 sps:$4 sm:$0xff]  }
 0x13a   :  { %950 = vmatpush1.bf16.msra.mxu0 %v7995_v34  ;;  %991 = vmatpush1.bf16.msra.mxu1 %v7998_v35  ;;  %v8084_v34 = vld [vmem:[#allocation5 + $0x10] ss:$36 sps:$4 sm:$0xff]  }
 0x13b   :  { %951 = vmatprep.subr.bf16.mxu0 %v8003_v36  ;;  %992 = vmatprep.subr.bf16.mxu1 %v8006_v37  ;;  %v8089_v35 = vld [vmem:[#allocation5 + $0x214] ss:$36 sps:$4 sm:$0xff]  }
 0x13c   :  { %v8087_v36 = vld [vmem:[#allocation5 + $0x210] ss:$36 sps:$4 sm:$0xff]   ;;  %v8090_v37 = vld [vmem:[#allocation5 + $0x218] ss:$36 sps:$4 sm:$0xff]  }
 0x13e   :  { %952 = vmatpush1.bf16.msra.mxu0 %v8001_v39  ;;  %993 = vmatpush1.bf16.msra.mxu1 %v8004_v40  ;;  %v8093_v39 = vld [vmem:[#allocation5 + $0x1cc] ss:$36 sps:$4 sm:$0xff]  }
 0x13f   :  { %7828 = vmatprep.subr.bf16.mxu0 %v9261_v46  ;;  %1427 = vmatprep.subr.bf16.mxu1 %v8009_v41  ;;  %v8091_v40 = vld [vmem:[#allocation5 + $0x1c8] ss:$36 sps:$4 sm:$0xff]   ;;  %v8094_v41 = vld [vmem:[#allocation5 + $0x1d0] ss:$36 sps:$4 sm:$0xff]  }
 0x141   :  { %970 = vmatmul.mubr.bf16.vlgmr.msra.gmra.mxu0 %v9360_v14  ;;  %1011 = vmatmul.mubr.bf16.vlgmr.msra.gmra.mxu1 %v9360_v14 }
 0x142   :  { %7829 = vmatpush3.bf16.msra.mxu0 %v8010_v44  ;;  %1428 = vmatpush1.bf16.msra.mxu1 %v8007_v42  ;;  %v8097_v42 = vld [vmem:[#allocation5 + $0x184] ss:$36 sps:$4 sm:$0xff]  }
 0x143   :  { %7830 = vmatprep.subr.bf16.mxu0 %v9261_v46  ;;  %1429 = vmatprep.subr.bf16.mxu1 %v8013_v45  ;;  %v8095_v44 = vld [vmem:[#allocation5 + $0x180] ss:$36 sps:$4 sm:$0xff]   ;;  %v8098_v45 = vld [vmem:[#allocation5 + $0x188] ss:$36 sps:$4 sm:$0xff]  }
 0x144   :  { %7844 = vmatprep.mubr.msk.bf16.mxu0 %vm9262_vm0, %v9261_v46  ;;  %1459 = vmatprep.mubr.bf16.mxu1 %v9254_v0 }
 0x146   :  { %7831 = vmatpush3.bf16.msra.mxu0 %v8014_v48  ;;  %1430 = vmatpush1.bf16.msra.mxu1 %v8011_v47  ;;  %v8101_v47 = vld [vmem:[#allocation5 + $0x13c] ss:$36 sps:$4 sm:$0xff]  }
 0x147   :  { %7832 = vmatprep.subr.bf16.mxu0 %v9261_v46  ;;  %1431 = vmatprep.subr.bf16.mxu1 %v8017_v49  ;;  %v8099_v48 = vld [vmem:[#allocation5 + $0x138] ss:$36 sps:$4 sm:$0xff]   ;;  %v8102_v49 = vld [vmem:[#allocation5 + $0x140] ss:$36 sps:$4 sm:$0xff]  }
 0x14a   :  { %7833 = vmatpush3.bf16.msra.mxu0 %v8018_v51  ;;  %1432 = vmatpush1.bf16.msra.mxu1 %v8015_v50  ;;  %v8105_v50 = vld [vmem:[#allocation5 + $0xf4] ss:$36 sps:$4 sm:$0xff]  }
 0x14b   :  { %7834 = vmatprep.subr.bf16.mxu0 %v9261_v46  ;;  %1433 = vmatprep.subr.bf16.mxu1 %v8021_v52  ;;  %v8103_v51 = vld [vmem:[#allocation5 + $0xf0] ss:$36 sps:$4 sm:$0xff]   ;;  %v8106_v52 = vld [vmem:[#allocation5 + $0xf8] ss:$36 sps:$4 sm:$0xff]  }
 0x14e   :  { %7835 = vmatpush3.bf16.msra.mxu0 %v8022_v54  ;;  %1434 = vmatpush1.bf16.msra.mxu1 %v8019_v53  ;;  %v8109_v53 = vld [vmem:[#allocation5 + $0xac] ss:$36 sps:$4 sm:$0xff]  }
 0x14f   :  { %7836 = vmatprep.subr.bf16.mxu0 %v9261_v46  ;;  %1435 = vmatprep.subr.bf16.mxu1 %v8025_v55  ;;  %v8107_v54 = vld [vmem:[#allocation5 + $0xa8] ss:$36 sps:$4 sm:$0xff]   ;;  %v8110_v55 = vld [vmem:[#allocation5 + $0xb0] ss:$36 sps:$4 sm:$0xff]  }
 0x152   :  { %7837 = vmatpush3.bf16.msra.mxu0 %v8026_v57  ;;  %1436 = vmatpush1.bf16.msra.mxu1 %v8023_v56  ;;  %v8113_v56 = vld [vmem:[#allocation5 + $0x64] ss:$36 sps:$4 sm:$0xff]  }
 0x153   :  { %7838 = vmatprep.subr.bf16.mxu0 %v9261_v46  ;;  %1437 = vmatprep.subr.bf16.mxu1 %v8029_v58  ;;  %v8111_v57 = vld [vmem:[#allocation5 + $0x60] ss:$36 sps:$4 sm:$0xff]   ;;  %v8114_v58 = vld [vmem:[#allocation5 + $0x68] ss:$36 sps:$4 sm:$0xff]  }
 0x156   :  { %7839 = vmatpush3.bf16.msra.mxu0 %v8030_v60  ;;  %1438 = vmatpush1.bf16.msra.mxu1 %v8027_v59  ;;  %v8117_v59 = vld [vmem:[#allocation5 + $0x1c] ss:$36 sps:$4 sm:$0xff]  }
 0x157   :  { %7840 = vmatprep.subr.bf16.mxu0 %v9261_v46  ;;  %1439 = vmatprep.subr.bf16.mxu1 %v8033_v61  ;;  %v8115_v60 = vld [vmem:[#allocation5 + $0x18] ss:$36 sps:$4 sm:$0xff]   ;;  %v8118_v61 = vld [vmem:[#allocation5 + $0x20] ss:$36 sps:$4 sm:$0xff]  }
 0x15a   :  { %7841 = vmatpush3.bf16.msra.mxu0 %v8034_v63  ;;  %1440 = vmatpush1.bf16.msra.mxu1 %v8031_v62  ;;  %v8121_v62 = vld [vmem:[#allocation10 + $0x1fc] ss:$36 sps:$4 sm:$0xff]  }
 0x15b   :  { %7842 = vmatprep.subr.bf16.mxu0 %v9261_v46  ;;  %1441 = vmatprep.subr.bf16.mxu1 %v8037_v1  ;;  %v8119_v63 = vld [vmem:[#allocation10 + $0x1f8] ss:$36 sps:$4 sm:$0xff]  }
 0x15c   :  { %v8124_v1 = vld [vmem:[#allocation10 + $0x1b4] ss:$36 sps:$4 sm:$0xff]  }
 0x15e   :  { %7843 = vmatpush3.bf16.msra.mxu0 %v8038_v3  ;;  %1442 = vmatpush1.bf16.msra.mxu1 %v8035_v2  ;;  %v8122_v2 = vld [vmem:[#allocation10 + $0x1b0] ss:$36 sps:$4 sm:$0xff]  }
 0x15f   :  { %1468 = vmatprep.subr.bf16.mxu0 %v8041_v43  ;;  %1509 = vmatprep.subr.bf16.mxu1 %v8044_v4  ;;  %v8127_v3 = vld [vmem:[#allocation10 + $0x16c] ss:$36 sps:$4 sm:$0xff]   ;;  %v8130_v4 = vld [vmem:[#allocation10 + $0x124] ss:$36 sps:$4 sm:$0xff]  }
 0x160   :  { %v8125_v43 = vld [vmem:[#allocation10 + $0x168] ss:$36 sps:$4 sm:$0xff]  }
 0x161   :  { %7845 = vmatmul.mubr.bf16.vlgmr.msra.gmra.mxu0 %v9360_v14  ;;  %1460 = vmatmul.mubr.bf16.vlgmr.msra.gmra.mxu1 %v9381_v9  ;;  %v8057_v14 = vld [vmem:[#allocation5 + $0x128] ss:$36 sps:$4 sm:$0xff]  }
 0x162   :  { %1469 = vmatpush1.bf16.msra.mxu0 %v8039_v5  ;;  %1510 = vmatpush1.bf16.msra.mxu1 %v8042_v6  ;;  %v8128_v5 = vld [vmem:[#allocation10 + $0x120] ss:$36 sps:$4 sm:$0xff]  }
 0x163   :  { %1470 = vmatprep.subr.bf16.mxu0 %v8047_v7  ;;  %1511 = vmatprep.subr.bf16.mxu1 %v8050_v8  ;;  %v8148_v6 = vld [vmem:[#allocation10 + $0x67c] ss:$36 sps:$4 sm:$0xff]  }
 0x164   :  { %1500 = vmatprep.mubr.bf16.mxu0 %v9254_v0  ;;  %1541 = vmatprep.mubr.bf16.mxu1 %v9254_v0  ;;  %v8133_v7 = vld [vmem:[#allocation10 + $0xdc] ss:$36 sps:$4 sm:$0xff]  }
 0x165   :  { %v8146_v8 = vld [vmem:[#allocation10 + $0x678] ss:$36 sps:$4 sm:$0xff]  }
 0x166   :  { %1471 = vmatpush1.bf16.msra.mxu0 %v8045_v10  ;;  %1512 = vmatpush1.bf16.msra.mxu1 %v8048_v11  ;;  %v8131_v10 = vld [vmem:[#allocation10 + $0xd8] ss:$36 sps:$4 sm:$0xff]  }
 0x167   :  { %1472 = vmatprep.subr.bf16.mxu0 %v8053_v12  ;;  %1513 = vmatprep.subr.bf16.mxu1 %v8056_v15  ;;  %v8154_v11 = vld [vmem:[#allocation10 + $0x634] ss:$36 sps:$4 sm:$0xff]  }
 0x168   :  { %v8152_v12 = vld [vmem:[#allocation10 + $0x630] ss:$36 sps:$4 sm:$0xff]  }
 0x169   :  { %v8134_v15 = vld [vmem:[#allocation10 + $0x90] ss:$36 sps:$4 sm:$0xff]  }
 0x16a   :  { %1473 = vmatpush1.bf16.msra.mxu0 %v8051_v16  ;;  %1514 = vmatpush1.bf16.msra.mxu1 %v8054_v17  ;;  %v8160_v16 = vld [vmem:[#allocation10 + $0x5ec] ss:$36 sps:$4 sm:$0xff]  }
 0x16b   :  { %1474 = vmatprep.subr.bf16.mxu0 %v8059_v13  ;;  %1515 = vmatprep.subr.bf16.mxu1 %v8062_v18  ;;  %v8139_v17 = vld [vmem:[#allocation10 + $0x4c] ss:$36 sps:$4 sm:$0xff]  }
 0x16c   :  { %v8158_v13 = vld [vmem:[#allocation10 + $0x5e8] ss:$36 sps:$4 sm:$0xff]  }
 0x16d   :  { %v8137_v18 = vld [vmem:[#allocation10 + $0x48] ss:$36 sps:$4 sm:$0xff]  }
 0x16e   :  { %1475 = vmatpush1.bf16.msra.mxu0 %v8057_v14  ;;  %1516 = vmatpush1.bf16.msra.mxu1 %v8060_v38  ;;  %v8166_v14 = vld [vmem:[#allocation10 + $0x5a4] ss:$36 sps:$4 sm:$0xff]  }
 0x16f   :  { %1476 = vmatprep.subr.bf16.mxu0 %v8065_v19  ;;  %1517 = vmatprep.subr.bf16.mxu1 %v8068_v20  ;;  %v8142_v38 = vld [vmem:[#allocation10 + $0x4] ss:$36 sps:$4 sm:$0xff]  }
 0x170   :  { %v8164_v19 = vld [vmem:[#allocation10 + $0x5a0] ss:$36 sps:$4 sm:$0xff]  }
 0x171   :  { %v8140_v20 = vld [vmem:[#allocation10] ss:$36 sps:$4 sm:$0xff]  }
 0x172   :  { %1477 = vmatpush1.bf16.msra.mxu0 %v8063_v21  ;;  %1518 = vmatpush1.bf16.msra.mxu1 %v8066_v22  ;;  %v8172_v21 = vld [vmem:[#allocation10 + $0x55c] ss:$36 sps:$4 sm:$0xff]  }
 0x173   :  { %1478 = vmatprep.subr.bf16.mxu0 %v8071_v23  ;;  %1519 = vmatprep.subr.bf16.mxu1 %v8074_v24  ;;  %v8145_v22 = vld [vmem:[#allocation10 + $0x43c] ss:$36 sps:$4 sm:$0xff]  }
 0x174   :  { %v8170_v23 = vld [vmem:[#allocation10 + $0x558] ss:$36 sps:$4 sm:$0xff]  }
 0x175   :  { %v8143_v24 = vld [vmem:[#allocation10 + $0x438] ss:$36 sps:$4 sm:$0xff]  }
 0x176   :  { %1479 = vmatpush1.bf16.msra.mxu0 %v8069_v25  ;;  %1520 = vmatpush1.bf16.msra.mxu1 %v8072_v26  ;;  %v8178_v25 = vld [vmem:[#allocation10 + $0x514] ss:$36 sps:$4 sm:$0xff]  }
 0x177   :  { %1480 = vmatprep.subr.bf16.mxu0 %v8077_v27  ;;  %1521 = vmatprep.subr.bf16.mxu1 %v8080_v28  ;;  %v8151_v26 = vld [vmem:[#allocation10 + $0x3f4] ss:$36 sps:$4 sm:$0xff]  }
 0x178   :  { %v8176_v27 = vld [vmem:[#allocation10 + $0x510] ss:$36 sps:$4 sm:$0xff]  }
 0x179   :  { %v8149_v28 = vld [vmem:[#allocation10 + $0x3f0] ss:$36 sps:$4 sm:$0xff]  }
 0x17a   :  { %1481 = vmatpush1.bf16.msra.mxu0 %v8075_v29  ;;  %1522 = vmatpush1.bf16.msra.mxu1 %v8078_v30  ;;  %v8157_v29 = vld [vmem:[#allocation10 + $0x3ac] ss:$36 sps:$4 sm:$0xff]  }
 0x17b   :  { %1482 = vmatprep.subr.bf16.mxu0 %v8083_v31  ;;  %1523 = vmatprep.subr.bf16.mxu1 %v8086_v32  ;;  %v8184_v30 = vld [vmem:[#allocation10 + $0x4cc] ss:$36 sps:$4 sm:$0xff]  }
 0x17c   :  { %v8182_v31 = vld [vmem:[#allocation10 + $0x4c8] ss:$36 sps:$4 sm:$0xff]  }
 0x17d   :  { %v8155_v32 = vld [vmem:[#allocation10 + $0x3a8] ss:$36 sps:$4 sm:$0xff]  }
 0x17e   :  { %1483 = vmatpush1.bf16.msra.mxu0 %v8081_v33  ;;  %1524 = vmatpush1.bf16.msra.mxu1 %v8084_v34  ;;  %v8163_v33 = vld [vmem:[#allocation10 + $0x364] ss:$36 sps:$4 sm:$0xff]  }
 0x17f   :  { %1550 = vmatprep.subr.bf16.mxu0 %v8089_v35  ;;  %7848 = vmatprep.subr.bf16.mxu1 %v9261_v46  ;;  %v8190_v34 = vld [vmem:[#allocation10 + $0x484] ss:$36 sps:$4 sm:$0xff]  }
 0x180   :  { %v8188_v35 = vld [vmem:[#allocation10 + $0x480] ss:$36 sps:$4 sm:$0xff]  }
 0x181   :  { %1501 = vmatmul.mubr.bf16.vlgmr.msra.gmra.mxu0 %v9381_v9  ;;  %1542 = vmatmul.mubr.bf16.vlgmr.msra.gmra.mxu1 %v9381_v9 }
 0x182   :  { %1551 = vmatpush1.bf16.msra.mxu0 %v8087_v36  ;;  %7849 = vmatpush3.bf16.msra.mxu1 %v8090_v37  ;;  %v8161_v36 = vld [vmem:[#allocation10 + $0x360] ss:$36 sps:$4 sm:$0xff]  }
 0x183   :  { %1552 = vmatprep.subr.bf16.mxu0 %v8093_v39  ;;  %7850 = vmatprep.subr.bf16.mxu1 %v9261_v46  ;;  %v8169_v37 = vld [vmem:[#allocation10 + $0x31c] ss:$36 sps:$4 sm:$0xff]  }
 0x184   :  { %1582 = vmatprep.mubr.bf16.mxu0 %v9254_v0  ;;  %7864 = vmatprep.mubr.msk.bf16.mxu1 %vm9262_vm0, %v9261_v46  ;;  %v8193_v39 = vld [vmem:[#allocation10 + $0x8bc] ss:$36 sps:$4 sm:$0xff]  }
 0x186   :  { %1553 = vmatpush1.bf16.msra.mxu0 %v8091_v40  ;;  %7851 = vmatpush3.bf16.msra.mxu1 %v8094_v41  ;;  %v8191_v40 = vld [vmem:[#allocation10 + $0x8b8] ss:$36 sps:$4 sm:$0xff]  }
 0x187   :  { %1554 = vmatprep.subr.bf16.mxu0 %v8097_v42  ;;  %7852 = vmatprep.subr.bf16.mxu1 %v9261_v46  ;;  %v8167_v41 = vld [vmem:[#allocation10 + $0x318] ss:$36 sps:$4 sm:$0xff]  }
 0x188   :  { %v8175_v42 = vld [vmem:[#allocation10 + $0x2d4] ss:$36 sps:$4 sm:$0xff]  }
 0x18a   :  { %1555 = vmatpush1.bf16.msra.mxu0 %v8095_v44  ;;  %7853 = vmatpush3.bf16.msra.mxu1 %v8098_v45  ;;  %v8199_v44 = vld [vmem:[#allocation10 + $0x874] ss:$36 sps:$4 sm:$0xff]  }
 0x18b   :  { %1556 = vmatprep.subr.bf16.mxu0 %v8101_v47  ;;  %7854 = vmatprep.subr.bf16.mxu1 %v9261_v46  ;;  %v8197_v45 = vld [vmem:[#allocation10 + $0x870] ss:$36 sps:$4 sm:$0xff]  }
 0x18c   :  { %v8173_v47 = vld [vmem:[#allocation10 + $0x2d0] ss:$36 sps:$4 sm:$0xff]  }
 0x18e   :  { %1557 = vmatpush1.bf16.msra.mxu0 %v8099_v48  ;;  %7855 = vmatpush3.bf16.msra.mxu1 %v8102_v49  ;;  %v8181_v48 = vld [vmem:[#allocation10 + $0x28c] ss:$36 sps:$4 sm:$0xff]  }
 0x18f   :  { %1558 = vmatprep.subr.bf16.mxu0 %v8105_v50  ;;  %7856 = vmatprep.subr.bf16.mxu1 %v9261_v46  ;;  %v8205_v49 = vld [vmem:[#allocation10 + $0x82c] ss:$36 sps:$4 sm:$0xff]  }
 0x190   :  { %v8203_v50 = vld [vmem:[#allocation10 + $0x828] ss:$36 sps:$4 sm:$0xff]  }
 0x192   :  { %1559 = vmatpush1.bf16.msra.mxu0 %v8103_v51  ;;  %7857 = vmatpush3.bf16.msra.mxu1 %v8106_v52  ;;  %v8179_v51 = vld [vmem:[#allocation10 + $0x288] ss:$36 sps:$4 sm:$0xff]  }
 0x193   :  { %1560 = vmatprep.subr.bf16.mxu0 %v8109_v53  ;;  %7858 = vmatprep.subr.bf16.mxu1 %v9261_v46  ;;  %v8187_v52 = vld [vmem:[#allocation10 + $0x244] ss:$36 sps:$4 sm:$0xff]  }
 0x194   :  { %v8211_v53 = vld [vmem:[#allocation10 + $0x7e4] ss:$36 sps:$4 sm:$0xff]  }
 0x196   :  { %1561 = vmatpush1.bf16.msra.mxu0 %v8107_v54  ;;  %7859 = vmatpush3.bf16.msra.mxu1 %v8110_v55  ;;  %v8209_v54 = vld [vmem:[#allocation10 + $0x7e0] ss:$36 sps:$4 sm:$0xff]  }
 0x197   :  { %1562 = vmatprep.subr.bf16.mxu0 %v8113_v56  ;;  %7860 = vmatprep.subr.bf16.mxu1 %v9261_v46  ;;  %v8185_v55 = vld [vmem:[#allocation10 + $0x240] ss:$36 sps:$4 sm:$0xff]  }
 0x198   :  { %v8196_v56 = vld [vmem:[#allocation10 + $0xafc] ss:$36 sps:$4 sm:$0xff]  }
 0x19a   :  { %1563 = vmatpush1.bf16.msra.mxu0 %v8111_v57  ;;  %7861 = vmatpush3.bf16.msra.mxu1 %v8114_v58  ;;  %v8217_v57 = vld [vmem:[#allocation10 + $0x79c] ss:$36 sps:$4 sm:$0xff]  }
 0x19b   :  { %1564 = vmatprep.subr.bf16.mxu0 %v8117_v59  ;;  %7862 = vmatprep.subr.bf16.mxu1 %v9261_v46  ;;  %v8215_v58 = vld [vmem:[#allocation10 + $0x798] ss:$36 sps:$4 sm:$0xff]  }
 0x19c   :  { %v8223_v59 = vld [vmem:[#allocation10 + $0x754] ss:$36 sps:$4 sm:$0xff]  }
 0x19e   :  { %1565 = vmatpush1.bf16.msra.mxu0 %v8115_v60  ;;  %7863 = vmatpush3.bf16.msra.mxu1 %v8118_v61  ;;  %v8221_v60 = vld [vmem:[#allocation10 + $0x750] ss:$36 sps:$4 sm:$0xff]  }
 0x19f   :  { %5842 = vmatprep.subr.bf16.mxu0 %v8121_v62  ;;  %5883 = vmatprep.subr.bf16.mxu1 %v8148_v6 }
 0x1a1   :  { %1583 = vmatmul.mubr.bf16.vlgmr.msra.gmra.mxu0 %v9381_v9  ;;  %7865 = vmatmul.mubr.bf16.vlgmr.msra.gmra.mxu1 %v9381_v9  ;;  %v8136_v9 = vld [vmem:[#allocation10 + $0x94] ss:$36 sps:$4 sm:$0xff]  }
 0x1a2   :  { %5843 = vmatpush1.bf16.msra.mxu0 %v8119_v63  ;;  %5884 = vmatpush1.bf16.msra.mxu1 %v8146_v8  ;;  %v8233_v8 = vld [vmem:[#allocation10 + $0x6c0] ss:$36 sps:$4 sm:$0xff]  }
 0x1a3   :  { %5844 = vmatprep.subr.bf16.mxu0 %v8124_v1  ;;  %5885 = vmatprep.subr.bf16.mxu1 %v8154_v11 }
 0x1a6   :  { %5845 = vmatpush1.bf16.msra.mxu0 %v8122_v2  ;;  %5886 = vmatpush1.bf16.msra.mxu1 %v8152_v12  ;;  %v8229_v2 = vld [vmem:[#allocation10 + $0x70c] ss:$36 sps:$4 sm:$0xff]  }
 0x1a7   :  { %5846 = vmatprep.subr.bf16.mxu0 %v8127_v3  ;;  %5887 = vmatprep.subr.bf16.mxu1 %v8160_v16  ;;  %v8227_v3 = vld [vmem:[#allocation10 + $0x708] ss:$36 sps:$4 sm:$0xff]  }
 0x1aa   :  { %5847 = vmatpush1.bf16.msra.mxu0 %v8125_v43  ;;  %5888 = vmatpush1.bf16.msra.mxu1 %v8158_v13 }
 0x1ab   :  { %5848 = vmatprep.subr.bf16.mxu0 %v8130_v4  ;;  %5889 = vmatprep.subr.bf16.mxu1 %v8166_v14  ;;  %v1635_v14 = vlaneseq }
 0x1ae   :  { %5849 = vmatpush1.bf16.msra.mxu0 %v8128_v5  ;;  %5890 = vmatpush1.bf16.msra.mxu1 %v8164_v19 }
 0x1af   :  { %5850 = vmatprep.subr.bf16.mxu0 %v8133_v7  ;;  %5891 = vmatprep.subr.bf16.mxu1 %v8172_v21  ;;  %v8235_v7 = vld [vmem:[#allocation10 + $0x6c4] ss:$36 sps:$4 sm:$0xff]  }
 0x1b2   :  { %5851 = vmatpush1.bf16.msra.mxu0 %v8131_v10  ;;  %5892 = vmatpush1.bf16.msra.mxu1 %v8170_v23  ;;  %v8244_v10 = vld [vmem:[#allocation10 + $0xf7c] ss:$36 sps:$4 sm:$0xff]  }
 0x1b3   :  { %5852 = vmatprep.subr.bf16.mxu0 %v8136_v9  ;;  %5893 = vmatprep.subr.bf16.mxu1 %v8178_v25 }
 0x1b6   :  { %5853 = vmatpush1.bf16.msra.mxu0 %v8134_v15  ;;  %5894 = vmatpush1.bf16.msra.mxu1 %v8176_v27 }
 0x1b7   :  { %5854 = vmatprep.subr.bf16.mxu0 %v8139_v17  ;;  %5895 = vmatprep.subr.bf16.mxu1 %v8184_v30 }
 0x1ba   :  { %5855 = vmatpush1.bf16.msra.mxu0 %v8137_v18  ;;  %5896 = vmatpush1.bf16.msra.mxu1 %v8182_v31 }
 0x1bb   :  { %5856 = vmatprep.subr.bf16.mxu0 %v8142_v38  ;;  %5897 = vmatprep.subr.bf16.mxu1 %v8190_v34  ;;  %v9410_v38 = vshrl.u32 %v1635_v14, 7 }
 0x1bd   :  { %v1637_v19 = vsub.s32 0, %v9410_v38  ;;  %v1641_v21 = vsub.s32 1, %v9410_v38  ;;  %v1653_v14 = vsub.s32 4, %v9410_v38 }
 0x1be   :  { %5857 = vmatpush1.bf16.msra.mxu0 %v8140_v20  ;;  %5898 = vmatpush1.bf16.msra.mxu1 %v8188_v35  ;;  %v9413_v20 = vld [vmem:[#allocation8] sm:$0xff] }
 0x1bf   :  { %5858 = vmatprep.subr.bf16.mxu0 %v8145_v22  ;;  %5899 = vmatprep.subr.bf16.mxu1 %v8193_v39  ;;  %v1638_v22 = vrot.slane %v9413_v20, %v1637_v19 }
 0x1c2   :  { %5859 = vmatpush2.bf16.msra.mxu0 %v8143_v24  ;;  %5900 = vmatpush2.bf16.msra.mxu1 %v8191_v40 }
 0x1c3   :  { %5860 = vmatprep.subr.bf16.mxu0 %v8151_v26  ;;  %5901 = vmatprep.subr.bf16.mxu1 %v8199_v44  ;;  %v1642_v26 = vrot.slane %v9413_v20, %v1641_v21  ;;  %v1645_v44 = vsub.s32 2, %v9410_v38 }
 0x1c6   :  { %5861 = vmatpush2.bf16.msra.mxu0 %v8149_v28  ;;  %5902 = vmatpush2.bf16.msra.mxu1 %v8197_v45  ;;  %v1649_v45 = vsub.s32 3, %v9410_v38 }
 0x1c7   :  { %5862 = vmatprep.subr.bf16.mxu0 %v8157_v29  ;;  %5903 = vmatprep.subr.bf16.mxu1 %v8205_v49 }
 0x1ca   :  { %5863 = vmatpush2.bf16.msra.mxu0 %v8155_v32  ;;  %5904 = vmatpush2.bf16.msra.mxu1 %v8203_v50 }
 0x1cb   :  { %5864 = vmatprep.subr.bf16.mxu0 %v8163_v33  ;;  %5905 = vmatprep.subr.bf16.mxu1 %v8211_v53 }
 0x1ce   :  { %5865 = vmatpush2.bf16.msra.mxu0 %v8161_v36  ;;  %5906 = vmatpush2.bf16.msra.mxu1 %v8209_v54 }
 0x1cf   :  { %5866 = vmatprep.subr.bf16.mxu0 %v8169_v37  ;;  %5907 = vmatprep.subr.bf16.mxu1 %v8217_v57 }
 0x1d2   :  { %5867 = vmatpush2.bf16.msra.mxu0 %v8167_v41  ;;  %5908 = vmatpush2.bf16.msra.mxu1 %v8215_v58 }
 0x1d3   :  { %5868 = vmatprep.subr.bf16.mxu0 %v8175_v42  ;;  %5909 = vmatprep.subr.bf16.mxu1 %v8223_v59 }
 0x1d6   :  { %5869 = vmatpush2.bf16.msra.mxu0 %v8173_v47  ;;  %5910 = vmatpush2.bf16.msra.mxu1 %v8221_v60  ;;  %v1657_v47 = vsub.s32 5, %v9410_v38 }
 0x1d7   :  { %5870 = vmatprep.subr.bf16.mxu0 %v8181_v48  ;;  %5911 = vmatprep.subr.bf16.mxu1 %v8229_v2  ;;  %v1646_v48 = vrot.slane %v9413_v20, %v1645_v44 }
 0x1da   :  { %5871 = vmatpush2.bf16.msra.mxu0 %v8179_v51  ;;  %5912 = vmatpush2.bf16.msra.mxu1 %v8227_v3 }
 0x1db   :  { %5872 = vmatprep.subr.bf16.mxu0 %v8187_v52  ;;  %5913 = vmatprep.subr.bf16.mxu1 %v8235_v7  ;;  %v1650_v52 = vrot.slane %v9413_v20, %v1649_v45 }
 0x1de   :  { %5873 = vmatpush2.bf16.msra.mxu0 %v8185_v55  ;;  %5914 = vmatpush2.bf16.msra.mxu1 %v8233_v8  ;;  %v1658_v55 = vrot.slane %v9413_v20, %v1657_v47 }
 0x1df   :  { %5924 = vmatprep.subr.bf16.mxu0 %v8196_v56  ;;  %5965 = vmatprep.subr.bf16.mxu1 %v8244_v10  ;;  %v8194_v10 = vld [vmem:[#allocation10 + $0xaf8] ss:$36 sps:$4 sm:$0xff]  }
 0x1e1   :  { %v889_v61 = vpop.f32.mrf.mxu0  ;;  %v930_v62 = vpop.f32.mrf.mxu1 }
 0x1e3   :  { %v891_v63 = vpop.f32.mrf.mxu0  ;;  %v9402_v1 = vpop.f32.mrf.mxu1 }
 0x1e5   :  { %v893_v43 = vpop.f32.mrf.mxu0  ;;  %v934_v4 = vpop.f32.mrf.mxu1 }
 0x1e7   :  { %v894_v5 = vpop.f32.mrf.mxu0  ;;  %v935_v6 = vpop.f32.mrf.mxu1 }
 0x201   :  { %v9404_v11 = vpop.f32.mrf.mxu0  ;;  %v9406_v9 = vpop.f32.mrf.mxu1 }
 0x203   :  { %v973_v12 = vpop.f32.mrf.mxu0  ;;  %v9408_v15 = vpop.f32.mrf.mxu1 }
 0x205   :  { %v975_v16 = vpop.f32.mrf.mxu0  ;;  %v1016_v17 = vpop.f32.mrf.mxu1 }
 0x206   :  { %v8202_v16 = vld [vmem:[#allocation10 + $0xab4] ss:$36 sps:$4 sm:$0xff]  }
 0x207   :  { %v976_v13 = vpop.f32.mrf.mxu0  ;;  %v1017_v18 = vpop.f32.mrf.mxu1  ;;  %v8200_v17 = vld [vmem:[#allocation10 + $0xab0] ss:$36 sps:$4 sm:$0xff]  }
 0x208   :  { %v8208_v13 = vld [vmem:[#allocation10 + $0xa6c] ss:$36 sps:$4 sm:$0xff]  }
 0x209   :  { %v8206_v18 = vld [vmem:[#allocation10 + $0xa68] ss:$36 sps:$4 sm:$0xff]  }
 0x221   :  { %v9419_v23 = vpop.f32.mrf.mxu0  ;;  %v1461_v24 = vpop.f32.mrf.mxu1 }
 0x222   :  { %v1462_v25 = vadd.f32 %v1461_v24, %v889_v61 }
 0x223   :  { %v7846_v27 = vpop.f32.mrf.mxu0  ;;  %v1463_v28 = vpop.f32.mrf.mxu1 }
 0x224   :  { %v1680_v29 = vadd.f32 %v1638_v22, %v1462_v25  ;;  %v1464_v30 = vadd.f32 %v1463_v28, %v891_v63  ;;  %v8214_v22 = vld [vmem:[#allocation10 + $0xa24] ss:$36 sps:$4 sm:$0xff]  }
 0x225   :  { %v1056_v31 = vpop.f32.mrf.mxu0  ;;  %v1465_v32 = vpop.f32.mrf.mxu1 }
 0x226   :  { %v7055_v33 = vmul.f32 -1.442695, %v1680_v29  ;;  %v1681_v34 = vadd.f32 %v1642_v26, %v1464_v30  ;;  %v8212_v26 = vld [vmem:[#allocation10 + $0xa20] ss:$36 sps:$4 sm:$0xff]  }
 0x227   :  { %v7847_v35 = vpop.f32.mrf.mxu0  ;;  %v1466_v36 = vpop.f32.mrf.mxu1  ;;  %v8220_v30 = vld [vmem:[#allocation10 + $0x9dc] ss:$36 sps:$4 sm:$0xff]  }
 0x228   :  { %9059 = vpow2.f32 %v7055_v33  ;;  %v7056_v37 = vmul.f32 -1.442695, %v1681_v34  ;;  %v8226_v36 = vld [vmem:[#allocation10 + $0x994] ss:$36 sps:$4 sm:$0xff]  }
 0x22a   :  { %9061 = vpow2.f32 %v7056_v37  ;;  %v1665_v37 = vsub.s32 7, %v9410_v38 }
 0x235   :  { %v9060_v39 = vpop.eup %9059 }
 0x236   :  { %v1716_v40 = vadd.f32 1.0, %v9060_v39 }
 0x237   :  { %v9062_v41 = vpop.eup %9061 }
 0x238   :  { %9063 = vrcp.f32 %v1716_v40  ;;  %v1717_v42 = vadd.f32 1.0, %v9062_v41  ;;  %v8232_v40 = vld [vmem:[#allocation10 + $0x94c] ss:$36 sps:$4 sm:$0xff]  }
 0x23a   :  { %9065 = vrcp.f32 %v1717_v42 }
 0x241   :  { %v1502_v49 = vpop.f32.mrf.mxu0  ;;  %v1543_v50 = vpop.f32.mrf.mxu1 }
 0x242   :  { %v1503_v51 = vadd.f32 %v1502_v49, %v930_v62  ;;  %v1544_v28 = vadd.f32 %v1543_v50, %v9404_v11  ;;  %v8224_v11 = vld [vmem:[#allocation10 + $0x990] ss:$36 sps:$4 sm:$0xff]   ;;  %v8230_v49 = vld [vmem:[#allocation10 + $0x948] ss:$36 sps:$4 sm:$0xff]  }
 0x243   :  { %v1504_v53 = vpop.f32.mrf.mxu0  ;;  %v1545_v54 = vpop.f32.mrf.mxu1 }
 0x244   :  { %v9436_v56 = vadd.f32 %v1646_v48, %v1503_v51  ;;  %v1505_v57 = vadd.f32 %v1504_v53, %v9402_v1  ;;  %v1546_v58 = vadd.f32 %v1545_v54, %v973_v12  ;;  %v1666_v48 = vrot.slane %v9413_v20, %v1665_v37 }
 0x245   :  { %v9064_v59 = vpop.eup %9063  ;;  %v1506_v60 = vpop.f32.mrf.mxu0 }
 0x246   :  { %v1547_v61 = vpop.f32.mrf.mxu1  ;;  %v7057_v62 = vmul.f32 -1.442695, %v9436_v56  ;;  %v9440_v63 = vadd.f32 %v1650_v52, %v1505_v57  ;;  %v1743_v3 = vmul.f32 %v9064_v59, %v1680_v29  ;;  %v9442_v43 = vadd.f32 %v1658_v55, %v1546_v58  ;;  %v8238_v52 = vld [vmem:[#allocation10 + $0x904] ss:$36 sps:$4 sm:$0xff]  }
 0x247   :  { %v9066_v2 = vpop.eup %9065  ;;  %v1507_v4 = vpop.f32.mrf.mxu0  ;;  %v1654_v29 = vrot.slane %v9413_v20, %v1653_v14  ;;  %v8236_v59 = vld [vmem:[#allocation10 + $0x900] ss:$36 sps:$4 sm:$0xff]  }
 0x248   :  { %v1548_v5 = vpop.f32.mrf.mxu1  ;;  %v1744_v6 = vmul.f32 %v9066_v2, %v1681_v34  ;;  %9067 = vpow2.f32 %v7057_v62  ;;  %v7058_v7 = vmul.f32 -1.442695, %v9440_v63  ;;  %v7060_v1 = vmul.f32 -1.442695, %v9442_v43  ;;  %v8218_v34 = vld [vmem:[#allocation10 + $0x9d8] ss:$36 sps:$4 sm:$0xff]  }
 0x249   :  { %v9448_v12 = vpack.c.bf16 %v1743_v3, %v1743_v3  ;;  %v9457_v35 = vadd.f32 %v1654_v29, %v1544_v28  ;;  %v8241_v3 = vld [vmem:[#allocation10 + $0xd3c] ss:$36 sps:$4 sm:$0xff]   ;;  %v8259_v29 = vld [vmem:[#allocation10 + $0xc64] ss:$36 sps:$4 sm:$0xff]  }
 0x24a   :  { %v9446_v8 = vpack.c.bf16 %v1744_v6, %v1744_v6  ;;  %9069 = vpow2.f32 %v7058_v7 }
 0x24b   :  { %9071 = vpow2.f32 %v7060_v1  ;;  %v7059_v39 = vmul.f32 -1.442695, %v9457_v35  ;;  %v8239_v1 = vld [vmem:[#allocation10 + $0xd38] ss:$36 sps:$4 sm:$0xff]  }
 0x24c   :  { %5874 = vmatprep.mubr.bf16.mxu0 %v9446_v8 }
 0x24d   :  { %5875 = vmatmul.mubr.bf16.vlgmr.msra.gmra.mxu0 %v9448_v12 }
 0x24e   :  { %5925 = vmatpush1.bf16.msra.mxu0 %v8194_v10  ;;  %v8242_v10 = vld [vmem:[#allocation10 + $0xf78] ss:$36 sps:$4 sm:$0xff]  }
 0x24f   :  { %5926 = vmatprep.subr.bf16.mxu0 %v8202_v16 }
 0x252   :  { %5927 = vmatpush1.bf16.msra.mxu0 %v8200_v17  ;;  %v8247_v17 = vld [vmem:[#allocation10 + $0xcf4] ss:$36 sps:$4 sm:$0xff]  }
 0x253   :  { %5928 = vmatprep.subr.bf16.mxu0 %v8208_v13  ;;  %v8250_v13 = vld [vmem:[#allocation10 + $0xf34] ss:$36 sps:$4 sm:$0xff]  }
 0x255   :  { %v9068_v24 = vpop.eup %9067 }
 0x256   :  { %v1718_v25 = vadd.f32 1.0, %v9068_v24  ;;  %5929 = vmatpush1.bf16.msra.mxu0 %v8206_v18  ;;  %v8253_v18 = vld [vmem:[#allocation10 + $0xcac] ss:$36 sps:$4 sm:$0xff]  }
 0x257   :  { %v9070_v27 = vpop.eup %9069  ;;  %5930 = vmatprep.subr.bf16.mxu0 %v8214_v22  ;;  %v8256_v22 = vld [vmem:[#allocation10 + $0xeec] ss:$36 sps:$4 sm:$0xff]  }
 0x258   :  { %v9072_v31 = vpop.eup %9071  ;;  %9073 = vrcp.f32 %v1718_v25  ;;  %v1719_v32 = vadd.f32 1.0, %v9070_v27  ;;  %v1661_v25 = vsub.s32 6, %v9410_v38  ;;  %v8254_v27 = vld [vmem:[#allocation10 + $0xee8] ss:$36 sps:$4 sm:$0xff]  }
 0x259   :  { %v1721_v33 = vadd.f32 1.0, %v9072_v31 }
 0x25a   :  { %9075 = vrcp.f32 %v1719_v32  ;;  %5931 = vmatpush1.bf16.msra.mxu0 %v8212_v26  ;;  %v8251_v26 = vld [vmem:[#allocation10 + $0xca8] ss:$36 sps:$4 sm:$0xff]   ;;  %v1662_v32 = vrot.slane %v9413_v20, %v1661_v25  ;;  %v8263_v20 = vld [vmem:[#allocation10 + $0xc18] ss:$36 sps:$4 sm:$0xff]  }
 0x25b   :  { %9077 = vrcp.f32 %v1721_v33  ;;  %5932 = vmatprep.subr.bf16.mxu0 %v8220_v30  ;;  %v8262_v30 = vld [vmem:[#allocation10 + $0xea4] ss:$36 sps:$4 sm:$0xff]  }
 0x25c   :  { %9079 = vpow2.f32 %v7059_v39  ;;  %v8257_v33 = vld [vmem:[#allocation10 + $0xc60] ss:$36 sps:$4 sm:$0xff]  }
 0x25d   :  { %v8265_v39 = vld [vmem:[#allocation10 + $0xc1c] ss:$36 sps:$4 sm:$0xff]  }
 0x25e   :  { %5933 = vmatpush1.bf16.msra.mxu0 %v8218_v34  ;;  %v8260_v34 = vld [vmem:[#allocation10 + $0xea0] ss:$36 sps:$4 sm:$0xff]  }
 0x25f   :  { %5934 = vmatprep.subr.bf16.mxu0 %v8226_v36 }
 0x261   :  { %v1584_v41 = vpop.f32.mrf.mxu0  ;;  %v9461_v42 = vpop.f32.mrf.mxu1 }
 0x262   :  { %5935 = vmatpush1.bf16.msra.mxu0 %v8224_v11  ;;  %v1585_v31 = vadd.f32 %v1584_v41, %v9406_v9  ;;  %v1626_v11 = vadd.f32 %v9461_v42, %v9419_v23  ;;  %v8266_v41 = vld [vmem:[#allocation10 + $0xe58] ss:$36 sps:$4 sm:$0xff]   ;;  %v8269_v42 = vld [vmem:[#allocation10 + $0xbd0] ss:$36 sps:$4 sm:$0xff]  }
 0x263   :  { %v1586_v50 = vpop.f32.mrf.mxu0  ;;  %v7866_v51 = vpop.f32.mrf.mxu1  ;;  %5936 = vmatprep.subr.bf16.mxu0 %v8232_v40  ;;  %v8268_v40 = vld [vmem:[#allocation10 + $0xe5c] ss:$36 sps:$4 sm:$0xff]  }
 0x264   :  { %v1587_v53 = vadd.f32 %v1586_v50, %v9408_v15  ;;  %v9489_v9 = vadd.f32 %v1662_v32, %v1585_v31  ;;  %v8271_v51 = vld [vmem:[#allocation10 + $0xbd4] ss:$36 sps:$4 sm:$0xff]   ;;  %v8302_v31 = vld [vmem:[#allocation10 + $0x1368] ss:$36 sps:$4 sm:$0xff]  }
 0x265   :  { %v9074_v54 = vpop.eup %9073  ;;  %v1588_v55 = vpop.f32.mrf.mxu0 }
 0x266   :  { %v1628_v57 = vpop.f32.mrf.mxu1  ;;  %v9467_v58 = vadd.f32 %v1666_v48, %v1587_v53  ;;  %5937 = vmatpush1.bf16.msra.mxu0 %v8230_v49  ;;  %v1745_v61 = vmul.f32 %v9074_v54, %v9436_v56  ;;  %v7054_v48 = vld [vmem:[#allocation8 + $0x8] ss:$0 sm:$0xff]  ;;  %v7061_v23 = vmul.f32 -1.442695, %v9489_v9  ;;  %v8272_v53 = vld [vmem:[#allocation10 + $0xe10] ss:$36 sps:$4 sm:$0xff]  }
 0x267   :  { %v9076_v60 = vpop.eup %9075  ;;  %v1589_v62 = vpop.f32.mrf.mxu0  ;;  %5938 = vmatprep.subr.bf16.mxu0 %v8238_v52  ;;  %v9491_v50 = vadd.f32 %v7054_v48, %v1626_v11  ;;  %v8274_v52 = vld [vmem:[#allocation10 + $0xe14] ss:$36 sps:$4 sm:$0xff]   ;;  %v8277_v55 = vld [vmem:[#allocation10 + $0xb8c] ss:$36 sps:$4 sm:$0xff]   ;;  %v8308_v11 = vld [vmem:[#allocation10 + $0x1320] ss:$36 sps:$4 sm:$0xff]  }
 0x268   :  { %v7867_v2 = vpop.f32.mrf.mxu1  ;;  %v9078_v4 = vpop.eup %9077  ;;  %v1746_v5 = vmul.f32 %v9076_v60, %v9440_v63  ;;  %v7062_v6 = vmul.f32 -1.442695, %v9467_v58  ;;  %v9475_v16 = vpack.c.bf16 %v1745_v61, %v1745_v61  ;;  %v8245_v63 = vld [vmem:[#allocation10 + $0xcf0] ss:$36 sps:$4 sm:$0xff]   ;;  %v8278_v60 = vld [vmem:[#allocation10 + $0xdc8] ss:$36 sps:$4 sm:$0xff]  }
 0x269   :  { %v1748_v15 = vmul.f32 %v9078_v4, %v9442_v43  ;;  %v8248_v43 = vld [vmem:[#allocation10 + $0xf30] ss:$36 sps:$4 sm:$0xff]   ;;  %v9080_v24 = vpop.eup %9079  ;;  %v7063_v54 = vmul.f32 -1.442695, %v9491_v50  ;;  %v8283_v61 = vld [vmem:[#allocation10 + $0xb44] ss:$36 sps:$4 sm:$0xff]  }
 0x26a   :  { %v9473_v7 = vpack.c.bf16 %v1746_v5, %v1746_v5  ;;  %9081 = vpow2.f32 %v7062_v6  ;;  %5939 = vmatpush1.bf16.msra.mxu0 %v8236_v59  ;;  %v1720_v28 = vadd.f32 1.0, %v9080_v24  ;;  %v8280_v57 = vld [vmem:[#allocation10 + $0xdcc] ss:$36 sps:$4 sm:$0xff]   ;;  %v8286_v62 = vld [vmem:[#allocation10 + $0xd84] ss:$36 sps:$4 sm:$0xff]  }
 0x26b   :  { %v9477_v56 = vpack.c.bf16 %v1748_v15, %v1748_v15  ;;  %5940 = vmatprep.subr.bf16.mxu0 %v8241_v3  ;;  %v8275_v59 = vld [vmem:[#allocation10 + $0xb88] ss:$36 sps:$4 sm:$0xff]   ;;  %v8281_v3 = vld [vmem:[#allocation10 + $0xb40] ss:$36 sps:$4 sm:$0xff]   ;;  %v8311_v48 = vld [vmem:[#allocation10 + $0x1098] ss:$36 sps:$4 sm:$0xff]  }
 0x26c   :  { %5915 = vmatprep.mubr.bf16.mxu1 %v9473_v7  ;;  %9083 = vrcp.f32 %v1720_v28  ;;  %v8284_v4 = vld [vmem:[#allocation10 + $0xd80] ss:$36 sps:$4 sm:$0xff]  }
 0x26d   :  { %5956 = vmatprep.mubr.bf16.mxu0 %v9477_v56  ;;  %5916 = vmatmul.mubr.bf16.vlgmr.msra.gmra.mxu1 %v9475_v16  ;;  %v8289_v15 = vld [vmem:[#allocation10 + $0x11bc] ss:$36 sps:$4 sm:$0xff]  }
 0x26e   :  { %5941 = vmatpush2.bf16.msra.mxu0 %v8239_v1  ;;  %5966 = vmatpush1.bf16.msra.mxu1 %v8242_v10  ;;  %v8292_v1 = vld [vmem:[#allocation10 + $0x13fc] ss:$36 sps:$4 sm:$0xff]  }
 0x26f   :  { %5942 = vmatprep.subr.bf16.mxu0 %v8247_v17  ;;  %5967 = vmatprep.subr.bf16.mxu1 %v8250_v13  ;;  %v8287_v13 = vld [vmem:[#allocation10 + $0x11b8] ss:$36 sps:$4 sm:$0xff]  }
 0x272   :  { %5943 = vmatpush2.bf16.msra.mxu0 %v8245_v63  ;;  %5968 = vmatpush1.bf16.msra.mxu1 %v8248_v43  ;;  %v8290_v63 = vld [vmem:[#allocation10 + $0x13f8] ss:$36 sps:$4 sm:$0xff]  }
 0x273   :  { %5944 = vmatprep.subr.bf16.mxu0 %v8253_v18  ;;  %5969 = vmatprep.subr.bf16.mxu1 %v8256_v22  ;;  %v8295_v18 = vld [vmem:[#allocation10 + $0x1174] ss:$36 sps:$4 sm:$0xff]  }
 0x274   :  { %v8298_v22 = vld [vmem:[#allocation10 + $0x13b4] ss:$36 sps:$4 sm:$0xff]  }
 0x276   :  { %5945 = vmatpush2.bf16.msra.mxu0 %v8251_v26  ;;  %5970 = vmatpush1.bf16.msra.mxu1 %v8254_v27  ;;  %v8301_v26 = vld [vmem:[#allocation10 + $0x112c] ss:$36 sps:$4 sm:$0xff]  }
 0x277   :  { %v9082_v36 = vpop.eup %9081  ;;  %5946 = vmatprep.subr.bf16.mxu0 %v8259_v29  ;;  %5971 = vmatprep.subr.bf16.mxu1 %v8262_v30  ;;  %v8304_v27 = vld [vmem:[#allocation10 + $0x136c] ss:$36 sps:$4 sm:$0xff]  }
 0x278   :  { %v1723_v49 = vadd.f32 1.0, %v9082_v36  ;;  %v8299_v30 = vld [vmem:[#allocation10 + $0x1128] ss:$36 sps:$4 sm:$0xff]   ;;  %v8305_v36 = vld [vmem:[#allocation10 + $0x10e0] ss:$36 sps:$4 sm:$0xff]  }
 0x279   :  { %v9084_v2 = vpop.eup %9083 }
 0x27a   :  { %9085 = vrcp.f32 %v1723_v49  ;;  %5947 = vmatpush2.bf16.msra.mxu0 %v8257_v33  ;;  %5972 = vmatpush1.bf16.msra.mxu1 %v8260_v34  ;;  %v1747_v6 = vmul.f32 %v9084_v2, %v9457_v35  ;;  %v8293_v35 = vld [vmem:[#allocation10 + $0x1170] ss:$36 sps:$4 sm:$0xff]   ;;  %v8307_v33 = vld [vmem:[#allocation10 + $0x10e4] ss:$36 sps:$4 sm:$0xff]   ;;  %v8314_v49 = vld [vmem:[#allocation10 + $0x12d8] ss:$36 sps:$4 sm:$0xff]  }
 0x27b   :  { %5948 = vmatprep.subr.bf16.mxu0 %v8265_v39  ;;  %5973 = vmatprep.subr.bf16.mxu1 %v8268_v40  ;;  %9087 = vpow2.f32 %v7061_v23  ;;  %v8310_v34 = vld [vmem:[#allocation10 + $0x1324] ss:$36 sps:$4 sm:$0xff]   ;;  %v8313_v39 = vld [vmem:[#allocation10 + $0x109c] ss:$36 sps:$4 sm:$0xff]   ;;  %v8325_v23 = vld [vmem:[#allocation10 + $0x100c] ss:$36 sps:$4 sm:$0xff]  }
 0x27c   :  { %9089 = vpow2.f32 %v7063_v54  ;;  %v9499_v43 = vpack.c.bf16 %v1747_v6, %v1747_v6  ;;  %v8316_v40 = vld [vmem:[#allocation10 + $0x12dc] ss:$36 sps:$4 sm:$0xff]   ;;  %v8326_v54 = vld [vmem:[#allocation10 + $0x1248] ss:$36 sps:$4 sm:$0xff]  }
 0x27d   :  { %v8335_v6 = vld [vmem:[#allocation10 + $0x200] ss:$36 sps:$4 sm:$0xff]  }
 0x27e   :  { %5949 = vmatpush2.bf16.msra.mxu0 %v8263_v20  ;;  %5974 = vmatpush1.bf16.msra.mxu1 %v8266_v41  ;;  %v8319_v20 = vld [vmem:[#allocation10 + $0x1054] ss:$36 sps:$4 sm:$0xff]  }
 0x27f   :  { %5950 = vmatprep.subr.bf16.mxu0 %v8271_v51  ;;  %5975 = vmatprep.subr.bf16.mxu1 %v8274_v52  ;;  %v8322_v41 = vld [vmem:[#allocation10 + $0x1294] ss:$36 sps:$4 sm:$0xff]  }
 0x280   :  { %v8317_v51 = vld [vmem:[#allocation10 + $0x1050] ss:$36 sps:$4 sm:$0xff]  }
 0x281   :  { %v8320_v52 = vld [vmem:[#allocation10 + $0x1290] ss:$36 sps:$4 sm:$0xff]  }
 0x282   :  { %5951 = vmatpush2.bf16.msra.mxu0 %v8269_v42  ;;  %5976 = vmatpush1.bf16.msra.mxu1 %v8272_v53  ;;  %v8328_v42 = vld [vmem:[#allocation10 + $0x124c] ss:$36 sps:$4 sm:$0xff]  }
 0x283   :  { %5952 = vmatprep.subr.bf16.mxu0 %v8277_v55  ;;  %5977 = vmatprep.subr.bf16.mxu1 %v8280_v57  ;;  %v8323_v53 = vld [vmem:[#allocation10 + $0x1008] ss:$36 sps:$4 sm:$0xff]  }
 0x284   :  { %v8331_v57 = vld [vmem:[#allocation10 + $0xfc4] ss:$36 sps:$4 sm:$0xff]  }
 0x286   :  { %5953 = vmatpush2.bf16.msra.mxu0 %v8275_v59  ;;  %5978 = vmatpush1.bf16.msra.mxu1 %v8278_v60  ;;  %v8334_v59 = vld [vmem:[#allocation10 + $0x1204] ss:$36 sps:$4 sm:$0xff]  }
 0x287   :  { %v9086_v5 = vpop.eup %9085  ;;  %5954 = vmatprep.subr.bf16.mxu0 %v8283_v61  ;;  %5979 = vmatprep.subr.bf16.mxu1 %v8286_v62  ;;  %v8329_v61 = vld [vmem:[#allocation10 + $0xfc0] ss:$36 sps:$4 sm:$0xff]  }
 0x288   :  { %v1750_v10 = vmul.f32 %v9086_v5, %v9467_v58  ;;  %v8296_v58 = vld [vmem:[#allocation10 + $0x13b0] ss:$36 sps:$4 sm:$0xff]   ;;  %v9088_v24 = vpop.eup %9087  ;;  %v8332_v62 = vld [vmem:[#allocation10 + $0x1200] ss:$36 sps:$4 sm:$0xff]  }
 0x289   :  { %v9090_v28 = vpop.eup %9089  ;;  %v1722_v29 = vadd.f32 1.0, %v9088_v24  ;;  %v8340_v5 = vld [vmem:[#allocation10 + $0x684] ss:$36 sps:$4 sm:$0xff]   ;;  %v8355_v24 = vld [vmem:[#allocation10 + $0x12c] ss:$36 sps:$4 sm:$0xff]  }
 0x28a   :  { %v9497_v17 = vpack.c.bf16 %v1750_v10, %v1750_v10  ;;  %5955 = vmatpush2.bf16.msra.mxu0 %v8281_v3  ;;  %5980 = vmatpush1.bf16.msra.mxu1 %v8284_v4  ;;  %v1724_v32 = vadd.f32 1.0, %v9090_v28  ;;  %v8337_v4 = vld [vmem:[#allocation10 + $0x204] ss:$36 sps:$4 sm:$0xff]  }
 0x28b   :  { %5981 = vmatprep.subr.bf16.mxu1 %v8289_v15  ;;  %6006 = vmatprep.subr.bf16.mxu0 %v8292_v1  ;;  %9091 = vrcp.f32 %v1722_v29  ;;  %v8338_v10 = vld [vmem:[#allocation10 + $0x680] ss:$36 sps:$4 sm:$0xff]   ;;  %v8356_v28 = vld [vmem:[#allocation10 + $0x5a8] ss:$36 sps:$4 sm:$0xff]  }
 0x28c   :  { %5997 = vmatprep.mubr.bf16.mxu1 %v9497_v17  ;;  %9093 = vrcp.f32 %v1724_v32  ;;  %v8361_v29 = vld [vmem:[#allocation10 + $0xe4] ss:$36 sps:$4 sm:$0xff]  }
 0x28d   :  { %5957 = vmatmul.mubr.bf16.vlgmr.msra.gmra.mxu0 %v9499_v43  ;;  %v8362_v32 = vld [vmem:[#allocation10 + $0x560] ss:$36 sps:$4 sm:$0xff]  }
 0x28e   :  { %5982 = vmatpush2.bf16.msra.mxu1 %v8287_v13  ;;  %6007 = vmatpush1.bf16.msra.mxu0 %v8290_v63  ;;  %v8343_v13 = vld [vmem:[#allocation10 + $0x1bc] ss:$36 sps:$4 sm:$0xff]  }
 0x28f   :  { %5983 = vmatprep.subr.bf16.mxu1 %v8295_v18  ;;  %6008 = vmatprep.subr.bf16.mxu0 %v8298_v22  ;;  %v8346_v63 = vld [vmem:[#allocation10 + $0x63c] ss:$36 sps:$4 sm:$0xff]   ;;  %v8349_v18 = vld [vmem:[#allocation10 + $0x174] ss:$36 sps:$4 sm:$0xff]  }
 0x290   :  { %6038 = vmatprep.mubr.bf16.mxu0 %v9254_v0  ;;  %v8352_v22 = vld [vmem:[#allocation10 + $0x5f4] ss:$36 sps:$4 sm:$0xff]  }
 0x292   :  { %5984 = vmatpush2.bf16.msra.mxu1 %v8293_v35  ;;  %6009 = vmatpush1.bf16.msra.mxu0 %v8296_v58  ;;  %v8347_v35 = vld [vmem:[#allocation10 + $0x170] ss:$36 sps:$4 sm:$0xff]  }
 0x293   :  { %5985 = vmatprep.subr.bf16.mxu1 %v8301_v26  ;;  %6010 = vmatprep.subr.bf16.mxu0 %v8304_v27  ;;  %v8350_v58 = vld [vmem:[#allocation10 + $0x5f0] ss:$36 sps:$4 sm:$0xff]   ;;  %v8353_v27 = vld [vmem:[#allocation10 + $0x128] ss:$36 sps:$4 sm:$0xff]  }
 0x294   :  { %v8358_v26 = vld [vmem:[#allocation10 + $0x5ac] ss:$36 sps:$4 sm:$0xff]  }
 0x296   :  { %5986 = vmatpush2.bf16.msra.mxu1 %v8299_v30  ;;  %6011 = vmatpush1.bf16.msra.mxu0 %v8302_v31  ;;  %v8364_v30 = vld [vmem:[#allocation10 + $0x564] ss:$36 sps:$4 sm:$0xff]  }
 0x297   :  { %5987 = vmatprep.subr.bf16.mxu1 %v8307_v33  ;;  %6012 = vmatprep.subr.bf16.mxu0 %v8310_v34  ;;  %v8359_v31 = vld [vmem:[#allocation10 + $0xe0] ss:$36 sps:$4 sm:$0xff]  }
 0x298   :  { %v9092_v55 = vpop.eup %9091  ;;  %v8367_v33 = vld [vmem:[#allocation10 + $0x9c] ss:$36 sps:$4 sm:$0xff]  }
 0x299   :  { %v9094_v60 = vpop.eup %9093  ;;  %v1749_v2 = vmul.f32 %v9092_v55, %v9489_v9  ;;  %v8341_v9 = vld [vmem:[#allocation10 + $0x1b8] ss:$36 sps:$4 sm:$0xff]  }
 0x29a   :  { %5988 = vmatpush2.bf16.msra.mxu1 %v8305_v36  ;;  %6013 = vmatpush1.bf16.msra.mxu0 %v8308_v11  ;;  %v1751_v3 = vmul.f32 %v9094_v60, %v9491_v50  ;;  %v8344_v50 = vld [vmem:[#allocation10 + $0x638] ss:$36 sps:$4 sm:$0xff]  }
 0x29b   :  { %5989 = vmatprep.subr.bf16.mxu1 %v8313_v39  ;;  %6014 = vmatprep.subr.bf16.mxu0 %v8316_v40  ;;  %v9506_v15 = vpack.c.bf16 %v1749_v2, %v1749_v2  ;;  %v8370_v34 = vld [vmem:[#allocation10 + $0x51c] ss:$36 sps:$4 sm:$0xff]   ;;  %v8373_v39 = vld [vmem:[#allocation10 + $0x54] ss:$36 sps:$4 sm:$0xff]  }
 0x29c   :  { %v9508_v1 = vpack.c.bf16 %v1751_v3, %v1751_v3  ;;  %v8365_v36 = vld [vmem:[#allocation10 + $0x98] ss:$36 sps:$4 sm:$0xff]   ;;  %v8395_v2 = vld [vmem:[#allocation10 + $0x3b0] ss:$36 sps:$4 sm:$0xff]  }
 0x29d   :  { %v8368_v11 = vld [vmem:[#allocation10 + $0x518] ss:$36 sps:$4 sm:$0xff]   ;;  %v8398_v3 = vld [vmem:[#allocation10 + $0x830] ss:$36 sps:$4 sm:$0xff]  }
 0x29e   :  { %5990 = vmatpush2.bf16.msra.mxu1 %v8311_v48  ;;  %6015 = vmatpush1.bf16.msra.mxu0 %v8314_v49  ;;  %v8376_v40 = vld [vmem:[#allocation10 + $0x4d4] ss:$36 sps:$4 sm:$0xff]   ;;  %v8391_v55 = vld [vmem:[#allocation10 + $0x3fc] ss:$36 sps:$4 sm:$0xff]  }
 0x29f   :  { %5991 = vmatprep.subr.bf16.mxu1 %v8319_v20  ;;  %6016 = vmatprep.subr.bf16.mxu0 %v8322_v41  ;;  %v8371_v48 = vld [vmem:[#allocation10 + $0x50] ss:$36 sps:$4 sm:$0xff]   ;;  %v8392_v60 = vld [vmem:[#allocation10 + $0x878] ss:$36 sps:$4 sm:$0xff]  }
 0x2a0   :  { %v8374_v49 = vld [vmem:[#allocation10 + $0x4d0] ss:$36 sps:$4 sm:$0xff]  }
 0x2a1   :  { %v8379_v20 = vld [vmem:[#allocation10 + $0xc] ss:$36 sps:$4 sm:$0xff]  }
 0x2a2   :  { %5992 = vmatpush2.bf16.msra.mxu1 %v8317_v51  ;;  %6017 = vmatpush1.bf16.msra.mxu0 %v8320_v52  ;;  %v8382_v41 = vld [vmem:[#allocation10 + $0x48c] ss:$36 sps:$4 sm:$0xff]  }
 0x2a3   :  { %5993 = vmatprep.subr.bf16.mxu1 %v8325_v23  ;;  %6018 = vmatprep.subr.bf16.mxu0 %v8328_v42  ;;  %v8377_v51 = vld [vmem:[#allocation10 + $0x8] ss:$36 sps:$4 sm:$0xff]  }
 0x2a4   :  { %v8380_v52 = vld [vmem:[#allocation10 + $0x488] ss:$36 sps:$4 sm:$0xff]  }
 0x2a5   :  { %v8385_v23 = vld [vmem:[#allocation10 + $0x444] ss:$36 sps:$4 sm:$0xff]  }
 0x2a6   :  { %5994 = vmatpush2.bf16.msra.mxu1 %v8323_v53  ;;  %6019 = vmatpush1.bf16.msra.mxu0 %v8326_v54  ;;  %v8388_v42 = vld [vmem:[#allocation10 + $0x8c4] ss:$36 sps:$4 sm:$0xff]  }
 0x2a7   :  { %5995 = vmatprep.subr.bf16.mxu1 %v8331_v57  ;;  %6020 = vmatprep.subr.bf16.mxu0 %v8334_v59  ;;  %v8383_v53 = vld [vmem:[#allocation10 + $0x440] ss:$36 sps:$4 sm:$0xff]   ;;  %v8389_v59 = vld [vmem:[#allocation10 + $0x3f8] ss:$36 sps:$4 sm:$0xff]  }
 0x2a8   :  { %v8386_v54 = vld [vmem:[#allocation10 + $0x8c0] ss:$36 sps:$4 sm:$0xff]  }
 0x2a9   :  { %v8394_v57 = vld [vmem:[#allocation10 + $0x87c] ss:$36 sps:$4 sm:$0xff]  }
 0x2aa   :  { %5996 = vmatpush2.bf16.msra.mxu1 %v8329_v61  ;;  %6021 = vmatpush1.bf16.msra.mxu0 %v8332_v62  ;;  %v8397_v61 = vld [vmem:[#allocation10 + $0x3b4] ss:$36 sps:$4 sm:$0xff]  }
 0x2ab   :  { %6047 = vmatprep.subr.bf16.mxu1 %v8337_v4  ;;  %6088 = vmatprep.subr.bf16.mxu0 %v8340_v5  ;;  %v8400_v62 = vld [vmem:[#allocation10 + $0x834] ss:$36 sps:$4 sm:$0xff]   ;;  %v8403_v4 = vld [vmem:[#allocation10 + $0x36c] ss:$36 sps:$4 sm:$0xff]  }
 0x2ac   :  { %v8406_v5 = vld [vmem:[#allocation10 + $0x7ec] ss:$36 sps:$4 sm:$0xff]  }
 0x2ad   :  { %5998 = vmatmul.mubr.bf16.vlgmr.msra.gmra.mxu1 %v9506_v15  ;;  %6039 = vmatmul.mubr.bf16.vlgmr.msra.gmra.mxu0 %v9508_v1 }
 0x2ae   :  { %6048 = vmatpush1.bf16.msra.mxu1 %v8335_v6  ;;  %6079 = vmatprep.mubr.bf16.mxu1 %v9446_v8  ;;  %v8401_v6 = vld [vmem:[#allocation10 + $0x368] ss:$36 sps:$4 sm:$0xff]  }
 0x2af   :  { %6089 = vmatpush1.bf16.msra.mxu0 %v8338_v10  ;;  %6120 = vmatprep.mubr.bf16.mxu0 %v9473_v7  ;;  %v8404_v10 = vld [vmem:[#allocation10 + $0x7e8] ss:$36 sps:$4 sm:$0xff]  }
 0x2b0   :  { %6049 = vmatprep.subr.bf16.mxu1 %v8343_v13  ;;  %6090 = vmatprep.subr.bf16.mxu0 %v8346_v63  ;;  %v8409_v13 = vld [vmem:[#allocation10 + $0x324] ss:$36 sps:$4 sm:$0xff]  }
 0x2b1   :  { %v8412_v63 = vld [vmem:[#allocation10 + $0x7a4] ss:$36 sps:$4 sm:$0xff]  }
 0x2b2   :  { %6050 = vmatpush1.bf16.msra.mxu1 %v8341_v9  ;;  %v8407_v9 = vld [vmem:[#allocation10 + $0x320] ss:$36 sps:$4 sm:$0xff]  }
 0x2b3   :  { %6091 = vmatpush1.bf16.msra.mxu0 %v8344_v50  ;;  %6051 = vmatprep.subr.bf16.mxu1 %v8349_v18  ;;  %v8410_v50 = vld [vmem:[#allocation10 + $0x7a0] ss:$36 sps:$4 sm:$0xff]  }
 0x2b4   :  { %6092 = vmatprep.subr.bf16.mxu0 %v8352_v22  ;;  %v8415_v18 = vld [vmem:[#allocation10 + $0x2dc] ss:$36 sps:$4 sm:$0xff]  }
 0x2b5   :  { %v8418_v22 = vld [vmem:[#allocation10 + $0x75c] ss:$36 sps:$4 sm:$0xff]  }
 0x2b6   :  { %6052 = vmatpush1.bf16.msra.mxu1 %v8347_v35  ;;  %v8413_v35 = vld [vmem:[#allocation10 + $0x2d8] ss:$36 sps:$4 sm:$0xff]  }
 0x2b7   :  { %6093 = vmatpush1.bf16.msra.mxu0 %v8350_v58  ;;  %6053 = vmatprep.subr.bf16.mxu1 %v8355_v24  ;;  %v8416_v58 = vld [vmem:[#allocation10 + $0x758] ss:$36 sps:$4 sm:$0xff]  }
 0x2b8   :  { %6094 = vmatprep.subr.bf16.mxu0 %v8358_v26  ;;  %v8421_v24 = vld [vmem:[#allocation10 + $0x294] ss:$36 sps:$4 sm:$0xff]  }
 0x2b9   :  { %v8424_v26 = vld [vmem:[#allocation10 + $0x714] ss:$36 sps:$4 sm:$0xff]  }
 0x2ba   :  { %6054 = vmatpush1.bf16.msra.mxu1 %v8353_v27  ;;  %v8419_v27 = vld [vmem:[#allocation10 + $0x290] ss:$36 sps:$4 sm:$0xff]  }
 0x2bb   :  { %6095 = vmatpush1.bf16.msra.mxu0 %v8356_v28  ;;  %6055 = vmatprep.subr.bf16.mxu1 %v8361_v29  ;;  %v8422_v28 = vld [vmem:[#allocation10 + $0x710] ss:$36 sps:$4 sm:$0xff]  }
 0x2bc   :  { %6096 = vmatprep.subr.bf16.mxu0 %v8364_v30  ;;  %v8427_v29 = vld [vmem:[#allocation10 + $0x24c] ss:$36 sps:$4 sm:$0xff]  }
 0x2bd   :  { %v8430_v30 = vld [vmem:[#allocation10 + $0x6cc] ss:$36 sps:$4 sm:$0xff]  }
 0x2be   :  { %6056 = vmatpush1.bf16.msra.mxu1 %v8359_v31  ;;  %v8425_v31 = vld [vmem:[#allocation10 + $0x248] ss:$36 sps:$4 sm:$0xff]  }
 0x2bf   :  { %6097 = vmatpush1.bf16.msra.mxu0 %v8362_v32  ;;  %6057 = vmatprep.subr.bf16.mxu1 %v8367_v33  ;;  %v8428_v32 = vld [vmem:[#allocation10 + $0x6c8] ss:$36 sps:$4 sm:$0xff]  }
 0x2c0   :  { %6098 = vmatprep.subr.bf16.mxu0 %v8370_v34  ;;  %v8433_v33 = vld [vmem:[#allocation10 + $0xb04] ss:$36 sps:$4 sm:$0xff]  }
 0x2c1   :  { %v8436_v34 = vld [vmem:[#allocation10 + $0xf84] ss:$36 sps:$4 sm:$0xff]  }
 0x2c2   :  { %6058 = vmatpush1.bf16.msra.mxu1 %v8365_v36  ;;  %v8431_v36 = vld [vmem:[#allocation10 + $0xb00] ss:$36 sps:$4 sm:$0xff]  }
 0x2c3   :  { %6099 = vmatpush1.bf16.msra.mxu0 %v8368_v11  ;;  %6059 = vmatprep.subr.bf16.mxu1 %v8373_v39  ;;  %v8434_v11 = vld [vmem:[#allocation10 + $0xf80] ss:$36 sps:$4 sm:$0xff]  }
 0x2c4   :  { %6100 = vmatprep.subr.bf16.mxu0 %v8376_v40  ;;  %v8439_v39 = vld [vmem:[#allocation10 + $0xabc] ss:$36 sps:$4 sm:$0xff]  }
 0x2c5   :  { %v8442_v40 = vld [vmem:[#allocation10 + $0xf3c] ss:$36 sps:$4 sm:$0xff]  }
 0x2c6   :  { %6060 = vmatpush1.bf16.msra.mxu1 %v8371_v48  ;;  %v8437_v48 = vld [vmem:[#allocation10 + $0xab8] ss:$36 sps:$4 sm:$0xff]  }
 0x2c7   :  { %6101 = vmatpush1.bf16.msra.mxu0 %v8374_v49  ;;  %6061 = vmatprep.subr.bf16.mxu1 %v8379_v20  ;;  %v8440_v49 = vld [vmem:[#allocation10 + $0xf38] ss:$36 sps:$4 sm:$0xff]  }
 0x2c8   :  { %6102 = vmatprep.subr.bf16.mxu0 %v8382_v41  ;;  %v8445_v20 = vld [vmem:[#allocation10 + $0xa74] ss:$36 sps:$4 sm:$0xff]  }
 0x2c9   :  { %v8448_v41 = vld [vmem:[#allocation10 + $0xef4] ss:$36 sps:$4 sm:$0xff]  }
 0x2ca   :  { %6062 = vmatpush1.bf16.msra.mxu1 %v8377_v51  ;;  %v8443_v51 = vld [vmem:[#allocation10 + $0xa70] ss:$36 sps:$4 sm:$0xff]  }
 0x2cb   :  { %6103 = vmatpush1.bf16.msra.mxu0 %v8380_v52  ;;  %6063 = vmatprep.subr.bf16.mxu1 %v8385_v23  ;;  %v8446_v52 = vld [vmem:[#allocation10 + $0xef0] ss:$36 sps:$4 sm:$0xff]  }
 0x2cc   :  { %6104 = vmatprep.subr.bf16.mxu0 %v8388_v42  ;;  %v8451_v23 = vld [vmem:[#allocation10 + $0xa2c] ss:$36 sps:$4 sm:$0xff]  }
 0x2cd   :  { %v8454_v42 = vld [vmem:[#allocation10 + $0xeac] ss:$36 sps:$4 sm:$0xff]  }
 0x2ce   :  { %6064 = vmatpush2.bf16.msra.mxu1 %v8383_v53  ;;  %v8449_v53 = vld [vmem:[#allocation10 + $0xa28] ss:$36 sps:$4 sm:$0xff]  }
 0x2cf   :  { %6105 = vmatpush2.bf16.msra.mxu0 %v8386_v54  ;;  %6065 = vmatprep.subr.bf16.mxu1 %v8391_v55  ;;  %v8452_v54 = vld [vmem:[#allocation10 + $0xea8] ss:$36 sps:$4 sm:$0xff]  }
 0x2d0   :  { %6106 = vmatprep.subr.bf16.mxu0 %v8394_v57  ;;  %v8457_v55 = vld [vmem:[#allocation10 + $0x9e4] ss:$36 sps:$4 sm:$0xff]  }
 0x2d1   :  { %v8460_v57 = vld [vmem:[#allocation10 + $0xe64] ss:$36 sps:$4 sm:$0xff]  }
 0x2d2   :  { %6066 = vmatpush2.bf16.msra.mxu1 %v8389_v59  ;;  %v8455_v59 = vld [vmem:[#allocation10 + $0x9e0] ss:$36 sps:$4 sm:$0xff]  }
 0x2d3   :  { %6107 = vmatpush2.bf16.msra.mxu0 %v8392_v60  ;;  %6067 = vmatprep.subr.bf16.mxu1 %v8397_v61  ;;  %v8458_v60 = vld [vmem:[#allocation10 + $0xe60] ss:$36 sps:$4 sm:$0xff]  }
 0x2d4   :  { %6108 = vmatprep.subr.bf16.mxu0 %v8400_v62  ;;  %v8463_v61 = vld [vmem:[#allocation10 + $0x99c] ss:$36 sps:$4 sm:$0xff]  }
 0x2d5   :  { %v8466_v62 = vld [vmem:[#allocation10 + $0xe1c] ss:$36 sps:$4 sm:$0xff]  }
 0x2d6   :  { %6068 = vmatpush2.bf16.msra.mxu1 %v8395_v2  ;;  %v8461_v2 = vld [vmem:[#allocation10 + $0x998] ss:$36 sps:$4 sm:$0xff]  }
 0x2d7   :  { %6109 = vmatpush2.bf16.msra.mxu0 %v8398_v3  ;;  %6069 = vmatprep.subr.bf16.mxu1 %v8403_v4  ;;  %v8464_v3 = vld [vmem:[#allocation10 + $0xe18] ss:$36 sps:$4 sm:$0xff]  }
 0x2d8   :  { %6110 = vmatprep.subr.bf16.mxu0 %v8406_v5  ;;  %v8469_v4 = vld [vmem:[#allocation10 + $0x954] ss:$36 sps:$4 sm:$0xff]  }
 0x2d9   :  { %v8472_v5 = vld [vmem:[#allocation10 + $0xdd4] ss:$36 sps:$4 sm:$0xff]  }
 0x2da   :  { %6070 = vmatpush2.bf16.msra.mxu1 %v8401_v6  ;;  %v8467_v6 = vld [vmem:[#allocation10 + $0x950] ss:$36 sps:$4 sm:$0xff]  }
 0x2db   :  { %6111 = vmatpush2.bf16.msra.mxu0 %v8404_v10  ;;  %6071 = vmatprep.subr.bf16.mxu1 %v8409_v13  ;;  %v8470_v10 = vld [vmem:[#allocation10 + $0xdd0] ss:$36 sps:$4 sm:$0xff]  }
 0x2dc   :  { %6112 = vmatprep.subr.bf16.mxu0 %v8412_v63  ;;  %v8475_v13 = vld [vmem:[#allocation10 + $0x90c] ss:$36 sps:$4 sm:$0xff]  }
 0x2dd   :  { %v8478_v63 = vld [vmem:[#allocation10 + $0xd8c] ss:$36 sps:$4 sm:$0xff]  }
 0x2de   :  { %6072 = vmatpush2.bf16.msra.mxu1 %v8407_v9  ;;  %v8473_v9 = vld [vmem:[#allocation10 + $0x908] ss:$36 sps:$4 sm:$0xff]  }
 0x2df   :  { %6113 = vmatpush2.bf16.msra.mxu0 %v8410_v50  ;;  %6073 = vmatprep.subr.bf16.mxu1 %v8415_v18  ;;  %v8476_v50 = vld [vmem:[#allocation10 + $0xd88] ss:$36 sps:$4 sm:$0xff]  }
 0x2e0   :  { %6114 = vmatprep.subr.bf16.mxu0 %v8418_v22  ;;  %v8481_v18 = vld [vmem:[#allocation10 + $0xd44] ss:$36 sps:$4 sm:$0xff]  }
 0x2e1   :  { %v8484_v22 = vld [vmem:[#allocation10 + $0x11c4] ss:$36 sps:$4 sm:$0xff]  }
 0x2e2   :  { %6074 = vmatpush2.bf16.msra.mxu1 %v8413_v35  ;;  %v8479_v35 = vld [vmem:[#allocation10 + $0xd40] ss:$36 sps:$4 sm:$0xff]  }
 0x2e3   :  { %6115 = vmatpush2.bf16.msra.mxu0 %v8416_v58  ;;  %6075 = vmatprep.subr.bf16.mxu1 %v8421_v24  ;;  %v8482_v58 = vld [vmem:[#allocation10 + $0x11c0] ss:$36 sps:$4 sm:$0xff]  }
 0x2e4   :  { %6116 = vmatprep.subr.bf16.mxu0 %v8424_v26  ;;  %v8487_v24 = vld [vmem:[#allocation10 + $0xcfc] ss:$36 sps:$4 sm:$0xff]  }
 0x2e5   :  { %v8490_v26 = vld [vmem:[#allocation10 + $0x117c] ss:$36 sps:$4 sm:$0xff]  }
 0x2e6   :  { %6076 = vmatpush2.bf16.msra.mxu1 %v8419_v27 }
 0x2e7   :  { %6117 = vmatpush2.bf16.msra.mxu0 %v8422_v28  ;;  %6077 = vmatprep.subr.bf16.mxu1 %v8427_v29  ;;  %v8485_v28 = vld [vmem:[#allocation10 + $0xcf8] ss:$36 sps:$4 sm:$0xff]  }
 0x2e8   :  { %6118 = vmatprep.subr.bf16.mxu0 %v8430_v30  ;;  %v8488_v30 = vld [vmem:[#allocation10 + $0x1178] ss:$36 sps:$4 sm:$0xff]  }
 0x2ea   :  { %6078 = vmatpush2.bf16.msra.mxu1 %v8425_v31  ;;  %v8493_v31 = vld [vmem:[#allocation10 + $0xcb4] ss:$36 sps:$4 sm:$0xff]  }
 0x2eb   :  { %6119 = vmatpush2.bf16.msra.mxu0 %v8428_v32  ;;  %6129 = vmatprep.subr.bf16.mxu1 %v8433_v33  ;;  %v8496_v32 = vld [vmem:[#allocation10 + $0x1134] ss:$36 sps:$4 sm:$0xff]  }
 0x2ec   :  { %6170 = vmatprep.subr.bf16.mxu0 %v8436_v34  ;;  %v8491_v34 = vld [vmem:[#allocation10 + $0xcb0] ss:$36 sps:$4 sm:$0xff]  }
 0x2ed   :  { %6080 = vmatmul.mubr.bf16.vlgmr.msra.gmra.mxu1 %v9448_v12 }
 0x2ee   :  { %6121 = vmatmul.mubr.bf16.vlgmr.msra.gmra.mxu0 %v9475_v16  ;;  %6130 = vmatpush1.bf16.msra.mxu1 %v8431_v36 }
 0x2ef   :  { %6161 = vmatprep.mubr.bf16.mxu1 %v9477_v56  ;;  %6171 = vmatpush1.bf16.msra.mxu0 %v8434_v11  ;;  %v8494_v11 = vld [vmem:[#allocation10 + $0x1130] ss:$36 sps:$4 sm:$0xff]  }
 0x2f0   :  { %6202 = vmatprep.mubr.bf16.mxu0 %v9497_v17  ;;  %6131 = vmatprep.subr.bf16.mxu1 %v8439_v39  ;;  %v8499_v39 = vld [vmem:[#allocation10 + $0xc6c] ss:$36 sps:$4 sm:$0xff]  }
 0x2f1   :  { %6172 = vmatprep.subr.bf16.mxu0 %v8442_v40  ;;  %v8502_v40 = vld [vmem:[#allocation10 + $0x10ec] ss:$36 sps:$4 sm:$0xff]  }
 0x2f2   :  { %6132 = vmatpush1.bf16.msra.mxu1 %v8437_v48  ;;  %v8497_v48 = vld [vmem:[#allocation10 + $0xc68] ss:$36 sps:$4 sm:$0xff]  }
 0x2f3   :  { %6173 = vmatpush1.bf16.msra.mxu0 %v8440_v49  ;;  %6133 = vmatprep.subr.bf16.mxu1 %v8445_v20  ;;  %v8500_v49 = vld [vmem:[#allocation10 + $0x10e8] ss:$36 sps:$4 sm:$0xff]  }
 0x2f4   :  { %6174 = vmatprep.subr.bf16.mxu0 %v8448_v41  ;;  %v8505_v20 = vld [vmem:[#allocation10 + $0xc24] ss:$36 sps:$4 sm:$0xff]  }
 0x2f5   :  { %v8508_v41 = vld [vmem:[#allocation10 + $0x10a4] ss:$36 sps:$4 sm:$0xff]  }
 0x2f6   :  { %6134 = vmatpush1.bf16.msra.mxu1 %v8443_v51  ;;  %v8503_v51 = vld [vmem:[#allocation10 + $0xc20] ss:$36 sps:$4 sm:$0xff]  }
 0x2f7   :  { %6175 = vmatpush1.bf16.msra.mxu0 %v8446_v52  ;;  %6135 = vmatprep.subr.bf16.mxu1 %v8451_v23  ;;  %v8506_v52 = vld [vmem:[#allocation10 + $0x10a0] ss:$36 sps:$4 sm:$0xff]  }
 0x2f8   :  { %6176 = vmatprep.subr.bf16.mxu0 %v8454_v42  ;;  %v8511_v23 = vld [vmem:[#allocation10 + $0xbdc] ss:$36 sps:$4 sm:$0xff]  }
 0x2f9   :  { %v8514_v42 = vld [vmem:[#allocation10 + $0x105c] ss:$36 sps:$4 sm:$0xff]  }
 0x2fa   :  { %6136 = vmatpush1.bf16.msra.mxu1 %v8449_v53  ;;  %v8509_v53 = vld [vmem:[#allocation10 + $0xbd8] ss:$36 sps:$4 sm:$0xff]  }
 0x2fb   :  { %6177 = vmatpush1.bf16.msra.mxu0 %v8452_v54  ;;  %6137 = vmatprep.subr.bf16.mxu1 %v8457_v55  ;;  %v8512_v54 = vld [vmem:[#allocation10 + $0x1058] ss:$36 sps:$4 sm:$0xff]  }
 0x2fc   :  { %6178 = vmatprep.subr.bf16.mxu0 %v8460_v57  ;;  %v8517_v55 = vld [vmem:[#allocation10 + $0xb94] ss:$36 sps:$4 sm:$0xff]  }
 0x2fd   :  { %v8520_v57 = vld [vmem:[#allocation10 + $0x1014] ss:$36 sps:$4 sm:$0xff]  }
 0x2fe   :  { %6138 = vmatpush1.bf16.msra.mxu1 %v8455_v59  ;;  %v8515_v59 = vld [vmem:[#allocation10 + $0xb90] ss:$36 sps:$4 sm:$0xff]  }
 0x2ff   :  { %6179 = vmatpush1.bf16.msra.mxu0 %v8458_v60  ;;  %6139 = vmatprep.subr.bf16.mxu1 %v8463_v61  ;;  %v8518_v60 = vld [vmem:[#allocation10 + $0x1010] ss:$36 sps:$4 sm:$0xff]  }
 0x300   :  { %6180 = vmatprep.subr.bf16.mxu0 %v8466_v62  ;;  %v8523_v61 = vld [vmem:[#allocation10 + $0xb4c] ss:$36 sps:$4 sm:$0xff]  }
 0x301   :  { %v8526_v62 = vld [vmem:[#allocation10 + $0xfcc] ss:$36 sps:$4 sm:$0xff]  }
 0x302   :  { %6140 = vmatpush1.bf16.msra.mxu1 %v8461_v2  ;;  %v8521_v2 = vld [vmem:[#allocation10 + $0xb48] ss:$36 sps:$4 sm:$0xff]  }
 0x303   :  { %6181 = vmatpush1.bf16.msra.mxu0 %v8464_v3  ;;  %6141 = vmatprep.subr.bf16.mxu1 %v8469_v4  ;;  %v8524_v3 = vld [vmem:[#allocation10 + $0xfc8] ss:$36 sps:$4 sm:$0xff]  }
 0x304   :  { %6182 = vmatprep.subr.bf16.mxu0 %v8472_v5  ;;  %v8529_v4 = vld [vmem:[#allocation10 + $0x1404] ss:$36 sps:$4 sm:$0xff]   ;;  %v8532_v5 = vld [vmem:[#allocation10 + $0x20c] ss:$36 sps:$4 sm:$0xff]  }
 0x306   :  { %6142 = vmatpush1.bf16.msra.mxu1 %v8467_v6  ;;  %v8527_v6 = vld [vmem:[#allocation10 + $0x1400] ss:$36 sps:$4 sm:$0xff]  }
 0x307   :  { %6183 = vmatpush1.bf16.msra.mxu0 %v8470_v10  ;;  %6143 = vmatprep.subr.bf16.mxu1 %v8475_v13  ;;  %v8530_v10 = vld [vmem:[#allocation10 + $0x208] ss:$36 sps:$4 sm:$0xff]   ;;  %v8535_v13 = vld [vmem:[#allocation10 + $0x13bc] ss:$36 sps:$4 sm:$0xff]  }
 0x308   :  { %6184 = vmatprep.subr.bf16.mxu0 %v8478_v63  ;;  %v8538_v63 = vld [vmem:[#allocation10 + $0x1c4] ss:$36 sps:$4 sm:$0xff]  }
 0x30a   :  { %6144 = vmatpush1.bf16.msra.mxu1 %v8473_v9 }
 0x30b   :  { %6185 = vmatpush1.bf16.msra.mxu0 %v8476_v50  ;;  %6145 = vmatprep.subr.bf16.mxu1 %v8481_v18  ;;  %v8533_v50 = vld [vmem:[#allocation10 + $0x13b8] ss:$36 sps:$4 sm:$0xff]  }
 0x30c   :  { %6186 = vmatprep.subr.bf16.mxu0 %v8484_v22  ;;  %v8536_v22 = vld [vmem:[#allocation10 + $0x1c0] ss:$36 sps:$4 sm:$0xff]  }
 0x30d   :  { %v9518_v27 = vpop.f32.mrf.mxu0 }
 0x30e   :  { %6146 = vmatpush2.bf16.msra.mxu1 %v8479_v35  ;;  %v8541_v35 = vld [vmem:[#allocation10 + $0x1374] ss:$36 sps:$4 sm:$0xff]  }
 0x30f   :  { %6187 = vmatpush2.bf16.msra.mxu0 %v8482_v58  ;;  %v9520_v29 = vpop.f32.mrf.mxu0  ;;  %6147 = vmatprep.subr.bf16.mxu1 %v8487_v24  ;;  %v8544_v58 = vld [vmem:[#allocation10 + $0x17c] ss:$36 sps:$4 sm:$0xff]  }
 0x310   :  { %6188 = vmatprep.subr.bf16.mxu0 %v8490_v26  ;;  %v8539_v26 = vld [vmem:[#allocation10 + $0x1370] ss:$36 sps:$4 sm:$0xff]  }
 0x311   :  { %v5880_v33 = vpop.f32.mrf.mxu0 }
 0x312   :  { %6148 = vmatpush2.bf16.msra.mxu1 %v8485_v28  ;;  %v8545_v33 = vld [vmem:[#allocation10 + $0x1328] ss:$36 sps:$4 sm:$0xff]  }
 0x313   :  { %6189 = vmatpush2.bf16.msra.mxu0 %v8488_v30  ;;  %v5881_v36 = vpop.f32.mrf.mxu0  ;;  %6149 = vmatprep.subr.bf16.mxu1 %v8493_v31  ;;  %v8542_v30 = vld [vmem:[#allocation10 + $0x178] ss:$36 sps:$4 sm:$0xff]   ;;  %v8547_v31 = vld [vmem:[#allocation10 + $0x132c] ss:$36 sps:$4 sm:$0xff]  }
 0x314   :  { %6190 = vmatprep.subr.bf16.mxu0 %v8496_v32  ;;  %v8550_v32 = vld [vmem:[#allocation10 + $0x134] ss:$36 sps:$4 sm:$0xff]   ;;  %v8553_v36 = vld [vmem:[#allocation10 + $0x12e4] ss:$36 sps:$4 sm:$0xff]  }
 0x316   :  { %6150 = vmatpush2.bf16.msra.mxu1 %v8491_v34  ;;  %v8548_v34 = vld [vmem:[#allocation10 + $0x130] ss:$36 sps:$4 sm:$0xff]  }
 0x317   :  { %6191 = vmatpush2.bf16.msra.mxu0 %v8494_v11  ;;  %6151 = vmatprep.subr.bf16.mxu1 %v8499_v39  ;;  %v8556_v11 = vld [vmem:[#allocation10 + $0xec] ss:$36 sps:$4 sm:$0xff]   ;;  %v8551_v39 = vld [vmem:[#allocation10 + $0x12e0] ss:$36 sps:$4 sm:$0xff]  }
 0x318   :  { %6192 = vmatprep.subr.bf16.mxu0 %v8502_v40  ;;  %v8554_v40 = vld [vmem:[#allocation10 + $0xe8] ss:$36 sps:$4 sm:$0xff]  }
 0x31a   :  { %6152 = vmatpush2.bf16.msra.mxu1 %v8497_v48  ;;  %v8559_v48 = vld [vmem:[#allocation10 + $0x129c] ss:$36 sps:$4 sm:$0xff]  }
 0x31b   :  { %6193 = vmatpush2.bf16.msra.mxu0 %v8500_v49  ;;  %6153 = vmatprep.subr.bf16.mxu1 %v8505_v20  ;;  %v8562_v49 = vld [vmem:[#allocation10 + $0xa4] ss:$36 sps:$4 sm:$0xff]   ;;  %v8557_v20 = vld [vmem:[#allocation10 + $0x1298] ss:$36 sps:$4 sm:$0xff]  }
 0x31c   :  { %6194 = vmatprep.subr.bf16.mxu0 %v8508_v41  ;;  %v8560_v41 = vld [vmem:[#allocation10 + $0xa0] ss:$36 sps:$4 sm:$0xff]  }
 0x31e   :  { %6154 = vmatpush2.bf16.msra.mxu1 %v8503_v51  ;;  %v8565_v51 = vld [vmem:[#allocation10 + $0x1254] ss:$36 sps:$4 sm:$0xff]  }
 0x31f   :  { %6195 = vmatpush2.bf16.msra.mxu0 %v8506_v52  ;;  %6155 = vmatprep.subr.bf16.mxu1 %v8511_v23  ;;  %v8568_v52 = vld [vmem:[#allocation10 + $0x5c] ss:$36 sps:$4 sm:$0xff]   ;;  %v8563_v23 = vld [vmem:[#allocation10 + $0x1250] ss:$36 sps:$4 sm:$0xff]  }
 0x320   :  { %6196 = vmatprep.subr.bf16.mxu0 %v8514_v42  ;;  %v8566_v42 = vld [vmem:[#allocation10 + $0x58] ss:$36 sps:$4 sm:$0xff]  }
 0x322   :  { %6156 = vmatpush2.bf16.msra.mxu1 %v8509_v53  ;;  %v8571_v53 = vld [vmem:[#allocation10 + $0x120c] ss:$36 sps:$4 sm:$0xff]  }
 0x323   :  { %6197 = vmatpush2.bf16.msra.mxu0 %v8512_v54  ;;  %6157 = vmatprep.subr.bf16.mxu1 %v8517_v55  ;;  %v8574_v54 = vld [vmem:[#allocation10 + $0x14] ss:$36 sps:$4 sm:$0xff]   ;;  %v8569_v55 = vld [vmem:[#allocation10 + $0x1208] ss:$36 sps:$4 sm:$0xff]  }
 0x324   :  { %6198 = vmatprep.subr.bf16.mxu0 %v8520_v57  ;;  %v8572_v57 = vld [vmem:[#allocation10 + $0x10] ss:$36 sps:$4 sm:$0xff]  }
 0x326   :  { %6158 = vmatpush2.bf16.msra.mxu1 %v8515_v59  ;;  %v8580_v59 = vld [vmem:[#allocation10 + $0x68c] ss:$36 sps:$4 sm:$0xff]  }
 0x327   :  { %6199 = vmatpush2.bf16.msra.mxu0 %v8518_v60  ;;  %6159 = vmatprep.subr.bf16.mxu1 %v8523_v61  ;;  %v8577_v60 = vld [vmem:[#allocation10 + $0x44c] ss:$36 sps:$4 sm:$0xff]  }
 0x328   :  { %6200 = vmatprep.subr.bf16.mxu0 %v8526_v62  ;;  %v8578_v61 = vld [vmem:[#allocation10 + $0x688] ss:$36 sps:$4 sm:$0xff]  }
 0x329   :  { %v8575_v62 = vld [vmem:[#allocation10 + $0x448] ss:$36 sps:$4 sm:$0xff]  }
 0x32a   :  { %6160 = vmatpush2.bf16.msra.mxu1 %v8521_v2  ;;  %v8586_v2 = vld [vmem:[#allocation10 + $0x644] ss:$36 sps:$4 sm:$0xff]  }
 0x32b   :  { %6201 = vmatpush2.bf16.msra.mxu0 %v8524_v3  ;;  %6211 = vmatprep.subr.bf16.mxu1 %v8529_v4  ;;  %v8583_v3 = vld [vmem:[#allocation10 + $0x404] ss:$36 sps:$4 sm:$0xff]  }
 0x32c   :  { %6252 = vmatprep.subr.bf16.mxu0 %v8532_v5  ;;  %v8584_v5 = vld [vmem:[#allocation10 + $0x640] ss:$36 sps:$4 sm:$0xff]  }
 0x32d   :  { %6162 = vmatmul.mubr.bf16.vlgmr.msra.gmra.mxu1 %v9499_v43  ;;  %v9523_v9 = vpop.f32.mrf.mxu1 }
 0x32e   :  { %6203 = vmatmul.mubr.bf16.vlgmr.msra.gmra.mxu0 %v9506_v15  ;;  %6212 = vmatpush1.bf16.msra.mxu1 %v8527_v6 }
 0x32f   :  { %6253 = vmatpush1.bf16.msra.mxu0 %v8530_v10  ;;  %6284 = vmatprep.mubr.bf16.mxu0 %v9446_v8  ;;  %v9527_v18 = vpop.f32.mrf.mxu1  ;;  %v8581_v10 = vld [vmem:[#allocation10 + $0x400] ss:$36 sps:$4 sm:$0xff]  }
 0x330   :  { %6213 = vmatprep.subr.bf16.mxu1 %v8535_v13  ;;  %6254 = vmatprep.subr.bf16.mxu0 %v8538_v63  ;;  %v8592_v13 = vld [vmem:[#allocation10 + $0x5fc] ss:$36 sps:$4 sm:$0xff]  }
 0x331   :  { %v5921_v24 = vpop.f32.mrf.mxu1  ;;  %6243 = vmatprep.mubr.bf16.mxu1 %v9254_v0  ;;  %v8589_v63 = vld [vmem:[#allocation10 + $0x3bc] ss:$36 sps:$4 sm:$0xff]  }
 0x332   :  { %6214 = vmatpush1.bf16.msra.mxu1 %v8533_v50  ;;  %v8598_v24 = vld [vmem:[#allocation10 + $0x5b4] ss:$36 sps:$4 sm:$0xff]  }
 0x333   :  { %6255 = vmatpush1.bf16.msra.mxu0 %v8536_v22  ;;  %v5922_v28 = vpop.f32.mrf.mxu1  ;;  %6215 = vmatprep.subr.bf16.mxu1 %v8541_v35  ;;  %v8590_v22 = vld [vmem:[#allocation10 + $0x5f8] ss:$36 sps:$4 sm:$0xff]  }
 0x334   :  { %6256 = vmatprep.subr.bf16.mxu0 %v8544_v58  ;;  %v8587_v58 = vld [vmem:[#allocation10 + $0x3b8] ss:$36 sps:$4 sm:$0xff]   ;;  %v8596_v28 = vld [vmem:[#allocation10 + $0x5b0] ss:$36 sps:$4 sm:$0xff]  }
 0x336   :  { %6216 = vmatpush1.bf16.msra.mxu1 %v8539_v26  ;;  %v8595_v26 = vld [vmem:[#allocation10 + $0x374] ss:$36 sps:$4 sm:$0xff]  }
 0x337   :  { %6257 = vmatpush1.bf16.msra.mxu0 %v8542_v30  ;;  %6217 = vmatprep.subr.bf16.mxu1 %v8547_v31  ;;  %v8593_v30 = vld [vmem:[#allocation10 + $0x370] ss:$36 sps:$4 sm:$0xff]  }
 0x338   :  { %6258 = vmatprep.subr.bf16.mxu0 %v8550_v32  ;;  %v8604_v31 = vld [vmem:[#allocation10 + $0x56c] ss:$36 sps:$4 sm:$0xff]  }
 0x339   :  { %v8601_v32 = vld [vmem:[#allocation10 + $0x32c] ss:$36 sps:$4 sm:$0xff]  }
 0x33a   :  { %6218 = vmatpush1.bf16.msra.mxu1 %v8545_v33  ;;  %v8602_v33 = vld [vmem:[#allocation10 + $0x568] ss:$36 sps:$4 sm:$0xff]  }
 0x33b   :  { %6259 = vmatpush1.bf16.msra.mxu0 %v8548_v34  ;;  %6219 = vmatprep.subr.bf16.mxu1 %v8553_v36  ;;  %v8599_v34 = vld [vmem:[#allocation10 + $0x328] ss:$36 sps:$4 sm:$0xff]  }
 0x33c   :  { %6260 = vmatprep.subr.bf16.mxu0 %v8556_v11  ;;  %v8610_v36 = vld [vmem:[#allocation10 + $0x524] ss:$36 sps:$4 sm:$0xff]  }
 0x33d   :  { %v8607_v11 = vld [vmem:[#allocation10 + $0x2e4] ss:$36 sps:$4 sm:$0xff]  }
 0x33e   :  { %6220 = vmatpush1.bf16.msra.mxu1 %v8551_v39  ;;  %v8608_v39 = vld [vmem:[#allocation10 + $0x520] ss:$36 sps:$4 sm:$0xff]  }
 0x33f   :  { %6261 = vmatpush1.bf16.msra.mxu0 %v8554_v40  ;;  %6221 = vmatprep.subr.bf16.mxu1 %v8559_v48  ;;  %v8605_v40 = vld [vmem:[#allocation10 + $0x2e0] ss:$36 sps:$4 sm:$0xff]  }
 0x340   :  { %6262 = vmatprep.subr.bf16.mxu0 %v8562_v49  ;;  %v8616_v48 = vld [vmem:[#allocation10 + $0x4dc] ss:$36 sps:$4 sm:$0xff]  }
 0x341   :  { %v8613_v49 = vld [vmem:[#allocation10 + $0x29c] ss:$36 sps:$4 sm:$0xff]  }
 0x342   :  { %6222 = vmatpush1.bf16.msra.mxu1 %v8557_v20  ;;  %v9536_v20 = vld [vmem:[#allocation11] sm:$0xff] }
 0x343   :  { %6263 = vmatpush1.bf16.msra.mxu0 %v8560_v41  ;;  %6223 = vmatprep.subr.bf16.mxu1 %v8565_v51  ;;  %v8614_v41 = vld [vmem:[#allocation10 + $0x4d8] ss:$36 sps:$4 sm:$0xff]  }
 0x344   :  { %6264 = vmatprep.subr.bf16.mxu0 %v8568_v52  ;;  %v8611_v51 = vld [vmem:[#allocation10 + $0x298] ss:$36 sps:$4 sm:$0xff]  }
 0x345   :  { %v8622_v52 = vld [vmem:[#allocation10 + $0x494] ss:$36 sps:$4 sm:$0xff]  }
 0x346   :  { %6224 = vmatpush1.bf16.msra.mxu1 %v8563_v23  ;;  %v2488_v23 = vrot.slane %v9536_v20, %v1637_v19 }
 0x347   :  { %6265 = vmatpush1.bf16.msra.mxu0 %v8566_v42  ;;  %6225 = vmatprep.subr.bf16.mxu1 %v8571_v53  ;;  %v8619_v42 = vld [vmem:[#allocation10 + $0x254] ss:$36 sps:$4 sm:$0xff]   ;;  %v2492_v53 = vrot.slane %v9536_v20, %v1641_v21 }
 0x348   :  { %6266 = vmatprep.subr.bf16.mxu0 %v8574_v54  ;;  %v8620_v54 = vld [vmem:[#allocation10 + $0x490] ss:$36 sps:$4 sm:$0xff]  }
 0x34a   :  { %6226 = vmatpush1.bf16.msra.mxu1 %v8569_v55  ;;  %v8617_v55 = vld [vmem:[#allocation10 + $0x250] ss:$36 sps:$4 sm:$0xff]  }
 0x34b   :  { %6267 = vmatpush1.bf16.msra.mxu0 %v8572_v57  ;;  %6293 = vmatprep.subr.bf16.mxu1 %v8580_v59  ;;  %v8625_v57 = vld [vmem:[#allocation10 + $0x8cc] ss:$36 sps:$4 sm:$0xff]   ;;  %v5877_v59 = vadd.f32 %v9518_v27, %v2488_v23  ;;  %v8658_v23 = vld [vmem:[#allocation10 + $0x9a4] ss:$36 sps:$4 sm:$0xff]  }
 0x34c   :  { %6268 = vmatprep.subr.bf16.mxu0 %v8577_v60  ;;  %v8628_v60 = vld [vmem:[#allocation10 + $0xb0c] ss:$36 sps:$4 sm:$0xff]  }
 0x34d   :  { %v9530_v4 = vpop.f32.mrf.mxu0  ;;  %6244 = vmatmul.mubr.bf16.vlgmr.msra.gmra.mxu1 %v9508_v1  ;;  %v5918_v19 = vadd.f32 %v9523_v9, %v5877_v59  ;;  %v8662_v59 = vld [vmem:[#allocation10 + $0x958] ss:$36 sps:$4 sm:$0xff]  }
 0x34e   :  { %6294 = vmatpush1.bf16.msra.mxu1 %v8578_v61  ;;  %6325 = vmatprep.mubr.bf16.mxu1 %v9473_v7  ;;  %v5879_v61 = vadd.f32 %v9520_v29, %v2492_v53  ;;  %v8629_v29 = vld [vmem:[#allocation10 + $0x880] ss:$36 sps:$4 sm:$0xff]  }
 0x34f   :  { %6269 = vmatpush2.bf16.msra.mxu0 %v8575_v62  ;;  %v9534_v6 = vpop.f32.mrf.mxu0  ;;  %6295 = vmatprep.subr.bf16.mxu1 %v8586_v2  ;;  %v8623_v62 = vld [vmem:[#allocation10 + $0x8c8] ss:$36 sps:$4 sm:$0xff]   ;;  %v8656_v53 = vld [vmem:[#allocation10 + $0x9a0] ss:$36 sps:$4 sm:$0xff]  }
 0x350   :  { %6270 = vmatprep.subr.bf16.mxu0 %v8583_v3  ;;  %v8626_v2 = vld [vmem:[#allocation10 + $0xb08] ss:$36 sps:$4 sm:$0xff]   ;;  %v5920_v21 = vadd.f32 %v9527_v18, %v5879_v61  ;;  %v5959_v3 = vadd.f32 %v9530_v4, %v5918_v19  ;;  %v8632_v18 = vld [vmem:[#allocation10 + $0xac0] ss:$36 sps:$4 sm:$0xff]   ;;  %v8670_v61 = vld [vmem:[#allocation10 + $0x914] ss:$36 sps:$4 sm:$0xff]  }
 0x351   :  { %v5962_v50 = vpop.f32.mrf.mxu0  ;;  %v8665_v19 = vld [vmem:[#allocation10 + $0x6d0] ss:$36 sps:$4 sm:$0xff]  }
 0x352   :  { %6296 = vmatpush1.bf16.msra.mxu1 %v8584_v5  ;;  %v8631_v5 = vld [vmem:[#allocation10 + $0x884] ss:$36 sps:$4 sm:$0xff]  }
 0x353   :  { %6271 = vmatpush2.bf16.msra.mxu0 %v8581_v10  ;;  %v5963_v35 = vpop.f32.mrf.mxu0  ;;  %6297 = vmatprep.subr.bf16.mxu1 %v8592_v13  ;;  %v8634_v10 = vld [vmem:[#allocation10 + $0xac4] ss:$36 sps:$4 sm:$0xff]  }
 0x354   :  { %6272 = vmatprep.subr.bf16.mxu0 %v8589_v63  ;;  %v5961_v63 = vadd.f32 %v9534_v6, %v5920_v21  ;;  %v8637_v35 = vld [vmem:[#allocation10 + $0x83c] ss:$36 sps:$4 sm:$0xff]   ;;  %v8673_v21 = vld [vmem:[#allocation10 + $0xd4c] ss:$36 sps:$4 sm:$0xff]  }
 0x356   :  { %6298 = vmatpush1.bf16.msra.mxu1 %v8590_v22 }
 0x357   :  { %6273 = vmatpush2.bf16.msra.mxu0 %v8587_v58  ;;  %6299 = vmatprep.subr.bf16.mxu1 %v8598_v24  ;;  %v8640_v58 = vld [vmem:[#allocation10 + $0xa7c] ss:$36 sps:$4 sm:$0xff]  }
 0x358   :  { %6274 = vmatprep.subr.bf16.mxu0 %v8595_v26 }
 0x35a   :  { %6300 = vmatpush1.bf16.msra.mxu1 %v8596_v28 }
 0x35b   :  { %6275 = vmatpush2.bf16.msra.mxu0 %v8593_v30  ;;  %6301 = vmatprep.subr.bf16.mxu1 %v8604_v31  ;;  %v8635_v30 = vld [vmem:[#allocation10 + $0x838] ss:$36 sps:$4 sm:$0xff]  }
 0x35c   :  { %6276 = vmatprep.subr.bf16.mxu0 %v8601_v32 }
 0x35e   :  { %6302 = vmatpush1.bf16.msra.mxu1 %v8602_v33  ;;  %v8638_v33 = vld [vmem:[#allocation10 + $0xa78] ss:$36 sps:$4 sm:$0xff]  }
 0x35f   :  { %6277 = vmatpush2.bf16.msra.mxu0 %v8599_v34  ;;  %6303 = vmatprep.subr.bf16.mxu1 %v8610_v36  ;;  %v8643_v34 = vld [vmem:[#allocation10 + $0x7f4] ss:$36 sps:$4 sm:$0xff]  }
 0x360   :  { %6278 = vmatprep.subr.bf16.mxu0 %v8607_v11  ;;  %v8646_v11 = vld [vmem:[#allocation10 + $0xa34] ss:$36 sps:$4 sm:$0xff]  }
 0x362   :  { %6304 = vmatpush1.bf16.msra.mxu1 %v8608_v39  ;;  %v8641_v39 = vld [vmem:[#allocation10 + $0x7f0] ss:$36 sps:$4 sm:$0xff]  }
 0x363   :  { %6279 = vmatpush2.bf16.msra.mxu0 %v8605_v40  ;;  %6305 = vmatprep.subr.bf16.mxu1 %v8616_v48  ;;  %v8644_v40 = vld [vmem:[#allocation10 + $0xa30] ss:$36 sps:$4 sm:$0xff]  }
 0x364   :  { %6280 = vmatprep.subr.bf16.mxu0 %v8613_v49  ;;  %v8649_v48 = vld [vmem:[#allocation10 + $0x7ac] ss:$36 sps:$4 sm:$0xff]  }
 0x365   :  { %v8652_v49 = vld [vmem:[#allocation10 + $0x9ec] ss:$36 sps:$4 sm:$0xff]  }
 0x366   :  { %6306 = vmatpush1.bf16.msra.mxu1 %v8614_v41  ;;  %v8647_v41 = vld [vmem:[#allocation10 + $0x7a8] ss:$36 sps:$4 sm:$0xff]  }
 0x367   :  { %6281 = vmatpush2.bf16.msra.mxu0 %v8611_v51  ;;  %6307 = vmatprep.subr.bf16.mxu1 %v8622_v52  ;;  %v8650_v51 = vld [vmem:[#allocation10 + $0x9e8] ss:$36 sps:$4 sm:$0xff]  }
 0x368   :  { %6282 = vmatprep.subr.bf16.mxu0 %v8619_v42  ;;  %v8655_v52 = vld [vmem:[#allocation10 + $0x764] ss:$36 sps:$4 sm:$0xff]  }
 0x369   :  { %v8653_v42 = vld [vmem:[#allocation10 + $0x760] ss:$36 sps:$4 sm:$0xff]  }
 0x36a   :  { %6308 = vmatpush1.bf16.msra.mxu1 %v8620_v54  ;;  %v8661_v54 = vld [vmem:[#allocation10 + $0x71c] ss:$36 sps:$4 sm:$0xff]  }
 0x36b   :  { %6283 = vmatpush2.bf16.msra.mxu0 %v8617_v55  ;;  %6309 = vmatprep.subr.bf16.mxu1 %v8625_v57  ;;  %v8664_v55 = vld [vmem:[#allocation10 + $0x95c] ss:$36 sps:$4 sm:$0xff]  }
 0x36c   :  { %6334 = vmatprep.subr.bf16.mxu0 %v8628_v60  ;;  %v8659_v57 = vld [vmem:[#allocation10 + $0x718] ss:$36 sps:$4 sm:$0xff]  }
 0x36d   :  { %v5999_v13 = vpop.f32.mrf.mxu1  ;;  %v6040_v27 = vpop.f32.mrf.mxu0  ;;  %v8667_v60 = vld [vmem:[#allocation10 + $0x6d4] ss:$36 sps:$4 sm:$0xff]  }
 0x36e   :  { %v6000_v50 = vadd.f32 %v5999_v13, %v5959_v3  ;;  %6285 = vmatmul.mubr.bf16.vlgmr.msra.gmra.mxu0 %v9448_v12  ;;  %6310 = vmatpush2.bf16.msra.mxu1 %v8623_v62  ;;  %v8668_v62 = vld [vmem:[#allocation10 + $0x910] ss:$36 sps:$4 sm:$0xff]   ;;  %v8674_v3 = vld [vmem:[#allocation10 + $0xf88] ss:$36 sps:$4 sm:$0xff]  }
 0x36f   :  { %6335 = vmatpush1.bf16.msra.mxu0 %v8626_v2  ;;  %6366 = vmatprep.mubr.bf16.mxu0 %v9477_v56  ;;  %v6001_v9 = vpop.f32.mrf.mxu1  ;;  %v6042_v22 = vpop.f32.mrf.mxu0  ;;  %v8676_v2 = vld [vmem:[#allocation10 + $0xf8c] ss:$36 sps:$4 sm:$0xff]   ;;  %v8679_v13 = vld [vmem:[#allocation10 + $0xd04] ss:$36 sps:$4 sm:$0xff]  }
 0x370   :  { %v6002_v4 = vadd.f32 %v6001_v9, %v5961_v63  ;;  %6311 = vmatprep.subr.bf16.mxu1 %v8631_v5  ;;  %6336 = vmatprep.subr.bf16.mxu0 %v8634_v10  ;;  %v6041_v28 = vadd.f32 %v6040_v27, %v6000_v50  ;;  %v8671_v5 = vld [vmem:[#allocation10 + $0xd48] ss:$36 sps:$4 sm:$0xff]   ;;  %v8680_v27 = vld [vmem:[#allocation10 + $0xf40] ss:$36 sps:$4 sm:$0xff]   ;;  %v8686_v9 = vld [vmem:[#allocation10 + $0xef8] ss:$36 sps:$4 sm:$0xff]  }
 0x371   :  { %v6003_v24 = vpop.f32.mrf.mxu1  ;;  %v6044_v26 = vpop.f32.mrf.mxu0  ;;  %v8682_v10 = vld [vmem:[#allocation10 + $0xf44] ss:$36 sps:$4 sm:$0xff]   ;;  %v8688_v50 = vld [vmem:[#allocation10 + $0xefc] ss:$36 sps:$4 sm:$0xff]  }
 0x372   :  { %v6043_v6 = vadd.f32 %v6042_v22, %v6002_v4  ;;  %6312 = vmatpush2.bf16.msra.mxu1 %v8629_v29  ;;  %v8677_v63 = vld [vmem:[#allocation10 + $0xd00] ss:$36 sps:$4 sm:$0xff]   ;;  %v8683_v22 = vld [vmem:[#allocation10 + $0xcb8] ss:$36 sps:$4 sm:$0xff]   ;;  %v8692_v4 = vld [vmem:[#allocation10 + $0xeb0] ss:$36 sps:$4 sm:$0xff]  }
 0x373   :  { %6337 = vmatpush1.bf16.msra.mxu0 %v8632_v18  ;;  %v6004_v31 = vpop.f32.mrf.mxu1  ;;  %v6045_v32 = vpop.f32.mrf.mxu0  ;;  %6313 = vmatprep.subr.bf16.mxu1 %v8637_v35  ;;  %v8685_v29 = vld [vmem:[#allocation10 + $0xcbc] ss:$36 sps:$4 sm:$0xff]   ;;  %v8694_v18 = vld [vmem:[#allocation10 + $0xeb4] ss:$36 sps:$4 sm:$0xff]   ;;  %v8700_v24 = vld [vmem:[#allocation10 + $0xe6c] ss:$36 sps:$4 sm:$0xff]  }
 0x374   :  { %v6870_v36 = vcombine.low %v6041_v28, %v6043_v6  ;;  %6338 = vmatprep.subr.bf16.mxu0 %v8640_v58  ;;  %v8691_v35 = vld [vmem:[#allocation10 + $0xc74] ss:$36 sps:$4 sm:$0xff]   ;;  %v8697_v26 = vld [vmem:[#allocation10 + $0xc2c] ss:$36 sps:$4 sm:$0xff]   ;;  %v8703_v31 = vld [vmem:[#allocation10 + $0xbe4] ss:$36 sps:$4 sm:$0xff]  }
 0x375   :  { %v8689_v58 = vld [vmem:[#allocation10 + $0xc70] ss:$36 sps:$4 sm:$0xff]   ;;  %v8698_v28 = vld [vmem:[#allocation10 + $0xe68] ss:$36 sps:$4 sm:$0xff]   ;;  %v8704_v32 = vld [vmem:[#allocation10 + $0xe20] ss:$36 sps:$4 sm:$0xff]  }
 0x376   :  { %6878 = vst [vmem:[#allocation13] sm:$0xff] %v6870_v36  ;;  %6314 = vmatpush2.bf16.msra.mxu1 %v8635_v30  ;;  %v8695_v6 = vld [vmem:[#allocation10 + $0xc28] ss:$36 sps:$4 sm:$0xff]   ;;  %v8709_v36 = vld [vmem:[#allocation10 + $0xb9c] ss:$36 sps:$4 sm:$0xff]  }
 0x377   :  { %6339 = vmatpush1.bf16.msra.mxu0 %v8638_v33  ;;  %6315 = vmatprep.subr.bf16.mxu1 %v8643_v34  ;;  %v8706_v30 = vld [vmem:[#allocation10 + $0xe24] ss:$36 sps:$4 sm:$0xff]   ;;  %v8712_v34 = vld [vmem:[#allocation10 + $0xddc] ss:$36 sps:$4 sm:$0xff]  }
 0x378   :  { %6340 = vmatprep.subr.bf16.mxu0 %v8646_v11  ;;  %v8701_v33 = vld [vmem:[#allocation10 + $0xbe0] ss:$36 sps:$4 sm:$0xff]   ;;  %v8710_v11 = vld [vmem:[#allocation10 + $0xdd8] ss:$36 sps:$4 sm:$0xff]  }
 0x37a   :  { %6316 = vmatpush2.bf16.msra.mxu1 %v8641_v39  ;;  %v8707_v39 = vld [vmem:[#allocation10 + $0xb98] ss:$36 sps:$4 sm:$0xff]  }
 0x37b   :  { %6341 = vmatpush1.bf16.msra.mxu0 %v8644_v40  ;;  %6317 = vmatprep.subr.bf16.mxu1 %v8649_v48  ;;  %v8718_v40 = vld [vmem:[#allocation10 + $0xd94] ss:$36 sps:$4 sm:$0xff]  }
 0x37c   :  { %6342 = vmatprep.subr.bf16.mxu0 %v8652_v49  ;;  %v8715_v48 = vld [vmem:[#allocation10 + $0xb54] ss:$36 sps:$4 sm:$0xff]  }
 0x37d   :  { %v8716_v49 = vld [vmem:[#allocation10 + $0xd90] ss:$36 sps:$4 sm:$0xff]  }
 0x37e   :  { %6318 = vmatpush2.bf16.msra.mxu1 %v8647_v41  ;;  %v8713_v41 = vld [vmem:[#allocation10 + $0xb50] ss:$36 sps:$4 sm:$0xff]  }
 0x37f   :  { %6343 = vmatpush1.bf16.msra.mxu0 %v8650_v51  ;;  %6319 = vmatprep.subr.bf16.mxu1 %v8655_v52  ;;  %v8721_v51 = vld [vmem:[#allocation10 + $0x11cc] ss:$36 sps:$4 sm:$0xff]  }
 0x380   :  { %6344 = vmatprep.subr.bf16.mxu0 %v8658_v23  ;;  %v8724_v52 = vld [vmem:[#allocation10 + $0x140c] ss:$36 sps:$4 sm:$0xff]   ;;  %v2496_v23 = vrot.slane %v9536_v20, %v1645_v44 }
 0x382   :  { %6320 = vmatpush2.bf16.msra.mxu1 %v8653_v42  ;;  %v8719_v42 = vld [vmem:[#allocation10 + $0x11c8] ss:$36 sps:$4 sm:$0xff]  }
 0x383   :  { %6345 = vmatpush1.bf16.msra.mxu0 %v8656_v53  ;;  %6321 = vmatprep.subr.bf16.mxu1 %v8661_v54  ;;  %v8722_v53 = vld [vmem:[#allocation10 + $0x1408] ss:$36 sps:$4 sm:$0xff]  }
 0x384   :  { %6346 = vmatprep.subr.bf16.mxu0 %v8664_v55  ;;  %v8727_v54 = vld [vmem:[#allocation10 + $0x1184] ss:$36 sps:$4 sm:$0xff]   ;;  %v2500_v55 = vrot.slane %v9536_v20, %v1649_v45 }
 0x386   :  { %6322 = vmatpush2.bf16.msra.mxu1 %v8659_v57  ;;  %v8730_v57 = vld [vmem:[#allocation10 + $0x13c4] ss:$36 sps:$4 sm:$0xff]  }
 0x387   :  { %6347 = vmatpush1.bf16.msra.mxu0 %v8662_v59  ;;  %6323 = vmatprep.subr.bf16.mxu1 %v8667_v60 }
 0x388   :  { %6348 = vmatprep.subr.bf16.mxu0 %v8670_v61 }
 0x38a   :  { %6324 = vmatpush2.bf16.msra.mxu1 %v8665_v19  ;;  %v8725_v19 = vld [vmem:[#allocation10 + $0x1180] ss:$36 sps:$4 sm:$0xff]  }
 0x38b   :  { %6349 = vmatpush1.bf16.msra.mxu0 %v8668_v62  ;;  %6375 = vmatprep.subr.bf16.mxu1 %v8676_v2  ;;  %v8728_v62 = vld [vmem:[#allocation10 + $0x13c0] ss:$36 sps:$4 sm:$0xff]  }
 0x38c   :  { %6350 = vmatprep.subr.bf16.mxu0 %v8673_v21  ;;  %v8733_v2 = vld [vmem:[#allocation10 + $0x113c] ss:$36 sps:$4 sm:$0xff]  }
 0x38d   :  { %6326 = vmatmul.mubr.bf16.vlgmr.msra.gmra.mxu1 %v9475_v16 }
 0x38e   :  { %6376 = vmatpush1.bf16.msra.mxu1 %v8674_v3  ;;  %6407 = vmatprep.mubr.bf16.mxu1 %v9497_v17 }
 0x38f   :  { %6351 = vmatpush2.bf16.msra.mxu0 %v8671_v5  ;;  %6377 = vmatprep.subr.bf16.mxu1 %v8682_v10  ;;  %v8736_v10 = vld [vmem:[#allocation10 + $0x137c] ss:$36 sps:$4 sm:$0xff]  }
 0x390   :  { %6352 = vmatprep.subr.bf16.mxu0 %v8679_v13 }
 0x392   :  { %6378 = vmatpush1.bf16.msra.mxu1 %v8680_v27  ;;  %v8731_v27 = vld [vmem:[#allocation10 + $0x1138] ss:$36 sps:$4 sm:$0xff]  }
 0x393   :  { %6353 = vmatpush2.bf16.msra.mxu0 %v8677_v63  ;;  %6379 = vmatprep.subr.bf16.mxu1 %v8688_v50  ;;  %v8734_v50 = vld [vmem:[#allocation10 + $0x1378] ss:$36 sps:$4 sm:$0xff]  }
 0x394   :  { %6354 = vmatprep.subr.bf16.mxu0 %v8685_v29  ;;  %v8739_v29 = vld [vmem:[#allocation10 + $0x10f4] ss:$36 sps:$4 sm:$0xff]  }
 0x396   :  { %6380 = vmatpush1.bf16.msra.mxu1 %v8686_v9 }
 0x397   :  { %6355 = vmatpush2.bf16.msra.mxu0 %v8683_v22  ;;  %6381 = vmatprep.subr.bf16.mxu1 %v8694_v18  ;;  %v8742_v22 = vld [vmem:[#allocation10 + $0x1334] ss:$36 sps:$4 sm:$0xff]  }
 0x398   :  { %6356 = vmatprep.subr.bf16.mxu0 %v8691_v35  ;;  %v8737_v18 = vld [vmem:[#allocation10 + $0x10f0] ss:$36 sps:$4 sm:$0xff]  }
 0x399   :  { %v8740_v35 = vld [vmem:[#allocation10 + $0x1330] ss:$36 sps:$4 sm:$0xff]  }
 0x39a   :  { %6382 = vmatpush1.bf16.msra.mxu1 %v8692_v4  ;;  %v8745_v4 = vld [vmem:[#allocation10 + $0x10ac] ss:$36 sps:$4 sm:$0xff]  }
 0x39b   :  { %6357 = vmatpush2.bf16.msra.mxu0 %v8689_v58  ;;  %6383 = vmatprep.subr.bf16.mxu1 %v8700_v24  ;;  %v8748_v58 = vld [vmem:[#allocation10 + $0x12ec] ss:$36 sps:$4 sm:$0xff]  }
 0x39c   :  { %6358 = vmatprep.subr.bf16.mxu0 %v8697_v26  ;;  %v8743_v24 = vld [vmem:[#allocation10 + $0x10a8] ss:$36 sps:$4 sm:$0xff]  }
 0x39d   :  { %v8746_v26 = vld [vmem:[#allocation10 + $0x12e8] ss:$36 sps:$4 sm:$0xff]  }
 0x39e   :  { %6384 = vmatpush1.bf16.msra.mxu1 %v8698_v28  ;;  %v8751_v28 = vld [vmem:[#allocation10 + $0x1064] ss:$36 sps:$4 sm:$0xff]  }
 0x39f   :  { %6359 = vmatpush2.bf16.msra.mxu0 %v8695_v6  ;;  %6385 = vmatprep.subr.bf16.mxu1 %v8706_v30  ;;  %v8754_v6 = vld [vmem:[#allocation10 + $0x12a4] ss:$36 sps:$4 sm:$0xff]  }
 0x3a0   :  { %6360 = vmatprep.subr.bf16.mxu0 %v8703_v31  ;;  %v8749_v30 = vld [vmem:[#allocation10 + $0x1060] ss:$36 sps:$4 sm:$0xff]  }
 0x3a1   :  { %v8752_v31 = vld [vmem:[#allocation10 + $0x12a0] ss:$36 sps:$4 sm:$0xff]  }
 0x3a2   :  { %6386 = vmatpush1.bf16.msra.mxu1 %v8704_v32  ;;  %v8757_v32 = vld [vmem:[#allocation10 + $0x101c] ss:$36 sps:$4 sm:$0xff]  }
 0x3a3   :  { %6361 = vmatpush2.bf16.msra.mxu0 %v8701_v33  ;;  %6387 = vmatprep.subr.bf16.mxu1 %v8712_v34  ;;  %v8760_v33 = vld [vmem:[#allocation10 + $0x125c] ss:$36 sps:$4 sm:$0xff]  }
 0x3a4   :  { %6362 = vmatprep.subr.bf16.mxu0 %v8709_v36  ;;  %v8755_v34 = vld [vmem:[#allocation10 + $0x1018] ss:$36 sps:$4 sm:$0xff]  }
 0x3a5   :  { %v8758_v36 = vld [vmem:[#allocation10 + $0x1258] ss:$36 sps:$4 sm:$0xff]  }
 0x3a6   :  { %6388 = vmatpush1.bf16.msra.mxu1 %v8710_v11  ;;  %v8763_v11 = vld [vmem:[#allocation10 + $0xfd4] ss:$36 sps:$4 sm:$0xff]  }
 0x3a7   :  { %6363 = vmatpush2.bf16.msra.mxu0 %v8707_v39  ;;  %6389 = vmatprep.subr.bf16.mxu1 %v8718_v40  ;;  %v8766_v39 = vld [vmem:[#allocation10 + $0x1214] ss:$36 sps:$4 sm:$0xff]  }
 0x3a8   :  { %6364 = vmatprep.subr.bf16.mxu0 %v8715_v48  ;;  %v8761_v40 = vld [vmem:[#allocation10 + $0xfd0] ss:$36 sps:$4 sm:$0xff]  }
 0x3a9   :  { %v8764_v48 = vld [vmem:[#allocation10 + $0x1210] ss:$36 sps:$4 sm:$0xff]  }
 0x3aa   :  { %6390 = vmatpush1.bf16.msra.mxu1 %v8716_v49  ;;  %v8769_v49 = vld [vmem:[#allocation10 + $0x214] ss:$36 sps:$4 sm:$0xff]  }
 0x3ab   :  { %6365 = vmatpush2.bf16.msra.mxu0 %v8713_v41  ;;  %6391 = vmatprep.subr.bf16.mxu1 %v8721_v51  ;;  %v8772_v41 = vld [vmem:[#allocation10 + $0x694] ss:$36 sps:$4 sm:$0xff]  }
 0x3ac   :  { %6416 = vmatprep.subr.bf16.mxu0 %v8724_v52  ;;  %v8767_v51 = vld [vmem:[#allocation10 + $0x210] ss:$36 sps:$4 sm:$0xff]  }
 0x3ad   :  { %v6081_v59 = vpop.f32.mrf.mxu1  ;;  %v8770_v52 = vld [vmem:[#allocation10 + $0x690] ss:$36 sps:$4 sm:$0xff]  }
 0x3ae   :  { %v6082_v60 = vadd.f32 %v6081_v59, %v2496_v23  ;;  %v6122_v61 = vpop.f32.mrf.mxu0  ;;  %6367 = vmatmul.mubr.bf16.vlgmr.msra.gmra.mxu0 %v9499_v43  ;;  %6392 = vmatpush2.bf16.msra.mxu1 %v8719_v42  ;;  %v8775_v23 = vld [vmem:[#allocation10 + $0x1cc] ss:$36 sps:$4 sm:$0xff]   ;;  %v8779_v59 = vld [vmem:[#allocation10 + $0x180] ss:$36 sps:$4 sm:$0xff]  }
 0x3af   :  { %6417 = vmatpush1.bf16.msra.mxu0 %v8722_v53  ;;  %v6083_v44 = vpop.f32.mrf.mxu1  ;;  %6393 = vmatprep.subr.bf16.mxu1 %v8727_v54  ;;  %v8778_v42 = vld [vmem:[#allocation10 + $0x64c] ss:$36 sps:$4 sm:$0xff]  }
 0x3b0   :  { %v9561_v21 = vadd.f32 %v6122_v61, %v6082_v60  ;;  %v6084_v3 = vadd.f32 %v6083_v44, %v2500_v55  ;;  %v6124_v5 = vpop.f32.mrf.mxu0  ;;  %6418 = vmatprep.subr.bf16.mxu0 %v8730_v57  ;;  %6448 = vmatprep.mubr.bf16.mxu0 %v9254_v0  ;;  %v8773_v53 = vld [vmem:[#allocation10 + $0x1c8] ss:$36 sps:$4 sm:$0xff]   ;;  %v8782_v60 = vld [vmem:[#allocation10 + $0x600] ss:$36 sps:$4 sm:$0xff]   ;;  %v8785_v44 = vld [vmem:[#allocation10 + $0x138] ss:$36 sps:$4 sm:$0xff]  }
 0x3b1   :  { %v6085_v45 = vpop.f32.mrf.mxu1  ;;  %v8776_v54 = vld [vmem:[#allocation10 + $0x648] ss:$36 sps:$4 sm:$0xff]   ;;  %v8787_v61 = vld [vmem:[#allocation10 + $0x13c] ss:$36 sps:$4 sm:$0xff]  }
 0x3b2   :  { %v9564_v20 = vadd.f32 %v6124_v5, %v6084_v3  ;;  %v6126_v13 = vpop.f32.mrf.mxu0  ;;  %6394 = vmatpush2.bf16.msra.mxu1 %v8725_v19  ;;  %v8781_v55 = vld [vmem:[#allocation10 + $0x184] ss:$36 sps:$4 sm:$0xff]   ;;  %v8790_v19 = vld [vmem:[#allocation10 + $0x5bc] ss:$36 sps:$4 sm:$0xff]   ;;  %v8796_v3 = vld [vmem:[#allocation10 + $0x574] ss:$36 sps:$4 sm:$0xff]  }
 0x3b3   :  { %6419 = vmatpush1.bf16.msra.mxu0 %v8728_v62  ;;  %v6086_v63 = vpop.f32.mrf.mxu1  ;;  %6395 = vmatprep.subr.bf16.mxu1 %v8733_v2  ;;  %v8784_v57 = vld [vmem:[#allocation10 + $0x604] ss:$36 sps:$4 sm:$0xff]   ;;  %v8788_v62 = vld [vmem:[#allocation10 + $0x5b8] ss:$36 sps:$4 sm:$0xff]   ;;  %v8791_v5 = vld [vmem:[#allocation10 + $0xf0] ss:$36 sps:$4 sm:$0xff]  }
 0x3b4   :  { %v6127_v9 = vpop.f32.mrf.mxu0  ;;  %6420 = vmatprep.subr.bf16.mxu0 %v8736_v10  ;;  %v8793_v2 = vld [vmem:[#allocation10 + $0xf4] ss:$36 sps:$4 sm:$0xff]   ;;  %v8799_v45 = vld [vmem:[#allocation10 + $0xac] ss:$36 sps:$4 sm:$0xff]  }
 0x3b5   :  { %v8794_v10 = vld [vmem:[#allocation10 + $0x570] ss:$36 sps:$4 sm:$0xff]   ;;  %v8800_v63 = vld [vmem:[#allocation10 + $0x528] ss:$36 sps:$4 sm:$0xff]   ;;  %v8803_v9 = vld [vmem:[#allocation10 + $0x60] ss:$36 sps:$4 sm:$0xff]  }
 0x3b6   :  { %6396 = vmatpush2.bf16.msra.mxu1 %v8731_v27  ;;  %v8802_v13 = vld [vmem:[#allocation10 + $0x52c] ss:$36 sps:$4 sm:$0xff]  }
 0x3b7   :  { %6421 = vmatpush1.bf16.msra.mxu0 %v8734_v50  ;;  %6397 = vmatprep.subr.bf16.mxu1 %v8739_v29  ;;  %v8797_v27 = vld [vmem:[#allocation10 + $0xa8] ss:$36 sps:$4 sm:$0xff]  }
 0x3b8   :  { %6422 = vmatprep.subr.bf16.mxu0 %v8742_v22  ;;  %v8805_v50 = vld [vmem:[#allocation10 + $0x64] ss:$36 sps:$4 sm:$0xff]  }
 0x3b9   :  { %v8808_v29 = vld [vmem:[#allocation10 + $0x4e4] ss:$36 sps:$4 sm:$0xff]  }
 0x3ba   :  { %6398 = vmatpush2.bf16.msra.mxu1 %v8737_v18  ;;  %v8806_v22 = vld [vmem:[#allocation10 + $0x4e0] ss:$36 sps:$4 sm:$0xff]  }
 0x3bb   :  { %6423 = vmatpush1.bf16.msra.mxu0 %v8740_v35  ;;  %6399 = vmatprep.subr.bf16.mxu1 %v8745_v4  ;;  %v8811_v18 = vld [vmem:[#allocation10 + $0x1c] ss:$36 sps:$4 sm:$0xff]  }
 0x3bc   :  { %6424 = vmatprep.subr.bf16.mxu0 %v8748_v58  ;;  %v8814_v35 = vld [vmem:[#allocation10 + $0x49c] ss:$36 sps:$4 sm:$0xff]  }
 0x3bd   :  { %v8809_v4 = vld [vmem:[#allocation10 + $0x18] ss:$36 sps:$4 sm:$0xff]  }
 0x3be   :  { %6400 = vmatpush2.bf16.msra.mxu1 %v8743_v24  ;;  %v8812_v58 = vld [vmem:[#allocation10 + $0x498] ss:$36 sps:$4 sm:$0xff]  }
 0x3bf   :  { %6425 = vmatpush1.bf16.msra.mxu0 %v8746_v26  ;;  %6401 = vmatprep.subr.bf16.mxu1 %v8751_v28  ;;  %v8817_v24 = vld [vmem:[#allocation10 + $0x454] ss:$36 sps:$4 sm:$0xff]  }
 0x3c0   :  { %6426 = vmatprep.subr.bf16.mxu0 %v8754_v6  ;;  %v8820_v26 = vld [vmem:[#allocation10 + $0x8d4] ss:$36 sps:$4 sm:$0xff]  }
 0x3c1   :  { %v8815_v28 = vld [vmem:[#allocation10 + $0x450] ss:$36 sps:$4 sm:$0xff]  }
 0x3c2   :  { %6402 = vmatpush2.bf16.msra.mxu1 %v8749_v30  ;;  %v8818_v6 = vld [vmem:[#allocation10 + $0x8d0] ss:$36 sps:$4 sm:$0xff]  }
 0x3c3   :  { %6427 = vmatpush1.bf16.msra.mxu0 %v8752_v31  ;;  %6403 = vmatprep.subr.bf16.mxu1 %v8757_v32  ;;  %v8823_v30 = vld [vmem:[#allocation10 + $0x40c] ss:$36 sps:$4 sm:$0xff]  }
 0x3c4   :  { %6428 = vmatprep.subr.bf16.mxu0 %v8760_v33  ;;  %v8826_v31 = vld [vmem:[#allocation10 + $0x88c] ss:$36 sps:$4 sm:$0xff]  }
 0x3c6   :  { %6404 = vmatpush2.bf16.msra.mxu1 %v8755_v34  ;;  %v8821_v34 = vld [vmem:[#allocation10 + $0x408] ss:$36 sps:$4 sm:$0xff]  }
 0x3c7   :  { %6429 = vmatpush1.bf16.msra.mxu0 %v8758_v36  ;;  %6405 = vmatprep.subr.bf16.mxu1 %v8763_v11  ;;  %v8824_v11 = vld [vmem:[#allocation10 + $0x888] ss:$36 sps:$4 sm:$0xff]  }
 0x3c8   :  { %6430 = vmatprep.subr.bf16.mxu0 %v8766_v39  ;;  %v8829_v39 = vld [vmem:[#allocation10 + $0x3c4] ss:$36 sps:$4 sm:$0xff]  }
 0x3ca   :  { %6406 = vmatpush2.bf16.msra.mxu1 %v8761_v40 }
 0x3cb   :  { %6431 = vmatpush1.bf16.msra.mxu0 %v8764_v48  ;;  %6457 = vmatprep.subr.bf16.mxu1 %v8769_v49  ;;  %v8832_v48 = vld [vmem:[#allocation10 + $0x844] ss:$36 sps:$4 sm:$0xff]  }
 0x3cc   :  { %6498 = vmatprep.subr.bf16.mxu0 %v8772_v41 }
 0x3cd   :  { %6408 = vmatmul.mubr.bf16.vlgmr.msra.gmra.mxu1 %v9506_v15 }
 0x3ce   :  { %6449 = vmatmul.mubr.bf16.vlgmr.msra.gmra.mxu0 %v9508_v1  ;;  %6458 = vmatpush1.bf16.msra.mxu1 %v8767_v51  ;;  %v8827_v51 = vld [vmem:[#allocation10 + $0x3c0] ss:$36 sps:$4 sm:$0xff]  }
 0x3cf   :  { %6489 = vmatprep.mubr.bf16.mxu1 %v9446_v8  ;;  %6499 = vmatpush1.bf16.msra.mxu0 %v8770_v52 }
 0x3d0   :  { %6530 = vmatprep.mubr.bf16.mxu0 %v9473_v7  ;;  %6459 = vmatprep.subr.bf16.mxu1 %v8775_v23  ;;  %v8830_v23 = vld [vmem:[#allocation10 + $0x840] ss:$36 sps:$4 sm:$0xff]  }
 0x3d1   :  { %6500 = vmatprep.subr.bf16.mxu0 %v8778_v42  ;;  %v8835_v42 = vld [vmem:[#allocation10 + $0x37c] ss:$36 sps:$4 sm:$0xff]  }
 0x3d2   :  { %6460 = vmatpush1.bf16.msra.mxu1 %v8773_v53 }
 0x3d3   :  { %6501 = vmatpush1.bf16.msra.mxu0 %v8776_v54  ;;  %6461 = vmatprep.subr.bf16.mxu1 %v8781_v55  ;;  %v8838_v54 = vld [vmem:[#allocation10 + $0x7fc] ss:$36 sps:$4 sm:$0xff]  }
 0x3d4   :  { %6502 = vmatprep.subr.bf16.mxu0 %v8784_v57  ;;  %v8833_v55 = vld [vmem:[#allocation10 + $0x378] ss:$36 sps:$4 sm:$0xff]  }
 0x3d5   :  { %v8836_v57 = vld [vmem:[#allocation10 + $0x7f8] ss:$36 sps:$4 sm:$0xff]  }
 0x3d6   :  { %6462 = vmatpush1.bf16.msra.mxu1 %v8779_v59  ;;  %v8841_v59 = vld [vmem:[#allocation10 + $0x334] ss:$36 sps:$4 sm:$0xff]  }
 0x3d7   :  { %6503 = vmatpush1.bf16.msra.mxu0 %v8782_v60  ;;  %6463 = vmatprep.subr.bf16.mxu1 %v8787_v61  ;;  %v8844_v60 = vld [vmem:[#allocation10 + $0x7b4] ss:$36 sps:$4 sm:$0xff]  }
 0x3d8   :  { %6504 = vmatprep.subr.bf16.mxu0 %v8790_v19  ;;  %v8839_v61 = vld [vmem:[#allocation10 + $0x330] ss:$36 sps:$4 sm:$0xff]  }
 0x3d9   :  { %v8842_v19 = vld [vmem:[#allocation10 + $0x7b0] ss:$36 sps:$4 sm:$0xff]  }
 0x3da   :  { %6464 = vmatpush1.bf16.msra.mxu1 %v8785_v44  ;;  %v8847_v44 = vld [vmem:[#allocation10 + $0x2ec] ss:$36 sps:$4 sm:$0xff]  }
 0x3db   :  { %6505 = vmatpush1.bf16.msra.mxu0 %v8788_v62  ;;  %6465 = vmatprep.subr.bf16.mxu1 %v8793_v2  ;;  %v8850_v62 = vld [vmem:[#allocation10 + $0x76c] ss:$36 sps:$4 sm:$0xff]  }
 0x3dc   :  { %6506 = vmatprep.subr.bf16.mxu0 %v8796_v3  ;;  %v8845_v2 = vld [vmem:[#allocation10 + $0x2e8] ss:$36 sps:$4 sm:$0xff]  }
 0x3dd   :  { %v8848_v3 = vld [vmem:[#allocation10 + $0x768] ss:$36 sps:$4 sm:$0xff]  }
 0x3de   :  { %6466 = vmatpush1.bf16.msra.mxu1 %v8791_v5  ;;  %v8853_v5 = vld [vmem:[#allocation10 + $0x2a4] ss:$36 sps:$4 sm:$0xff]  }
 0x3df   :  { %6507 = vmatpush1.bf16.msra.mxu0 %v8794_v10  ;;  %6467 = vmatprep.subr.bf16.mxu1 %v8799_v45  ;;  %v8856_v10 = vld [vmem:[#allocation10 + $0x724] ss:$36 sps:$4 sm:$0xff]  }
 0x3e0   :  { %6508 = vmatprep.subr.bf16.mxu0 %v8802_v13  ;;  %v8851_v45 = vld [vmem:[#allocation10 + $0x2a0] ss:$36 sps:$4 sm:$0xff]  }
 0x3e1   :  { %v8854_v13 = vld [vmem:[#allocation10 + $0x720] ss:$36 sps:$4 sm:$0xff]  }
 0x3e2   :  { %6468 = vmatpush1.bf16.msra.mxu1 %v8797_v27  ;;  %v8859_v27 = vld [vmem:[#allocation10 + $0x25c] ss:$36 sps:$4 sm:$0xff]  }
 0x3e3   :  { %6509 = vmatpush1.bf16.msra.mxu0 %v8800_v63  ;;  %6469 = vmatprep.subr.bf16.mxu1 %v8805_v50  ;;  %v8862_v63 = vld [vmem:[#allocation10 + $0x6dc] ss:$36 sps:$4 sm:$0xff]  }
 0x3e4   :  { %6510 = vmatprep.subr.bf16.mxu0 %v8808_v29  ;;  %v8857_v50 = vld [vmem:[#allocation10 + $0x258] ss:$36 sps:$4 sm:$0xff]  }
 0x3e5   :  { %v8860_v29 = vld [vmem:[#allocation10 + $0x6d8] ss:$36 sps:$4 sm:$0xff]  }
 0x3e6   :  { %6470 = vmatpush1.bf16.msra.mxu1 %v8803_v9  ;;  %v8865_v9 = vld [vmem:[#allocation10 + $0xb14] ss:$36 sps:$4 sm:$0xff]  }
 0x3e7   :  { %6511 = vmatpush1.bf16.msra.mxu0 %v8806_v22  ;;  %6471 = vmatprep.subr.bf16.mxu1 %v8811_v18  ;;  %v8868_v22 = vld [vmem:[#allocation10 + $0xf94] ss:$36 sps:$4 sm:$0xff]  }
 0x3e8   :  { %6512 = vmatprep.subr.bf16.mxu0 %v8814_v35 }
 0x3ea   :  { %6472 = vmatpush1.bf16.msra.mxu1 %v8809_v4  ;;  %v8863_v4 = vld [vmem:[#allocation10 + $0xb10] ss:$36 sps:$4 sm:$0xff]  }
 0x3eb   :  { %6513 = vmatpush1.bf16.msra.mxu0 %v8812_v58  ;;  %6473 = vmatprep.subr.bf16.mxu1 %v8817_v24  ;;  %v8866_v58 = vld [vmem:[#allocation10 + $0xf90] ss:$36 sps:$4 sm:$0xff]  }
 0x3ec   :  { %6514 = vmatprep.subr.bf16.mxu0 %v8820_v26  ;;  %v8871_v24 = vld [vmem:[#allocation10 + $0xacc] ss:$36 sps:$4 sm:$0xff]  }
 0x3ed   :  { %v9570_v32 = vpop.f32.mrf.mxu1 }
 0x3ee   :  { %v9572_v33 = vpop.f32.mrf.mxu0  ;;  %6474 = vmatpush2.bf16.msra.mxu1 %v8815_v28  ;;  %v6164_v18 = vadd.f32 %v9570_v32, %v9561_v21  ;;  %v8874_v28 = vld [vmem:[#allocation10 + $0xf4c] ss:$36 sps:$4 sm:$0xff]   ;;  %v8877_v32 = vld [vmem:[#allocation10 + $0xa84] ss:$36 sps:$4 sm:$0xff]  }
 0x3ef   :  { %6515 = vmatpush2.bf16.msra.mxu0 %v8818_v6  ;;  %v6165_v36 = vpop.f32.mrf.mxu1  ;;  %6475 = vmatprep.subr.bf16.mxu1 %v8823_v30  ;;  %v8869_v21 = vld [vmem:[#allocation10 + $0xac8] ss:$36 sps:$4 sm:$0xff]  }
 0x3f0   :  { %v9574_v40 = vpop.f32.mrf.mxu0  ;;  %6516 = vmatprep.subr.bf16.mxu0 %v8826_v31  ;;  %v6166_v35 = vadd.f32 %v6165_v36, %v9564_v20  ;;  %v6205_v6 = vadd.f32 %v9572_v33, %v6164_v18  ;;  %v8872_v31 = vld [vmem:[#allocation10 + $0xf48] ss:$36 sps:$4 sm:$0xff]  }
 0x3f1   :  { %v6167_v49 = vpop.f32.mrf.mxu1  ;;  %v8917_v18 = vld [vmem:[#allocation10 + $0xd08] ss:$36 sps:$4 sm:$0xff]  }
 0x3f2   :  { %v6208_v41 = vpop.f32.mrf.mxu0  ;;  %6476 = vmatpush2.bf16.msra.mxu1 %v8821_v34  ;;  %v6207_v30 = vadd.f32 %v9574_v40, %v6166_v35  ;;  %v8875_v40 = vld [vmem:[#allocation10 + $0xa80] ss:$36 sps:$4 sm:$0xff]   ;;  %v8920_v35 = vld [vmem:[#allocation10 + $0x1188] ss:$36 sps:$4 sm:$0xff]  }
 0x3f3   :  { %6517 = vmatpush2.bf16.msra.mxu0 %v8824_v11  ;;  %v6168_v52 = vpop.f32.mrf.mxu1  ;;  %6477 = vmatprep.subr.bf16.mxu1 %v8829_v39  ;;  %v8880_v11 = vld [vmem:[#allocation10 + $0xf04] ss:$36 sps:$4 sm:$0xff]   ;;  %v8883_v41 = vld [vmem:[#allocation10 + $0xa3c] ss:$36 sps:$4 sm:$0xff]  }
 0x3f4   :  { %v6209_v53 = vpop.f32.mrf.mxu0  ;;  %6518 = vmatprep.subr.bf16.mxu0 %v8832_v48  ;;  %v8878_v49 = vld [vmem:[#allocation10 + $0xf00] ss:$36 sps:$4 sm:$0xff]   ;;  %v8881_v52 = vld [vmem:[#allocation10 + $0xa38] ss:$36 sps:$4 sm:$0xff]  }
 0x3f5   :  { %v8892_v53 = vld [vmem:[#allocation10 + $0xe74] ss:$36 sps:$4 sm:$0xff]  }
 0x3f6   :  { %6478 = vmatpush2.bf16.msra.mxu1 %v8827_v51  ;;  %v8886_v51 = vld [vmem:[#allocation10 + $0xebc] ss:$36 sps:$4 sm:$0xff]  }
 0x3f7   :  { %6519 = vmatpush2.bf16.msra.mxu0 %v8830_v23  ;;  %6479 = vmatprep.subr.bf16.mxu1 %v8835_v42  ;;  %v8884_v23 = vld [vmem:[#allocation10 + $0xeb8] ss:$36 sps:$4 sm:$0xff]  }
 0x3f8   :  { %6520 = vmatprep.subr.bf16.mxu0 %v8838_v54  ;;  %v8889_v42 = vld [vmem:[#allocation10 + $0x9f4] ss:$36 sps:$4 sm:$0xff]  }
 0x3f9   :  { %v8887_v54 = vld [vmem:[#allocation10 + $0x9f0] ss:$36 sps:$4 sm:$0xff]  }
 0x3fa   :  { %6480 = vmatpush2.bf16.msra.mxu1 %v8833_v55  ;;  %v8890_v55 = vld [vmem:[#allocation10 + $0xe70] ss:$36 sps:$4 sm:$0xff]  }
 0x3fb   :  { %6521 = vmatpush2.bf16.msra.mxu0 %v8836_v57  ;;  %6481 = vmatprep.subr.bf16.mxu1 %v8841_v59  ;;  %v8895_v57 = vld [vmem:[#allocation10 + $0x9ac] ss:$36 sps:$4 sm:$0xff]  }
 0x3fc   :  { %6522 = vmatprep.subr.bf16.mxu0 %v8844_v60  ;;  %v8898_v59 = vld [vmem:[#allocation10 + $0xe2c] ss:$36 sps:$4 sm:$0xff]  }
 0x3fd   :  { %v8893_v60 = vld [vmem:[#allocation10 + $0x9a8] ss:$36 sps:$4 sm:$0xff]  }
 0x3fe   :  { %6482 = vmatpush2.bf16.msra.mxu1 %v8839_v61  ;;  %v8896_v61 = vld [vmem:[#allocation10 + $0xe28] ss:$36 sps:$4 sm:$0xff]  }
 0x3ff   :  { %6523 = vmatpush2.bf16.msra.mxu0 %v8842_v19  ;;  %6483 = vmatprep.subr.bf16.mxu1 %v8847_v44  ;;  %v8901_v19 = vld [vmem:[#allocation10 + $0x964] ss:$36 sps:$4 sm:$0xff]  }
 0x400   :  { %6524 = vmatprep.subr.bf16.mxu0 %v8850_v62  ;;  %v8904_v44 = vld [vmem:[#allocation10 + $0xde4] ss:$36 sps:$4 sm:$0xff]  }
 0x401   :  { %v8899_v62 = vld [vmem:[#allocation10 + $0x960] ss:$36 sps:$4 sm:$0xff]  }
 0x402   :  { %6484 = vmatpush2.bf16.msra.mxu1 %v8845_v2  ;;  %v8902_v2 = vld [vmem:[#allocation10 + $0xde0] ss:$36 sps:$4 sm:$0xff]  }
 0x403   :  { %6525 = vmatpush2.bf16.msra.mxu0 %v8848_v3  ;;  %6485 = vmatprep.subr.bf16.mxu1 %v8853_v5  ;;  %v8907_v3 = vld [vmem:[#allocation10 + $0x91c] ss:$36 sps:$4 sm:$0xff]  }
 0x404   :  { %6526 = vmatprep.subr.bf16.mxu0 %v8856_v10  ;;  %v8910_v5 = vld [vmem:[#allocation10 + $0xd9c] ss:$36 sps:$4 sm:$0xff]  }
 0x405   :  { %v8905_v10 = vld [vmem:[#allocation10 + $0x918] ss:$36 sps:$4 sm:$0xff]  }
 0x406   :  { %6486 = vmatpush2.bf16.msra.mxu1 %v8851_v45  ;;  %v8908_v45 = vld [vmem:[#allocation10 + $0xd98] ss:$36 sps:$4 sm:$0xff]  }
 0x407   :  { %6527 = vmatpush2.bf16.msra.mxu0 %v8854_v13  ;;  %6487 = vmatprep.subr.bf16.mxu1 %v8859_v27  ;;  %v8913_v13 = vld [vmem:[#allocation10 + $0xd54] ss:$36 sps:$4 sm:$0xff]  }
 0x408   :  { %6528 = vmatprep.subr.bf16.mxu0 %v8862_v63  ;;  %v8916_v27 = vld [vmem:[#allocation10 + $0x11d4] ss:$36 sps:$4 sm:$0xff]  }
 0x409   :  { %v8911_v63 = vld [vmem:[#allocation10 + $0xd50] ss:$36 sps:$4 sm:$0xff]  }
 0x40a   :  { %6488 = vmatpush2.bf16.msra.mxu1 %v8857_v50  ;;  %v8914_v50 = vld [vmem:[#allocation10 + $0x11d0] ss:$36 sps:$4 sm:$0xff]  }
 0x40b   :  { %6529 = vmatpush2.bf16.msra.mxu0 %v8860_v29  ;;  %6539 = vmatprep.subr.bf16.mxu1 %v8865_v9  ;;  %v8919_v29 = vld [vmem:[#allocation10 + $0xd0c] ss:$36 sps:$4 sm:$0xff]  }
 0x40c   :  { %6580 = vmatprep.subr.bf16.mxu0 %v8868_v22  ;;  %v8922_v9 = vld [vmem:[#allocation10 + $0x118c] ss:$36 sps:$4 sm:$0xff]  }
 0x40d   :  { %v6245_v26 = vpop.f32.mrf.mxu1  ;;  %6490 = vmatmul.mubr.bf16.vlgmr.msra.gmra.mxu1 %v9448_v12 }
 0x40e   :  { %6531 = vmatmul.mubr.bf16.vlgmr.msra.gmra.mxu0 %v9475_v16  ;;  %6540 = vmatpush1.bf16.msra.mxu1 %v8863_v4  ;;  %v6246_v34 = vadd.f32 %v6245_v26, %v6205_v6  ;;  %v8925_v4 = vld [vmem:[#allocation10 + $0xcc4] ss:$36 sps:$4 sm:$0xff]  }
 0x40f   :  { %6571 = vmatprep.mubr.bf16.mxu1 %v9477_v56  ;;  %6581 = vmatpush1.bf16.msra.mxu0 %v8866_v58  ;;  %v6247_v20 = vpop.f32.mrf.mxu1  ;;  %v8926_v6 = vld [vmem:[#allocation10 + $0x1140] ss:$36 sps:$4 sm:$0xff]  }
 0x410   :  { %6612 = vmatprep.mubr.bf16.mxu0 %v9497_v17  ;;  %v6248_v36 = vadd.f32 %v6247_v20, %v6207_v30  ;;  %6541 = vmatprep.subr.bf16.mxu1 %v8871_v24  ;;  %v8928_v24 = vld [vmem:[#allocation10 + $0x1144] ss:$36 sps:$4 sm:$0xff]   ;;  %v8931_v30 = vld [vmem:[#allocation10 + $0xc7c] ss:$36 sps:$4 sm:$0xff]  }
 0x411   :  { %v6249_v39 = vpop.f32.mrf.mxu1  ;;  %6582 = vmatprep.subr.bf16.mxu0 %v8874_v28  ;;  %v8923_v28 = vld [vmem:[#allocation10 + $0xcc0] ss:$36 sps:$4 sm:$0xff]  }
 0x412   :  { %v6871_v33 = vcombine.low %v6246_v34, %v6248_v36  ;;  %6542 = vmatpush1.bf16.msra.mxu1 %v8869_v21  ;;  %v8934_v20 = vld [vmem:[#allocation10 + $0x10fc] ss:$36 sps:$4 sm:$0xff]   ;;  %v8937_v34 = vld [vmem:[#allocation10 + $0xc34] ss:$36 sps:$4 sm:$0xff]  }
 0x413   :  { %6583 = vmatpush1.bf16.msra.mxu0 %v8872_v31  ;;  %v6250_v48 = vpop.f32.mrf.mxu1  ;;  %6543 = vmatprep.subr.bf16.mxu1 %v8877_v32  ;;  %v8929_v31 = vld [vmem:[#allocation10 + $0xc78] ss:$36 sps:$4 sm:$0xff]   ;;  %v8938_v39 = vld [vmem:[#allocation10 + $0x10b0] ss:$36 sps:$4 sm:$0xff]  }
 0x414   :  { %6879 = vst [vmem:[#allocation13 + $0x8] sm:$0xff] %v6871_v33  ;;  %6584 = vmatprep.subr.bf16.mxu0 %v8880_v11  ;;  %v8932_v32 = vld [vmem:[#allocation10 + $0x10f8] ss:$36 sps:$4 sm:$0xff]   ;;  %v8935_v11 = vld [vmem:[#allocation10 + $0xc30] ss:$36 sps:$4 sm:$0xff]  }
 0x415   :  { %v8940_v36 = vld [vmem:[#allocation10 + $0x10b4] ss:$36 sps:$4 sm:$0xff]   ;;  %v8943_v33 = vld [vmem:[#allocation10 + $0xbec] ss:$36 sps:$4 sm:$0xff]  }
 0x416   :  { %6544 = vmatpush1.bf16.msra.mxu1 %v8875_v40  ;;  %v8946_v40 = vld [vmem:[#allocation10 + $0x106c] ss:$36 sps:$4 sm:$0xff]  }
 0x417   :  { %6585 = vmatpush1.bf16.msra.mxu0 %v8878_v49  ;;  %6545 = vmatprep.subr.bf16.mxu1 %v8883_v41  ;;  %v8941_v48 = vld [vmem:[#allocation10 + $0xbe8] ss:$36 sps:$4 sm:$0xff]  }
 0x418   :  { %6586 = vmatprep.subr.bf16.mxu0 %v8886_v51  ;;  %v8944_v49 = vld [vmem:[#allocation10 + $0x1068] ss:$36 sps:$4 sm:$0xff]  }
 0x419   :  { %v8949_v41 = vld [vmem:[#allocation10 + $0xba4] ss:$36 sps:$4 sm:$0xff]  }
 0x41a   :  { %6546 = vmatpush1.bf16.msra.mxu1 %v8881_v52  ;;  %v8952_v51 = vld [vmem:[#allocation10 + $0x1024] ss:$36 sps:$4 sm:$0xff]  }
 0x41b   :  { %6587 = vmatpush1.bf16.msra.mxu0 %v8884_v23  ;;  %6547 = vmatprep.subr.bf16.mxu1 %v8889_v42  ;;  %v8947_v52 = vld [vmem:[#allocation10 + $0xba0] ss:$36 sps:$4 sm:$0xff]  }
 0x41c   :  { %6588 = vmatprep.subr.bf16.mxu0 %v8892_v53  ;;  %v8950_v23 = vld [vmem:[#allocation10 + $0x1020] ss:$36 sps:$4 sm:$0xff]  }
 0x41d   :  { %v8955_v42 = vld [vmem:[#allocation10 + $0xb5c] ss:$36 sps:$4 sm:$0xff]  }
 0x41e   :  { %6548 = vmatpush1.bf16.msra.mxu1 %v8887_v54  ;;  %v8958_v53 = vld [vmem:[#allocation10 + $0xfdc] ss:$36 sps:$4 sm:$0xff]  }
 0x41f   :  { %6589 = vmatpush1.bf16.msra.mxu0 %v8890_v55  ;;  %6549 = vmatprep.subr.bf16.mxu1 %v8895_v57  ;;  %v8953_v54 = vld [vmem:[#allocation10 + $0xb58] ss:$36 sps:$4 sm:$0xff]  }
 0x420   :  { %6590 = vmatprep.subr.bf16.mxu0 %v8898_v59  ;;  %v8956_v55 = vld [vmem:[#allocation10 + $0xfd8] ss:$36 sps:$4 sm:$0xff]  }
 0x421   :  { %v8961_v57 = vld [vmem:[#allocation10 + $0x1414] ss:$36 sps:$4 sm:$0xff]  }
 0x422   :  { %6550 = vmatpush1.bf16.msra.mxu1 %v8893_v60  ;;  %v8962_v59 = vld [vmem:[#allocation10 + $0x458] ss:$36 sps:$4 sm:$0xff]   ;;  %v8959_v60 = vld [vmem:[#allocation10 + $0x1410] ss:$36 sps:$4 sm:$0xff]  }
 0x423   :  { %6591 = vmatpush1.bf16.msra.mxu0 %v8896_v61  ;;  %6551 = vmatprep.subr.bf16.mxu1 %v8901_v19  ;;  %v8963_v61 = vld [vmem:[#allocation10 + $0x218] ss:$36 sps:$4 sm:$0xff]   ;;  %v8966_v19 = vld [vmem:[#allocation10 + $0x13cc] ss:$36 sps:$4 sm:$0xff]  }
 0x424   :  { %6592 = vmatprep.subr.bf16.mxu0 %v8904_v44  ;;  %v8967_v44 = vld [vmem:[#allocation10 + $0x410] ss:$36 sps:$4 sm:$0xff]  }
 0x426   :  { %6552 = vmatpush1.bf16.msra.mxu1 %v8899_v62 }
 0x427   :  { %6593 = vmatpush1.bf16.msra.mxu0 %v8902_v2  ;;  %6553 = vmatprep.subr.bf16.mxu1 %v8907_v3  ;;  %v8964_v2 = vld [vmem:[#allocation10 + $0x13c8] ss:$36 sps:$4 sm:$0xff]  }
 0x428   :  { %6594 = vmatprep.subr.bf16.mxu0 %v8910_v5  ;;  %v8968_v5 = vld [vmem:[#allocation10 + $0x1d0] ss:$36 sps:$4 sm:$0xff]  }
 0x42a   :  { %6554 = vmatpush1.bf16.msra.mxu1 %v8905_v10  ;;  %v8971_v10 = vld [vmem:[#allocation10 + $0x1384] ss:$36 sps:$4 sm:$0xff]  }
 0x42b   :  { %6595 = vmatpush1.bf16.msra.mxu0 %v8908_v45  ;;  %6555 = vmatprep.subr.bf16.mxu1 %v8913_v13  ;;  %v8972_v45 = vld [vmem:[#allocation10 + $0x3c8] ss:$36 sps:$4 sm:$0xff]  }
 0x42c   :  { %6596 = vmatprep.subr.bf16.mxu0 %v8916_v27  ;;  %v8969_v27 = vld [vmem:[#allocation10 + $0x1380] ss:$36 sps:$4 sm:$0xff]  }
 0x42e   :  { %v9585_v22 = vpop.f32.mrf.mxu0  ;;  %6556 = vmatpush2.bf16.msra.mxu1 %v8911_v63 }
 0x42f   :  { %6597 = vmatpush2.bf16.msra.mxu0 %v8914_v50  ;;  %6557 = vmatprep.subr.bf16.mxu1 %v8919_v29  ;;  %v8973_v50 = vld [vmem:[#allocation10 + $0x188] ss:$36 sps:$4 sm:$0xff]   ;;  %v8976_v29 = vld [vmem:[#allocation10 + $0x133c] ss:$36 sps:$4 sm:$0xff]  }
 0x430   :  { %v9587_v58 = vpop.f32.mrf.mxu0  ;;  %6598 = vmatprep.subr.bf16.mxu0 %v8922_v9  ;;  %v8977_v9 = vld [vmem:[#allocation10 + $0x380] ss:$36 sps:$4 sm:$0xff]  }
 0x432   :  { %v6290_v26 = vpop.f32.mrf.mxu0  ;;  %6558 = vmatpush2.bf16.msra.mxu1 %v8917_v18  ;;  %v8978_v18 = vld [vmem:[#allocation10 + $0x140] ss:$36 sps:$4 sm:$0xff]  }
 0x433   :  { %6599 = vmatpush2.bf16.msra.mxu0 %v8920_v35  ;;  %6559 = vmatprep.subr.bf16.mxu1 %v8925_v4  ;;  %v8981_v35 = vld [vmem:[#allocation10 + $0x12f4] ss:$36 sps:$4 sm:$0xff]   ;;  %v8986_v26 = vld [vmem:[#allocation10 + $0x12ac] ss:$36 sps:$4 sm:$0xff]  }
 0x434   :  { %v6291_v21 = vpop.f32.mrf.mxu0  ;;  %6600 = vmatprep.subr.bf16.mxu0 %v8928_v24  ;;  %v8982_v4 = vld [vmem:[#allocation10 + $0x338] ss:$36 sps:$4 sm:$0xff]   ;;  %v8979_v24 = vld [vmem:[#allocation10 + $0x12f0] ss:$36 sps:$4 sm:$0xff]  }
 0x435   :  { %v8991_v21 = vld [vmem:[#allocation10 + $0x1264] ss:$36 sps:$4 sm:$0xff]  }
 0x436   :  { %6560 = vmatpush2.bf16.msra.mxu1 %v8923_v28  ;;  %v8987_v28 = vld [vmem:[#allocation10 + $0x2f0] ss:$36 sps:$4 sm:$0xff]  }
 0x437   :  { %6601 = vmatpush2.bf16.msra.mxu0 %v8926_v6  ;;  %6561 = vmatprep.subr.bf16.mxu1 %v8931_v30  ;;  %v8984_v6 = vld [vmem:[#allocation10 + $0x12a8] ss:$36 sps:$4 sm:$0xff]   ;;  %v8988_v30 = vld [vmem:[#allocation10 + $0xb0] ss:$36 sps:$4 sm:$0xff]  }
 0x438   :  { %6602 = vmatprep.subr.bf16.mxu0 %v8934_v20  ;;  %v8992_v20 = vld [vmem:[#allocation10 + $0x2a8] ss:$36 sps:$4 sm:$0xff]  }
 0x43a   :  { %6562 = vmatpush2.bf16.msra.mxu1 %v8929_v31  ;;  %v8989_v31 = vld [vmem:[#allocation10 + $0x1260] ss:$36 sps:$4 sm:$0xff]  }
 0x43b   :  { %6603 = vmatpush2.bf16.msra.mxu0 %v8932_v32  ;;  %6563 = vmatprep.subr.bf16.mxu1 %v8937_v34  ;;  %v8993_v32 = vld [vmem:[#allocation10 + $0x68] ss:$36 sps:$4 sm:$0xff]   ;;  %v8996_v34 = vld [vmem:[#allocation10 + $0x121c] ss:$36 sps:$4 sm:$0xff]  }
 0x43c   :  { %6604 = vmatprep.subr.bf16.mxu0 %v8940_v36  ;;  %v8997_v36 = vld [vmem:[#allocation10 + $0x260] ss:$36 sps:$4 sm:$0xff]  }
 0x43e   :  { %6564 = vmatpush2.bf16.msra.mxu1 %v8935_v11  ;;  %v8994_v11 = vld [vmem:[#allocation10 + $0x1218] ss:$36 sps:$4 sm:$0xff]  }
 0x43f   :  { %6605 = vmatpush2.bf16.msra.mxu0 %v8938_v39  ;;  %6565 = vmatprep.subr.bf16.mxu1 %v8943_v33  ;;  %v8998_v39 = vld [vmem:[#allocation10 + $0x20] ss:$36 sps:$4 sm:$0xff]   ;;  %v8999_v33 = vld [vmem:[#allocation10 + $0x8d8] ss:$36 sps:$4 sm:$0xff]  }
 0x440   :  { %6606 = vmatprep.subr.bf16.mxu0 %v8946_v40  ;;  %v9000_v40 = vld [vmem:[#allocation10 + $0xd58] ss:$36 sps:$4 sm:$0xff]  }
 0x442   :  { %6566 = vmatpush2.bf16.msra.mxu1 %v8941_v48  ;;  %v9001_v48 = vld [vmem:[#allocation10 + $0x698] ss:$36 sps:$4 sm:$0xff]  }
 0x443   :  { %6607 = vmatpush2.bf16.msra.mxu0 %v8944_v49  ;;  %6567 = vmatprep.subr.bf16.mxu1 %v8949_v41  ;;  %v9002_v49 = vld [vmem:[#allocation10 + $0xb18] ss:$36 sps:$4 sm:$0xff]   ;;  %v9003_v41 = vld [vmem:[#allocation10 + $0x890] ss:$36 sps:$4 sm:$0xff]  }
 0x444   :  { %6608 = vmatprep.subr.bf16.mxu0 %v8952_v51  ;;  %v9004_v51 = vld [vmem:[#allocation10 + $0xd10] ss:$36 sps:$4 sm:$0xff]  }
 0x446   :  { %6568 = vmatpush2.bf16.msra.mxu1 %v8947_v52 }
 0x447   :  { %6609 = vmatpush2.bf16.msra.mxu0 %v8950_v23  ;;  %6569 = vmatprep.subr.bf16.mxu1 %v8955_v42  ;;  %v9005_v23 = vld [vmem:[#allocation10 + $0x650] ss:$36 sps:$4 sm:$0xff]  }
 0x448   :  { %6610 = vmatprep.subr.bf16.mxu0 %v8958_v53  ;;  %v9006_v42 = vld [vmem:[#allocation10 + $0xad0] ss:$36 sps:$4 sm:$0xff]   ;;  %v9007_v53 = vld [vmem:[#allocation10 + $0x848] ss:$36 sps:$4 sm:$0xff]  }
 0x44a   :  { %6570 = vmatpush2.bf16.msra.mxu1 %v8953_v54 }
 0x44b   :  { %6611 = vmatpush2.bf16.msra.mxu0 %v8956_v55  ;;  %6621 = vmatprep.subr.bf16.mxu1 %v8961_v57  ;;  %v9008_v55 = vld [vmem:[#allocation10 + $0xcc8] ss:$36 sps:$4 sm:$0xff]  }
 0x44c   :  { %7731 = vmatprep.subr.bf16.mxu0 %v8962_v59  ;;  %v9009_v59 = vld [vmem:[#allocation10 + $0x608] ss:$36 sps:$4 sm:$0xff]  }
 0x44d   :  { %v9589_v62 = vpop.f32.mrf.mxu1  ;;  %6572 = vmatmul.mubr.bf16.vlgmr.msra.gmra.mxu1 %v9499_v43 }
 0x44e   :  { %6613 = vmatmul.mubr.bf16.vlgmr.msra.gmra.mxu0 %v9506_v15  ;;  %6622 = vmatpush1.bf16.msra.mxu1 %v8959_v60  ;;  %v9011_v60 = vld [vmem:[#allocation10 + $0x800] ss:$36 sps:$4 sm:$0xff]  }
 0x44f   :  { %7732 = vmatpush3.bf16.msra.mxu0 %v8963_v61  ;;  %6694 = vmatprep.mubr.bf16.mxu0 %v9446_v8  ;;  %v9594_v3 = vpop.f32.mrf.mxu1  ;;  %v8974_v8 = vld [vmem:[#allocation10 + $0x1338] ss:$36 sps:$4 sm:$0xff]  }
 0x450   :  { %6623 = vmatprep.subr.bf16.mxu1 %v8966_v19  ;;  %7733 = vmatprep.subr.bf16.mxu0 %v8967_v44  ;;  %v9013_v19 = vld [vmem:[#allocation10 + $0x5c0] ss:$36 sps:$4 sm:$0xff]   ;;  %v9015_v44 = vld [vmem:[#allocation10 + $0x7b8] ss:$36 sps:$4 sm:$0xff]  }
 0x451   :  { %v6331_v13 = vpop.f32.mrf.mxu1  ;;  %6653 = vmatprep.mubr.bf16.mxu1 %v9254_v0  ;;  %v8983_v0 = vld [vmem:[#allocation10 + $0xf8] ss:$36 sps:$4 sm:$0xff]  }
 0x452   :  { %6624 = vmatpush1.bf16.msra.mxu1 %v8964_v2  ;;  %v9016_v2 = vld [vmem:[#allocation10 + $0xc38] ss:$36 sps:$4 sm:$0xff]   ;;  %v9020_v13 = vld [vmem:[#allocation10 + $0xbf0] ss:$36 sps:$4 sm:$0xff]  }
 0x453   :  { %7734 = vmatpush3.bf16.msra.mxu0 %v8968_v5  ;;  %v6332_v63 = vpop.f32.mrf.mxu1  ;;  %6625 = vmatprep.subr.bf16.mxu1 %v8971_v10  ;;  %v9017_v5 = vld [vmem:[#allocation10 + $0x578] ss:$36 sps:$4 sm:$0xff]  }
 0x454   :  { %7735 = vmatprep.subr.bf16.mxu0 %v8972_v45  ;;  %v9018_v10 = vld [vmem:[#allocation10 + $0x9f8] ss:$36 sps:$4 sm:$0xff]   ;;  %v9019_v45 = vld [vmem:[#allocation10 + $0x770] ss:$36 sps:$4 sm:$0xff]  }
 0x455   :  { %v9022_v63 = vld [vmem:[#allocation10 + $0x9b0] ss:$36 sps:$4 sm:$0xff]  }
 0x456   :  { %6626 = vmatpush1.bf16.msra.mxu1 %v8969_v27  ;;  %v9021_v27 = vld [vmem:[#allocation10 + $0x530] ss:$36 sps:$4 sm:$0xff]  }
 0x457   :  { %7736 = vmatpush3.bf16.msra.mxu0 %v8973_v50  ;;  %6627 = vmatprep.subr.bf16.mxu1 %v8976_v29  ;;  %v9023_v50 = vld [vmem:[#allocation10 + $0x728] ss:$36 sps:$4 sm:$0xff]  }
 0x458   :  { %7737 = vmatprep.subr.bf16.mxu0 %v8977_v9  ;;  %v9024_v29 = vld [vmem:[#allocation10 + $0xba8] ss:$36 sps:$4 sm:$0xff]  }
 0x459   :  { %v9025_v9 = vld [vmem:[#allocation10 + $0x4e8] ss:$36 sps:$4 sm:$0xff]  }
 0x45a   :  { %6628 = vmatpush1.bf16.msra.mxu1 %v8974_v8  ;;  %v9026_v8 = vld [vmem:[#allocation10 + $0x968] ss:$36 sps:$4 sm:$0xff]  }
 0x45b   :  { %7738 = vmatpush3.bf16.msra.mxu0 %v8978_v18  ;;  %6629 = vmatprep.subr.bf16.mxu1 %v8981_v35  ;;  %v9027_v18 = vld [vmem:[#allocation10 + $0x6e0] ss:$36 sps:$4 sm:$0xff]  }
 0x45c   :  { %7739 = vmatprep.subr.bf16.mxu0 %v8982_v4  ;;  %v9605_v35 = vld [vmem:[#allocation11] sm:$0xff] }
 0x45d   :  { %v2504_v4 = vrot.slane %v9605_v35, %v1653_v14  ;;  %v9032_v14 = vld [vmem:[#allocation10 + $0xf98] ss:$36 sps:$4 sm:$0xff]  }
 0x45e   :  { %6630 = vmatpush1.bf16.msra.mxu1 %v8979_v24  ;;  %v9028_v24 = vld [vmem:[#allocation10 + $0xb60] ss:$36 sps:$4 sm:$0xff]  }
 0x45f   :  { %7740 = vmatpush3.bf16.msra.mxu0 %v8983_v0  ;;  %6631 = vmatprep.subr.bf16.mxu1 %v8986_v26  ;;  %v2508_v0 = vrot.slane %v9605_v35, %v1657_v47  ;;  %v9029_v26 = vld [vmem:[#allocation10 + $0x4a0] ss:$36 sps:$4 sm:$0xff]  }
 0x460   :  { %7741 = vmatprep.subr.bf16.mxu0 %v8987_v28  ;;  %v9030_v28 = vld [vmem:[#allocation10 + $0x920] ss:$36 sps:$4 sm:$0xff]  }
 0x462   :  { %6632 = vmatpush1.bf16.msra.mxu1 %v8984_v6  ;;  %v9031_v6 = vld [vmem:[#allocation10 + $0x11d8] ss:$36 sps:$4 sm:$0xff]  }
 0x463   :  { %7742 = vmatpush3.bf16.msra.mxu0 %v8988_v30  ;;  %6633 = vmatprep.subr.bf16.mxu1 %v8991_v21  ;;  %v6287_v30 = vadd.f32 %v9585_v22, %v2504_v4  ;;  %v6289_v21 = vadd.f32 %v9587_v58, %v2508_v0 }
 0x464   :  { %7743 = vmatprep.subr.bf16.mxu0 %v8992_v20 }
 0x465   :  { %v6328_v20 = vadd.f32 %v9589_v62, %v6287_v30  ;;  %v6330_v47 = vadd.f32 %v9594_v3, %v6289_v21  ;;  %v9035_v62 = vld [vmem:[#allocation10 + $0xf50] ss:$36 sps:$4 sm:$0xff]  }
 0x466   :  { %6634 = vmatpush1.bf16.msra.mxu1 %v8989_v31  ;;  %v9033_v31 = vld [vmem:[#allocation10 + $0x1418] ss:$36 sps:$4 sm:$0xff]  }
 0x467   :  { %7744 = vmatpush3.bf16.msra.mxu0 %v8993_v32  ;;  %6635 = vmatprep.subr.bf16.mxu1 %v8996_v34  ;;  %v9034_v34 = vld [vmem:[#allocation10 + $0x1190] ss:$36 sps:$4 sm:$0xff]  }
 0x468   :  { %7745 = vmatprep.subr.bf16.mxu0 %v8997_v36 }
 0x46a   :  { %6636 = vmatpush1.bf16.msra.mxu1 %v8994_v11 }
 0x46b   :  { %7746 = vmatpush3.bf16.msra.mxu0 %v8998_v39  ;;  %7753 = vmatprep.subr.bf16.mxu1 %v8999_v33  ;;  %v9036_v39 = vld [vmem:[#allocation10 + $0x13d0] ss:$36 sps:$4 sm:$0xff]   ;;  %v9037_v33 = vld [vmem:[#allocation10 + $0x1148] ss:$36 sps:$4 sm:$0xff]  }
 0x46c   :  { %7775 = vmatprep.subr.bf16.mxu0 %v9000_v40 }
 0x46d   :  { %6654 = vmatmul.mubr.bf16.vlgmr.msra.gmra.mxu1 %v9508_v1 }
 0x46e   :  { %v9598_v52 = vpop.f32.mrf.mxu0  ;;  %6695 = vmatmul.mubr.bf16.vlgmr.msra.gmra.mxu0 %v9448_v12  ;;  %7754 = vmatpush3.bf16.msra.mxu1 %v9001_v48  ;;  %v9010_v12 = vld [vmem:[#allocation10 + $0xa88] ss:$36 sps:$4 sm:$0xff]  }
 0x46f   :  { %6734 = vmatprep.mubr.bf16.mxu1 %v9473_v7  ;;  %7776 = vmatpush3.bf16.msra.mxu0 %v9002_v49  ;;  %v9012_v7 = vld [vmem:[#allocation10 + $0xc80] ss:$36 sps:$4 sm:$0xff]   ;;  %v6369_v32 = vadd.f32 %v9598_v52, %v6328_v20  ;;  %v9039_v52 = vld [vmem:[#allocation10 + $0x1388] ss:$36 sps:$4 sm:$0xff]  }
 0x470   :  { %6774 = vmatprep.mubr.bf16.mxu0 %v9477_v56  ;;  %v9603_v54 = vpop.f32.mrf.mxu0  ;;  %7755 = vmatprep.subr.bf16.mxu1 %v9003_v41  ;;  %v9014_v56 = vld [vmem:[#allocation10 + $0xa40] ss:$36 sps:$4 sm:$0xff]  }
 0x471   :  { %7777 = vmatprep.subr.bf16.mxu0 %v9004_v51  ;;  %v6371_v22 = vadd.f32 %v9603_v54, %v6330_v47  ;;  %v9038_v51 = vld [vmem:[#allocation10 + $0xf08] ss:$36 sps:$4 sm:$0xff]   ;;  %v9041_v54 = vld [vmem:[#allocation10 + $0xec0] ss:$36 sps:$4 sm:$0xff]  }
 0x472   :  { %v6372_v57 = vpop.f32.mrf.mxu0  ;;  %7756 = vmatpush3.bf16.msra.mxu1 %v9005_v23  ;;  %v9040_v23 = vld [vmem:[#allocation10 + $0x1100] ss:$36 sps:$4 sm:$0xff]  }
 0x473   :  { %7778 = vmatpush3.bf16.msra.mxu0 %v9006_v42  ;;  %7757 = vmatprep.subr.bf16.mxu1 %v9007_v53  ;;  %v9043_v57 = vld [vmem:[#allocation10 + $0x10b8] ss:$36 sps:$4 sm:$0xff]  }
 0x474   :  { %v6373_v61 = vpop.f32.mrf.mxu0  ;;  %7779 = vmatprep.subr.bf16.mxu0 %v9008_v55  ;;  %v9042_v55 = vld [vmem:[#allocation10 + $0x1340] ss:$36 sps:$4 sm:$0xff]  }
 0x475   :  { %v9047_v61 = vld [vmem:[#allocation10 + $0xe30] ss:$36 sps:$4 sm:$0xff]  }
 0x476   :  { %7758 = vmatpush3.bf16.msra.mxu1 %v9009_v59  ;;  %v9044_v59 = vld [vmem:[#allocation10 + $0xe78] ss:$36 sps:$4 sm:$0xff]  }
 0x477   :  { %7780 = vmatpush3.bf16.msra.mxu0 %v9010_v12  ;;  %7759 = vmatprep.subr.bf16.mxu1 %v9011_v60  ;;  %v9045_v12 = vld [vmem:[#allocation10 + $0x12f8] ss:$36 sps:$4 sm:$0xff]   ;;  %v9046_v60 = vld [vmem:[#allocation10 + $0x1070] ss:$36 sps:$4 sm:$0xff]  }
 0x478   :  { %7781 = vmatprep.subr.bf16.mxu0 %v9012_v7  ;;  %v9048_v7 = vld [vmem:[#allocation10 + $0x12b0] ss:$36 sps:$4 sm:$0xff]  }
 0x47a   :  { %7760 = vmatpush3.bf16.msra.mxu1 %v9013_v19  ;;  %v9049_v19 = vld [vmem:[#allocation10 + $0x1028] ss:$36 sps:$4 sm:$0xff]  }
 0x47b   :  { %7782 = vmatpush3.bf16.msra.mxu0 %v9014_v56  ;;  %7761 = vmatprep.subr.bf16.mxu1 %v9015_v44  ;;  %v9050_v56 = vld [vmem:[#allocation10 + $0xde8] ss:$36 sps:$4 sm:$0xff]  }
 0x47c   :  { %7783 = vmatprep.subr.bf16.mxu0 %v9016_v2  ;;  %v9051_v44 = vld [vmem:[#allocation10 + $0x1268] ss:$36 sps:$4 sm:$0xff]   ;;  %v9052_v2 = vld [vmem:[#allocation10 + $0xfe0] ss:$36 sps:$4 sm:$0xff]  }
 0x47e   :  { %7762 = vmatpush3.bf16.msra.mxu1 %v9017_v5  ;;  %v9053_v5 = vld [vmem:[#allocation10 + $0xda0] ss:$36 sps:$4 sm:$0xff]  }
 0x47f   :  { %7784 = vmatpush3.bf16.msra.mxu0 %v9018_v10  ;;  %7763 = vmatprep.subr.bf16.mxu1 %v9019_v45  ;;  %v9054_v10 = vld [vmem:[#allocation10 + $0x1220] ss:$36 sps:$4 sm:$0xff]   ;;  %v2512_v45 = vrot.slane %v9605_v35, %v1661_v25 }
 0x480   :  { %7785 = vmatprep.subr.bf16.mxu0 %v9020_v13  ;;  %v2516_v13 = vrot.slane %v9605_v35, %v1665_v37 }
 0x482   :  { %7764 = vmatpush3.bf16.msra.mxu1 %v9021_v27 }
 0x483   :  { %7786 = vmatpush3.bf16.msra.mxu0 %v9022_v63  ;;  %7765 = vmatprep.subr.bf16.mxu1 %v9023_v50 }
 0x484   :  { %7787 = vmatprep.subr.bf16.mxu0 %v9024_v29 }
 0x486   :  { %7766 = vmatpush3.bf16.msra.mxu1 %v9025_v9 }
 0x487   :  { %7788 = vmatpush3.bf16.msra.mxu0 %v9026_v8  ;;  %7767 = vmatprep.subr.bf16.mxu1 %v9027_v18 }
 0x488   :  { %7789 = vmatprep.subr.bf16.mxu0 %v9028_v24 }
 0x48a   :  { %7768 = vmatpush3.bf16.msra.mxu1 %v9029_v26 }
 0x48b   :  { %7790 = vmatpush3.bf16.msra.mxu0 %v9030_v28  ;;  %7797 = vmatprep.subr.bf16.mxu1 %v9031_v6 }
 0x48c   :  { %7868 = vmatprep.subr.bf16.mxu0 %v9261_v46 }
 0x48d   :  { %v6409_v36 = vpop.f32.mrf.mxu1  ;;  %6735 = vmatmul.mubr.bf16.vlgmr.msra.gmra.mxu1 %v9475_v16 }
 0x48e   :  { %v6410_v58 = vadd.f32 %v6409_v36, %v6369_v32  ;;  %v6450_v11 = vpop.f32.mrf.mxu0  ;;  %6775 = vmatmul.mubr.bf16.vlgmr.msra.gmra.mxu0 %v9499_v43  ;;  %7798 = vmatpush3.bf16.msra.mxu1 %v9032_v14 }
 0x48f   :  { %6814 = vmatprep.mubr.bf16.mxu1 %v9497_v17  ;;  %7869 = vmatpush3.bf16.msra.mxu0 %v9033_v31  ;;  %v6411_v3 = vpop.f32.mrf.mxu1 }
 0x490   :  { %v6412_v40 = vadd.f32 %v6411_v3, %v6371_v22  ;;  %v6452_v48 = vpop.f32.mrf.mxu0  ;;  %7799 = vmatprep.subr.bf16.mxu1 %v9034_v34  ;;  %7870 = vmatprep.subr.bf16.mxu0 %v9261_v46  ;;  %v6451_v49 = vadd.f32 %v6450_v11, %v6410_v58 }
 0x491   :  { %v6413_v16 = vpop.f32.mrf.mxu1  ;;  %7884 = vmatprep.mubr.msk.bf16.mxu0 %vm9262_vm0, %v9261_v46 }
 0x492   :  { %v6453_v41 = vadd.f32 %v6452_v48, %v6412_v40  ;;  %v6454_v43 = vpop.f32.mrf.mxu0  ;;  %7800 = vmatpush3.bf16.msra.mxu1 %v9035_v62 }
 0x493   :  { %7871 = vmatpush3.bf16.msra.mxu0 %v9036_v39  ;;  %v6414_v17 = vpop.f32.mrf.mxu1  ;;  %7801 = vmatprep.subr.bf16.mxu1 %v9037_v33 }
 0x494   :  { %v6872_v42 = vcombine.low %v6451_v49, %v6453_v41  ;;  %v6455_v53 = vpop.f32.mrf.mxu0  ;;  %7872 = vmatprep.subr.bf16.mxu0 %v9261_v46 }
 0x496   :  { %6880 = vst [vmem:[#allocation13 + $0x10] sm:$0xff] %v6872_v42  ;;  %7802 = vmatpush3.bf16.msra.mxu1 %v9038_v51 }
 0x497   :  { %7873 = vmatpush3.bf16.msra.mxu0 %v9039_v52  ;;  %7803 = vmatprep.subr.bf16.mxu1 %v9040_v23  ;;  %v7064_v52 = vld [vmem:[#allocation11 + $0x8] ss:$0 sm:$0xff] }
 0x498   :  { %7874 = vmatprep.subr.bf16.mxu0 %v9261_v46 }
 0x49a   :  { %7804 = vmatpush3.bf16.msra.mxu1 %v9041_v54 }
 0x49b   :  { %7875 = vmatpush3.bf16.msra.mxu0 %v9042_v55  ;;  %7805 = vmatprep.subr.bf16.mxu1 %v9043_v57 }
 0x49c   :  { %7876 = vmatprep.subr.bf16.mxu0 %v9261_v46 }
 0x49e   :  { %7806 = vmatpush3.bf16.msra.mxu1 %v9044_v59 }
 0x49f   :  { %7877 = vmatpush3.bf16.msra.mxu0 %v9045_v12  ;;  %7807 = vmatprep.subr.bf16.mxu1 %v9046_v60 }
 0x4a0   :  { %7878 = vmatprep.subr.bf16.mxu0 %v9261_v46 }
 0x4a2   :  { %7808 = vmatpush3.bf16.msra.mxu1 %v9047_v61 }
 0x4a3   :  { %7879 = vmatpush3.bf16.msra.mxu0 %v9048_v7  ;;  %7809 = vmatprep.subr.bf16.mxu1 %v9049_v19 }
 0x4a4   :  { %7880 = vmatprep.subr.bf16.mxu0 %v9261_v46 }
 0x4a6   :  { %7810 = vmatpush3.bf16.msra.mxu1 %v9050_v56 }
 0x4a7   :  { %7881 = vmatpush3.bf16.msra.mxu0 %v9051_v44  ;;  %7811 = vmatprep.subr.bf16.mxu1 %v9052_v2 }
 0x4a8   :  { %7882 = vmatprep.subr.bf16.mxu0 %v9261_v46 }
 0x4aa   :  { %7812 = vmatpush3.bf16.msra.mxu1 %v9053_v5 }
 0x4ab   :  { %7883 = vmatpush3.bf16.msra.mxu0 %v9054_v10 }
 0x4ad   :  { %6815 = vmatmul.mubr.bf16.vlgmr.msra.gmra.mxu1 %v9506_v15 }
 0x4ae   :  { %7885 = vmatmul.mubr.bf16.vlgmr.msra.gmra.mxu0 %v9508_v1 }
 0x4cd   :  { %v6491_v27 = vpop.f32.mrf.mxu1 }
 0x4ce   :  { %v6492_v63 = vadd.f32 %v6491_v27, %v2512_v45  ;;  %v6532_v50 = vpop.f32.mrf.mxu0 }
 0x4cf   :  { %v6493_v29 = vpop.f32.mrf.mxu1 }
 0x4d0   :  { %v6533_v9 = vadd.f32 %v6532_v50, %v6492_v63  ;;  %v6494_v46 = vadd.f32 %v6493_v29, %v2516_v13  ;;  %v6534_v8 = vpop.f32.mrf.mxu0 }
 0x4d1   :  { %v6495_v18 = vpop.f32.mrf.mxu1 }
 0x4d2   :  { %v6535_v4 = vadd.f32 %v6534_v8, %v6494_v46  ;;  %v6536_v15 = vpop.f32.mrf.mxu0 }
 0x4d3   :  { %v6496_v24 = vpop.f32.mrf.mxu1 }
 0x4d4   :  { %v6537_v1 = vpop.f32.mrf.mxu0 }
 0x50d   :  { %v6573_v0 = vpop.f32.mrf.mxu1 }
 0x50e   :  { %v6614_v26 = vpop.f32.mrf.mxu0  ;;  %v6574_v35 = vadd.f32 %v6573_v0, %v6533_v9 }
 0x50f   :  { %v6575_v28 = vpop.f32.mrf.mxu1 }
 0x510   :  { %v6616_v25 = vpop.f32.mrf.mxu0  ;;  %v6576_v21 = vadd.f32 %v6575_v28, %v6535_v4  ;;  %v6615_v14 = vadd.f32 %v6614_v26, %v6574_v35 }
 0x511   :  { %v6577_v6 = vpop.f32.mrf.mxu1 }
 0x512   :  { %v6618_v38 = vpop.f32.mrf.mxu0  ;;  %v6617_v31 = vadd.f32 %v6616_v25, %v6576_v21 }
 0x513   :  { %v6578_v30 = vpop.f32.mrf.mxu1 }
 0x514   :  { %v6619_v37 = vpop.f32.mrf.mxu0 }
 0x52d   :  { %v6655_v20 = vpop.f32.mrf.mxu1 }
 0x52e   :  { %v7747_v47 = vpop.f32.mrf.mxu0  ;;  %v6656_v34 = vadd.f32 %v6655_v20, %v6615_v14 }
 0x52f   :  { %v6657_v32 = vpop.f32.mrf.mxu1 }
 0x530   :  { %v6658_v36 = vadd.f32 %v6657_v32, %v6617_v31  ;;  %v7748_v22 = vpop.f32.mrf.mxu0 }
 0x531   :  { %v6659_v58 = vpop.f32.mrf.mxu1  ;;  %v7749_v17 = vadd.f32 %v7748_v22, %v7747_v47 }
 0x532   :  { %v6873_v11 = vcombine.low %v6656_v34, %v6658_v36  ;;  %v7750_v62 = vpop.f32.mrf.mxu0 }
 0x533   :  { %v6660_v3 = vpop.f32.mrf.mxu1  ;;  %v6697_v42 = vadd.f32 %v7749_v17, %v7064_v52 }
 0x534   :  { %6881 = vst [vmem:[#allocation13 + $0x18] sm:$0xff] %v6873_v11  ;;  %v7751_v39 = vpop.f32.mrf.mxu0 }
 0x54d   :  { %v7769_v33 = vpop.f32.mrf.mxu1 }
 0x54e   :  { %v7791_v40 = vpop.f32.mrf.mxu0 }
 0x54f   :  { %v7770_v48 = vpop.f32.mrf.mxu1 }
 0x550   :  { %v7792_v16 = vpop.f32.mrf.mxu0  ;;  %v7771_v23 = vadd.f32 %v7770_v48, %v7769_v33 }
 0x551   :  { %v7772_v49 = vpop.f32.mrf.mxu1  ;;  %v7793_v55 = vadd.f32 %v7792_v16, %v7791_v40 }
 0x552   :  { %v7794_v41 = vpop.f32.mrf.mxu0  ;;  %v6737_v53 = vadd.f32 %v7771_v23, %v6697_v42 }
 0x553   :  { %v7773_v43 = vpop.f32.mrf.mxu1 }
 0x554   :  { %v7795_v51 = vpop.f32.mrf.mxu0  ;;  %v6777_v12 = vadd.f32 %v7793_v55, %v6737_v53 }
 0x56d   :  { %v7813_v54 = vpop.f32.mrf.mxu1 }
 0x56e   :  { %v6856_v57 = vpop.f32.mrf.mxu0 }
 0x56f   :  { %v7814_v59 = vpop.f32.mrf.mxu1 }
 0x570   :  { %v7815_v60 = vadd.f32 %v7814_v59, %v7813_v54  ;;  %v7886_v61 = vpop.f32.mrf.mxu0 }
 0x571   :  { %v7816_v7 = vpop.f32.mrf.mxu1 }
 0x572   :  { %v6817_v19 = vadd.f32 %v7815_v60, %v6777_v12  ;;  %v6859_v56 = vpop.f32.mrf.mxu0 }
 0x573   :  { %v7817_v44 = vpop.f32.mrf.mxu1 }
 0x574   :  { %v6857_v2 = vadd.f32 %v6856_v57, %v6817_v19  ;;  %v7887_v5 = vpop.f32.mrf.mxu0 }
 0x576   :  { %6882 = vst [vmem:[#allocation13 + $0x20] sm:$0xf] %v6857_v2 }
 0x577   :  { %9227 = shalt.err (!%p9224_p6)
}
 0x578   :  { %6892 = dma.vmem_to_hbm [thread:$0]  %s6890_s6, 576, %s9650_s7, [#allocation4]  }
 0x579   :  { %9244 = dma.done.wait [#allocation4], 576  }
 0x57a   :  { %9245 = vsyncadd [#allocation4], 4294966720 }
 0x57b   :  { %6896 = vsyncpa [#allocation3], 1 }
 0x57c   :  { %6897 = vsyncpa [#allocation6], 1 }
 0x57d   :  { %6898 = vsyncpa [#allocation9], 1 }
 0x57e   :  { %6899 = vsyncpa [#allocation12], 1 }
 0x57f   :  { %6900 = vsyncpa [#allocation4], 1 }

</bundles_post_ra>
